<compile_context>
chip_gen: v7x
topology: tpu7x:2x2x1
jax: 0.10.0
libtpu: 0.0.40
codegen_flags: <defaults>
</compile_context>

<pallas_src>
import numpy as np
import jax
import jax.numpy as jnp
from jax.experimental import pallas as pl
from jax.experimental.pallas import tpu as pltpu


# ----------------------------------------------------------------------------
# small helpers
# ----------------------------------------------------------------------------
_VMEM = pl.BlockSpec(memory_space=pltpu.MemorySpace.VMEM)
_PAD_LANES = 128  # per-model lane-dense block width (head + KD feature + pad)


def _sum_to_11(x2d):
    """Reduce a 2D tile to shape (1, 1) while staying >= rank-2."""
    return jnp.sum(jnp.sum(x2d, axis=1, keepdims=True), axis=0, keepdims=True)


def _chan(slab, c, num_anchors):
    """Channel-major lane slice: channel c for all anchors -> [B, A]."""
    return slab[:, c * num_anchors:(c + 1) * num_anchors]


# ----------------------------------------------------------------------------
# Pallas kernels
# ----------------------------------------------------------------------------
def _matmul_kernel(x_ref, w_ref, o_ref):
    # bf16 MXU operands, f32 accumulation.
    o_ref[...] = jnp.dot(x_ref[...].astype(jnp.bfloat16),
                         w_ref[...].astype(jnp.bfloat16),
                         preferred_element_type=jnp.float32)


def pallas_linear(x, w):
    B = x.shape[0]
    Dout = w.shape[1]
    return pl.pallas_call(
        _matmul_kernel,
        out_shape=jax.ShapeDtypeStruct((B, Dout), jnp.float32),
        in_specs=[_VMEM, _VMEM],
        out_specs=_VMEM,
    )(x, w)


def _make_fused_forward_kernel(modalities, augment, kd_on, head_dim, feat_dim,
                               pad):
    """One kernel: audio-merge prologue + ONE block-sparse bf16 matmul that
    produces the student and all teacher heads/features, + per-teacher KD MSE.

    Ref layout:
      inputs : [audio_flat, <unique non-audio inputs in modality order>, w_big]
      outputs: [out_slab (B, (1+T)*pad)]  (+ [kd_out (1, pad)] when kd_on)
    """
    n_teachers = len(modalities)
    non_audio = [m for m in modalities if m != "audio"]
    n_x = len(non_audio)

    def kernel(*refs):
        audio = refs[0][...]
        if augment and audio.shape[0] >= 2:
            # merge_batch_0_1 fused in; pow-10 / log10 computed from rows 0/1
            # only (not the whole tile), then selected into row 1.
            merged = jnp.log10(
                jnp.maximum(audio[0:1, :] ** 10 + audio[1:2, :] ** 10, 1e-07))
            row = jax.lax.broadcasted_iota(jnp.int32, audio.shape, 0)
            audio = jnp.where(row == 1, merged, audio)

        pieces = [audio] + [refs[1 + i][...] for i in range(n_x)]
        w = refs[1 + n_x][...]                       # bf16 block-sparse weight
        out_ref = refs[2 + n_x]

        x_cat = jnp.concatenate(pieces, axis=1).astype(jnp.bfloat16)
        out = jnp.dot(x_cat, w, preferred_element_type=jnp.float32)
        out_ref[...] = out                           # lane-dense (1+T)*128 store

        if kd_on:
            kd_ref = refs[3 + n_x]
            fs = out[:, head_dim:head_dim + feat_dim]        # student KD feat
            b, f = fs.shape
            inv_n = 1.0 / float(b * f)
            row_f = jax.lax.broadcasted_iota(jnp.int32, fs.shape, 0)
            lane = jax.lax.broadcasted_iota(jnp.int32, (1, pad), 1)
            kd = jnp.zeros((1, pad), jnp.float32)
            for t in range(n_teachers):                      # static unroll
                base = (1 + t) * pad
                ft = out[:, base + head_dim:base + head_dim + feat_dim]
                if augment and b >= 2:
                    # average_batch_0_1 fused in: row1 = (row0 + row1) / 2.
                    avg = (ft[0:1, :] + ft[1:2, :]) * 0.5
                    ft = jnp.where(row_f == 1, avg, ft)
                d = fs - ft
                mse = _sum_to_11(d * d) * inv_n              # (1, 1)
                kd = kd + jnp.where(lane == t, mse, 0.0)
            kd_ref[...] = kd
    return kernel


def _make_det_loss_kernel(num_anchors, num_classes, img_size, out_lanes):
    """Detection loss on lane-dense [B, 128] slabs.

    head slab (channel-major, channel c at lanes [c*A, (c+1)*A)):
      0..3 box logits, 4 objectness (unsupervised), 5..5+K-1 class logits.
    gt slab (channel-major):
      0..3 xyxy GT boxes, 4..4+K-1 one-hot class, 4+K valid-anchor mask.
    Output: (1, 128) with lane 0 = regression loss, lane 1 = classification.
    """
    A, K = num_anchors, num_classes

    def sig(x):
        return pl.reciprocal(1.0 + jnp.exp(-x), approx=True)

    def kernel(head_ref, gt_ref, o_ref):
        head = head_ref[...]
        gt = gt_ref[...]

        # box decode (same cx/cy/w/h -> xyxy parameterization as the GT).
        cx = sig(_chan(head, 0, A)) * img_size
        cy = sig(_chan(head, 1, A)) * img_size
        bw = sig(_chan(head, 2, A)) * img_size
        bh = sig(_chan(head, 3, A)) * img_size
        px1, py1 = cx - 0.5 * bw, cy - 0.5 * bh
        px2, py2 = cx + 0.5 * bw, cy + 0.5 * bh

        mask = _chan(gt, 4 + K, A)                           # [B, A]
        denom = jnp.maximum(_sum_to_11(mask), 1.0)

        def sl1(d):
            ad = jnp.abs(d)
            return jnp.where(ad < 1.0, 0.5 * d * d, ad - 0.5)

        reg_el = (sl1(px1 - _chan(gt, 0, A)) + sl1(py1 - _chan(gt, 1, A))
                  + sl1(px2 - _chan(gt, 2, A)) + sl1(py2 - _chan(gt, 3, A)))
        reg = _sum_to_11(reg_el * mask) / denom

        # masked softmax cross-entropy, channel-major class logits.
        zs = [_chan(head, 5 + k, A) for k in range(K)]
        mx = zs[0]
        for z in zs[1:]:
            mx = jnp.maximum(mx, z)
        se = jnp.zeros_like(mx)
        for z in zs:
            se = se + jnp.exp(z - mx)
        lse = jnp.log(se)
        tgt = jnp.zeros_like(mx)
        for k in range(K):
            tgt = tgt + _chan(gt, 4 + k, A) * (zs[k] - mx)
        ce = lse - tgt                                       # [B, A]
        cls_l = _sum_to_11(ce * mask) / denom

        lane = jax.lax.broadcasted_iota(jnp.int32, (1, out_lanes), 1)
        o_ref[...] = (jnp.where(lane == 0, reg, 0.0)
                      + jnp.where(lane == 1, cls_l, 0.0))
    return kernel


# ----------------------------------------------------------------------------
# on-device greedy NMS + GT assembly (plain jnp inside the same jit)
# ----------------------------------------------------------------------------
def _pairwise_iou(boxes):
    x1, y1, x2, y2 = boxes[:, 0], boxes[:, 1], boxes[:, 2], boxes[:, 3]
    area = jnp.maximum(x2 - x1, 0.0) * jnp.maximum(y2 - y1, 0.0)
    xx1 = jnp.maximum(x1[:, None], x1[None, :])
    yy1 = jnp.maximum(y1[:, None], y1[None, :])
    xx2 = jnp.minimum(x2[:, None], x2[None, :])
    yy2 = jnp.minimum(y2[:, None], y2[None, :])
    inter = jnp.maximum(xx2 - xx1, 0.0) * jnp.maximum(yy2 - yy1, 0.0)
    union = area[:, None] + area[None, :] - inter
    return inter / jnp.maximum(union, 1e-9)


def _nms_assign_gt(boxes, scores, cls_idx, valid, iou_thr, num_out):
    """Greedy NMS (suppress IoU > thr, highest score first) over a fixed-size
    masked candidate pool, then take the first `num_out` kept candidates as
    per-anchor GT (same descending-score, truncated assignment as before)."""
    n = boxes.shape[0]
    s = jnp.where(valid, scores, -jnp.inf)
    order = jnp.argsort(-s)                         # descending, invalid last
    b = boxes[order]
    v = valid[order]
    c = cls_idx[order]
    iou = _pairwise_iou(b)
    idx = jnp.arange(n)

    def body(i, keep):
        sup = jnp.any((idx < i) & keep & (iou[i] > iou_thr))
        return keep.at[i].set(v[i] & jnp.logical_not(sup))

    keep = jax.lax.fori_loop(0, n, body, jnp.zeros((n,), jnp.bool_))
    perm = jnp.argsort(jnp.where(keep, 0, 1))       # stable: kept first
    take = perm[:num_out]
    m = keep[take]
    gt_box = jnp.where(m[:, None], b[take], 0.0)
    gt_cls = jnp.where(m, c[take], 0)
    return gt_box, gt_cls.astype(jnp.int32), m.astype(jnp.float32)


# ----------------------------------------------------------------------------
# synthetic student / teacher detectors (deterministic weights)
# ----------------------------------------------------------------------------
class LinearDetector:
    """Stand-in detector.  The detection head (A*(5+K) logits, channel-major)
    and the KD feature head (F) share one lane-dense [in_dim, 128] weight; the
    fused module path stitches these into a single block-sparse bf16 weight."""

    def __init__(self, key, in_dim, num_anchors, num_classes, feat_dim):
        k1, k2 = jax.random.split(key)
        self.in_dim = in_dim
        self.A = num_anchors
        self.K = num_classes
        self.feat_dim = feat_dim
        self.head_dim = num_anchors * (5 + num_classes)
        total = self.head_dim + feat_dim
        self.out_pad = max(_PAD_LANES, ((total + 127) // 128) * 128)
        w_head = jax.random.normal(k1, (in_dim, self.head_dim), jnp.float32) * 0.02
        w_feat = jax.random.normal(k2, (in_dim, feat_dim), jnp.float32) * 0.02
        w = jnp.zeros((in_dim, self.out_pad), jnp.float32)
        w = w.at[:, :self.head_dim].set(w_head)
        w = w.at[:, self.head_dim:total].set(w_feat)
        self.w_combined = w     # f32 master; fused path uses a bf16 copy

    def __call__(self, x_nchw):
        # Standalone path (the fused module forward uses the block-sparse
        # weight directly).  Head is channel-major; return [B, A, 5+K] logits.
        B = x_nchw.shape[0]
        x = jnp.asarray(x_nchw).reshape(B, -1).astype(jnp.float32)
        out = pallas_linear(x, self.w_combined)
        logits = out[:, :self.head_dim].reshape(B, 5 + self.K, self.A)
        logits = jnp.transpose(logits, (0, 2, 1))
        feats = out[:, self.head_dim:self.head_dim + self.feat_dim]
        return logits, [feats]


# ----------------------------------------------------------------------------
# reference (unfused) KD criterion — used only as an on/off switch on the hot
# path, where the same quantity is computed inside the fused forward kernel.
# ----------------------------------------------------------------------------
def criterion_kd(features_s, features_t):
    fs = features_s[0] if isinstance(features_s, (list, tuple)) else features_s
    ft = features_t[0] if isinstance(features_t, (list, tuple)) else features_t
    d = jnp.asarray(fs, jnp.float32) - jnp.asarray(ft, jnp.float32)
    return jnp.mean(d * d).reshape(1)


# ----------------------------------------------------------------------------
# the module
# ----------------------------------------------------------------------------
class ModelWithNMSLossAugmentedPallas:
    def __init__(self, student_model, teacher_models, criterion_main,
                 criterion_div, criterion_kd, config, valid_classes_dict):
        # TODO(synk): the project-specific criterion_main / logits_to_ground_truth
        # are replaced by a synthetic on-device decode + masked smooth-L1/CE
        # fused into the same jit; criterion_main/criterion_kd act as switches.
        self.criterion_main = criterion_main
        self.criterion_div = criterion_div
        self.criterion_kd = criterion_kd
        self.student_model = student_model
        self.teacher_models = teacher_models
        self.config = config
        self.valid_classes_dict = valid_classes_dict

        self._modalities = tuple(teacher_models.keys())
        self._non_audio = tuple(m for m in self._modalities if m != "audio")
        self._T = len(self._modalities)
        self._A = student_model.A
        self._K = student_model.K
        self._F = student_model.feat_dim
        self._HD = student_model.head_dim
        self._PAD = student_model.out_pad
        self._kd_on = criterion_kd is not None
        assert (5 + self._K) * self._A <= self._PAD

        # valid-class mask (raw class indices drive the CE target; the mapped
        # class values from valid_classes_dict are never consumed downstream).
        valid_mask = np.zeros((self._K,), np.bool_)
        for k in valid_classes_dict:
            k = int(k)
            if 0 <= k < self._K:
                valid_mask[k] = True
        self._valid_mask = jnp.asarray(valid_mask)

        # Block-sparse combined weight: rows grouped by unique input (audio is
        # shared by the student and the audio teacher), columns by model
        # ([student | teachers in modality order], 128 lanes per model).
        in_dims = {"audio": student_model.in_dim}
        for m in self._modalities:
            t = teacher_models[m]
            assert t.out_pad == self._PAD
            if m == "audio":
                assert t.in_dim == student_model.in_dim
            else:
                in_dims[m] = t.in_dim
        unique = ["audio"] + list(self._non_audio)
        row_off, off = {}, 0
        for u in unique:
            row_off[u] = off
            off += in_dims[u]
        n_models = 1 + self._T
        wb = np.zeros((off, n_models * self._PAD), np.float32)

        def place(w, inp, col):
            w = np.asarray(w, np.float32)
            r = row_off[inp]
            wb[r:r + w.shape[0], col:col + w.shape[1]] = w

        place(student_model.w_combined, "audio", 0)
        for t, m in enumerate(self._modalities):
            place(teacher_models[m].w_combined,
                  "audio" if m == "audio" else m, (1 + t) * self._PAD)
        self._w_big = jnp.asarray(wb, jnp.bfloat16)   # bf16 MXU operand

        self._device_step = {}

    # Kept for API compatibility; the hot path fuses these into the kernels.
    def average_batch_0_1(self, features_t):
        out = []
        for f in features_t:
            f = jnp.asarray(f)
            out.append(f.at[1].set((f[0] + f[1]) * 0.5))
        return out

    def merge_batch_0_1(self, audio):
        audio = jnp.asarray(audio)
        merged = jnp.log10(jnp.maximum(audio[0] ** 10 + audio[1] ** 10, 1e-07))
        return audio.at[1].set(merged)

    def _get_device_step(self, augment):
        key = bool(augment)
        if key in self._device_step:
            return self._device_step[key]

        modalities = self._modalities
        T, A, K = self._T, self._A, self._K
        F, HD, PAD = self._F, self._HD, self._PAD
        kd_on = self._kd_on
        n_models = 1 + T
        img_size = float(self.config["img_size"])
        score_thr = float(self.config["score_threshold"])
        iou_thr = 0.5
        gt_used = (5 + K) * A

        fwd_kernel = _make_fused_forward_kernel(modalities, key, kd_on, HD, F, PAD)
        det_kernel = _make_det_loss_kernel(A, K, img_size, PAD)

        def step(audio_flat, other_flats, w_big, valid_mask):
            B = audio_flat.shape[0]
            ins = (audio_flat,) + tuple(other_flats) + (w_big,)

            # --- kernel 1: merge + one bf16 block-sparse matmul + KD MSE ----
            if kd_on:
                out_slab, kd_out = pl.pallas_call(
                    fwd_kernel,
                    out_shape=(
                        jax.ShapeDtypeStruct((B, n_models * PAD), jnp.float32),
                        jax.ShapeDtypeStruct((1, PAD), jnp.float32)),
                    in_specs=[_VMEM] * len(ins),
                    out_specs=(_VMEM, _VMEM),
                )(*ins)
                kd_vec = kd_out[0, :T]
            else:
                out_slab = pl.pallas_call(
                    fwd_kernel,
                    out_shape=jax.ShapeDtypeStruct((B, n_models * PAD), jnp.float32),
                    in_specs=[_VMEM] * len(ins),
                    out_specs=_VMEM,
                )(*ins)
                kd_vec = jnp.zeros((T,), jnp.float32)

            # --- teacher box decode + score/class threshold (jnp, same jit) -
            x1l, y1l, x2l, y2l, scl, cll, vll = [], [], [], [], [], [], []
            for t in range(T):
                th = out_slab[:, (1 + t) * PAD:(1 + t) * PAD + HD]
                cx = jax.nn.sigmoid(_chan(th, 0, A)) * img_size
                cy = jax.nn.sigmoid(_chan(th, 1, A)) * img_size
                bw = jax.nn.sigmoid(_chan(th, 2, A)) * img_size
                bh = jax.nn.sigmoid(_chan(th, 3, A)) * img_size
                score = jax.nn.sigmoid(_chan(th, 4, A))
                cls_logits = jnp.stack([_chan(th, 5 + k, A) for k in range(K)],
                                       axis=-1)
                cls_idx = jnp.argmax(cls_logits, axis=-1).astype(jnp.int32)
                valid = valid_mask[cls_idx] & (score >= score_thr)
                x1l.append(cx - 0.5 * bw)
                y1l.append(cy - 0.5 * bh)
                x2l.append(cx + 0.5 * bw)
                y2l.append(cy + 0.5 * bh)
                scl.append(score)
                cll.append(cls_idx)
                vll.append(valid)
            cboxes = jnp.stack(
                [jnp.concatenate(x1l, 1), jnp.concatenate(y1l, 1),
                 jnp.concatenate(x2l, 1), jnp.concatenate(y2l, 1)], axis=-1)
            cscores = jnp.concatenate(scl, 1)
            ccls = jnp.concatenate(cll, 1)
            cvalid = jnp.concatenate(vll, 1)

            # --- fixed-capacity pool: own candidates + image-0 candidates
            #     injected into image 1 under augment (both non-empty) --------
            img0_boxes = jnp.broadcast_to(cboxes[0:1], cboxes.shape)
            img0_scores = jnp.broadcast_to(cscores[0:1], cscores.shape)
            img0_cls = jnp.broadcast_to(ccls[0:1], ccls.shape)
            if key and B >= 2:
                gate = jnp.any(cvalid[0]) & jnp.any(cvalid[1])
                is_img1 = (jnp.arange(B) == 1)[:, None]
                sec_valid = (jnp.broadcast_to(cvalid[0:1], cvalid.shape)
                             & gate & is_img1)
            else:
                sec_valid = jnp.zeros_like(cvalid)
            pboxes = jnp.concatenate([cboxes, img0_boxes], axis=1)
            pscores = jnp.concatenate([cscores, img0_scores], axis=1)
            pcls = jnp.concatenate([ccls, img0_cls], axis=1)
            pvalid = jnp.concatenate([cvalid, sec_valid], axis=1)

            # --- greedy NMS + GT assembly, vectorized over the batch --------
            gt_box, gt_cls, gt_mask = jax.vmap(
                lambda b_, s_, c_, v_: _nms_assign_gt(b_, s_, c_, v_,
                                                      iou_thr, A)
            )(pboxes, pscores, pcls, pvalid)

            parts = [gt_box[..., 0], gt_box[..., 1],
                     gt_box[..., 2], gt_box[..., 3]]
            for k in range(K):
                parts.append(jnp.where((gt_cls == k) & (gt_mask > 0.5),
                                       1.0, 0.0))
            parts.append(gt_mask)
            if PAD > gt_used:
                parts.append(jnp.zeros((B, PAD - gt_used), jnp.float32))
            gt_slab = jnp.concatenate(parts, axis=1)

            # --- kernel 2: fused detection loss (lane-dense slabs) ----------
            det = pl.pallas_call(
                det_kernel,
                out_shape=jax.ShapeDtypeStruct((1, PAD), jnp.float32),
                in_specs=[_VMEM, _VMEM],
                out_specs=_VMEM,
            )(out_slab[:, :PAD], gt_slab)
            return det[0, 0:1], det[0, 1:2], kd_vec

        fn = jax.jit(step)
        self._device_step[key] = fn
        return fn

    def forward(self, rgb, thermal, depth, audio, label,
                validate=False, augment=False):
        del label, validate   # unused, as in the reference forward
        B = rgb.shape[0]
        modality_inputs = {"rgb": rgb, "audio": audio,
                           "thermal": thermal, "depth": depth}
        for m in self._modalities:
            if m not in modality_inputs:
                raise ValueError("No valid modality to predict from teacher")

        audio_flat = jnp.asarray(audio).reshape(B, -1).astype(jnp.float32)
        other_flats = tuple(
            jnp.asarray(modality_inputs[m]).reshape(B, -1).astype(jnp.float32)
            for m in self._non_audio)

        step = self._get_device_step(bool(augment) and B >= 2)
        loss_reg, loss_cls, kd_vec = step(audio_flat, other_flats,
                                          self._w_big, self._valid_mask)

        if self._kd_on:
            kd_losses = [kd_vec[t:t + 1] for t in range(self._T)]
        else:
            kd_losses = [jnp.zeros((1,), jnp.float32) for _ in range(self._T)]
        zero = jnp.zeros((1,), jnp.float32)
        return [[loss_reg], [loss_cls], kd_losses, zero, zero, zero]


# ----------------------------------------------------------------------------
# main
# ----------------------------------------------------------------------------
if __name__ == "__main__":
    key = jax.random.PRNGKey(0)
    keys = jax.random.split(key, 10)

    B, S = 2, 16
    A, K, F = 8, 4, 32  # anchors, classes, KD feature dim

    rgb = jax.random.normal(keys[0], (B, 3, S, S), jnp.float32)
    thermal = jax.random.normal(keys[1], (B, 1, S, S), jnp.float32)
    depth = jax.random.normal(keys[2], (B, 1, S, S), jnp.float32)
    audio = jax.random.uniform(keys[3], (B, 1, S, S), jnp.float32,
                               minval=0.1, maxval=1.0)
    label = jnp.zeros((B, 1, 5), jnp.float32)

    config = {"img_size": float(S), "score_threshold": 0.3}
    valid_classes_dict = {i: i for i in range(K)}

    student = LinearDetector(keys[4], 1 * S * S, A, K, F)
    teachers = {
        "rgb": LinearDetector(keys[5], 3 * S * S, A, K, F),
        "audio": LinearDetector(keys[6], 1 * S * S, A, K, F),
        "thermal": LinearDetector(keys[7], 1 * S * S, A, K, F),
        "depth": LinearDetector(keys[8], 1 * S * S, A, K, F),
    }

    model = ModelWithNMSLossAugmentedPallas(
        student_model=student,
        teacher_models=teachers,
        criterion_main=None,          # fused on-device (see TODO in __init__)
        criterion_div=None,
        criterion_kd=criterion_kd,
        config=config,
        valid_classes_dict=valid_classes_dict,
    )

    out = model.forward(rgb, thermal, depth, audio, label,
                        validate=False, augment=True)
    jax.block_until_ready(out)
    print("KERNEL_OK")
</pallas_src>

<mosaic_0001>
module attributes {stable_mosaic.version = 11 : i64} {
  func.func @kernel(%arg0: memref<2x256xf32, #tpu.memory_space<vmem>>, %arg1: memref<2x768xf32, #tpu.memory_space<vmem>>, %arg2: memref<2x256xf32, #tpu.memory_space<vmem>>, %arg3: memref<2x256xf32, #tpu.memory_space<vmem>>, %arg4: memref<1536x640xbf16, #tpu.memory_space<vmem>>, %arg5: memref<2x640xf32, #tpu.memory_space<vmem>>, %arg6: memref<1x128xf32, #tpu.memory_space<vmem>>) attributes {dimension_semantics = [], scalar_prefetch = 0 : i64, scratch_operands = 0 : i64, tpu.core_type = #tpu.core_type<tc>} {
    %c0 = arith.constant 0 : index
    %c0_0 = arith.constant 0 : index
    %0 = vector.load %arg0[%c0, %c0_0] : memref<2x256xf32, #tpu.memory_space<vmem>>, vector<2x256xf32>
    %1 = vector.extract_strided_slice %0 {offsets = [0, 0], sizes = [1, 256], strides = [1, 1]} : vector<2x256xf32> to vector<1x256xf32>
    %2 = arith.mulf %1, %1 : vector<1x256xf32>
    %3 = arith.mulf %2, %2 : vector<1x256xf32>
    %4 = arith.mulf %3, %3 : vector<1x256xf32>
    %5 = arith.mulf %2, %4 : vector<1x256xf32>
    %6 = vector.extract_strided_slice %0 {offsets = [1, 0], sizes = [1, 256], strides = [1, 1]} : vector<2x256xf32> to vector<1x256xf32>
    %7 = arith.mulf %6, %6 : vector<1x256xf32>
    %8 = arith.mulf %7, %7 : vector<1x256xf32>
    %9 = arith.mulf %8, %8 : vector<1x256xf32>
    %10 = arith.mulf %7, %9 : vector<1x256xf32>
    %11 = arith.addf %5, %10 : vector<1x256xf32>
    %cst = arith.constant 1.000000e-07 : f32
    %12 = vector.broadcast %cst : f32 to vector<1x256xf32>
    %13 = arith.maximumf %11, %12 : vector<1x256xf32>
    %14 = math.log %13 : vector<1x256xf32>
    %cst_1 = arith.constant 0.434294492 : f32
    %15 = vector.broadcast %cst_1 : f32 to vector<1x256xf32>
    %16 = arith.mulf %14, %15 : vector<1x256xf32>
    %17 = tpu.iota {dimensions = array<i32: 0>} : vector<2x256xi32>
    %c1_i32 = arith.constant 1 : i32
    %18 = vector.broadcast %c1_i32 : i32 to vector<2x256xi32>
    %19 = arith.cmpi eq, %17, %18 : vector<2x256xi32>
    %20 = vector.shape_cast %16 : vector<1x256xf32> to vector<1x256xf32>
    %21 = vector.broadcast %20 : vector<1x256xf32> to vector<2x256xf32>
    %22 = arith.select %19, %21, %0 : vector<2x256xi1>, vector<2x256xf32>
    %c0_2 = arith.constant 0 : index
    %c0_3 = arith.constant 0 : index
    %23 = vector.load %arg1[%c0_2, %c0_3] : memref<2x768xf32, #tpu.memory_space<vmem>>, vector<2x768xf32>
    %c0_4 = arith.constant 0 : index
    %c0_5 = arith.constant 0 : index
    %24 = vector.load %arg2[%c0_4, %c0_5] : memref<2x256xf32, #tpu.memory_space<vmem>>, vector<2x256xf32>
    %c0_6 = arith.constant 0 : index
    %c0_7 = arith.constant 0 : index
    %25 = vector.load %arg3[%c0_6, %c0_7] : memref<2x256xf32, #tpu.memory_space<vmem>>, vector<2x256xf32>
    %c0_8 = arith.constant 0 : index
    %c0_9 = arith.constant 0 : index
    %26 = vector.load %arg4[%c0_8, %c0_9] : memref<1536x640xbf16, #tpu.memory_space<vmem>>, vector<1536x640xbf16>
    %27 = tpu.concatenate %22, %23, %24, %25 in 1 : vector<2x256xf32>, vector<2x768xf32>, vector<2x256xf32>, vector<2x256xf32> -> vector<2x1536xf32>
    %28 = arith.truncf %27 : vector<2x1536xf32> to vector<2x1536xbf16>
    %cst_10 = arith.constant dense<0.000000e+00> : vector<2x640xf32>
    %29 = tpu.matmul %28, %26, %cst_10 {dimension_numbers = #tpu.dot_dimension_numbers<[1], [0], [0], [1], [0, 0, 1, 1], [], []>} : vector<2x1536xbf16>, vector<1536x640xbf16>, vector<2x640xf32> -> vector<2x640xf32>
    %c0_11 = arith.constant 0 : index
    %c0_12 = arith.constant 0 : index
    %30 = vector.load %arg5[%c0_11, %c0_12] : memref<2x640xf32, #tpu.memory_space<vmem>>, vector<2x640xf32>
    tpu.vector_store %arg5[%c0_11, %c0_12], %29 {strides = array<i32>} : memref<2x640xf32, #tpu.memory_space<vmem>>, vector<2x640xf32>,
    %31 = vector.extract_strided_slice %29 {offsets = [0, 72], sizes = [2, 32], strides = [1, 1]} : vector<2x640xf32> to vector<2x32xf32>
    %32 = tpu.iota {dimensions = array<i32: 0>} : vector<2x32xi32>
    %33 = tpu.iota {dimensions = array<i32: 1>} : vector<1x128xi32>
    %cst_13 = arith.constant 0.000000e+00 : f32
    %34 = vector.broadcast %cst_13 : f32 to vector<1x128xf32>
    %35 = vector.extract_strided_slice %29 {offsets = [0, 200], sizes = [2, 32], strides = [1, 1]} : vector<2x640xf32> to vector<2x32xf32>
    %36 = vector.extract_strided_slice %35 {offsets = [0, 0], sizes = [1, 32], strides = [1, 1]} : vector<2x32xf32> to vector<1x32xf32>
    %37 = vector.extract_strided_slice %35 {offsets = [1, 0], sizes = [1, 32], strides = [1, 1]} : vector<2x32xf32> to vector<1x32xf32>
    %38 = arith.addf %36, %37 : vector<1x32xf32>
    %cst_14 = arith.constant 5.000000e-01 : f32
    %39 = vector.broadcast %cst_14 : f32 to vector<1x32xf32>
    %40 = arith.mulf %38, %39 : vector<1x32xf32>
    %c1_i32_15 = arith.constant 1 : i32
    %41 = vector.broadcast %c1_i32_15 : i32 to vector<2x32xi32>
    %42 = arith.cmpi eq, %32, %41 : vector<2x32xi32>
    %43 = vector.shape_cast %40 : vector<1x32xf32> to vector<1x32xf32>
    %44 = vector.broadcast %43 : vector<1x32xf32> to vector<2x32xf32>
    %45 = arith.select %42, %44, %35 : vector<2x32xi1>, vector<2x32xf32>
    %46 = arith.subf %31, %45 : vector<2x32xf32>
    %47 = arith.mulf %46, %46 : vector<2x32xf32>
    %cst_16 = arith.constant dense<0.000000e+00> : vector<2xf32>
    %48 = vector.multi_reduction <add>, %47, %cst_16 [1] : vector<2x32xf32> to vector<2xf32>
    %49 = vector.shape_cast %48 : vector<2xf32> to vector<2x1xf32>
    %cst_17 = arith.constant dense<0.000000e+00> : vector<1xf32>
    %50 = vector.multi_reduction <add>, %49, %cst_17 [0] : vector<2x1xf32> to vector<1xf32>
    %51 = vector.shape_cast %50 : vector<1xf32> to vector<1x1xf32>
    %cst_18 = arith.constant 1.562500e-02 : f32
    %52 = vector.broadcast %cst_18 : f32 to vector<1x1xf32>
    %53 = arith.mulf %51, %52 : vector<1x1xf32>
    %c0_i32 = arith.constant 0 : i32
    %54 = vector.broadcast %c0_i32 : i32 to vector<1x128xi32>
    %55 = arith.cmpi eq, %33, %54 : vector<1x128xi32>
    %cst_19 = arith.constant 0.000000e+00 : f32
    %56 = vector.shape_cast %53 : vector<1x1xf32> to vector<1x1xf32>
    %57 = vector.broadcast %56 : vector<1x1xf32> to vector<1x128xf32>
    %58 = vector.broadcast %cst_19 : f32 to vector<1x128xf32>
    %59 = arith.select %55, %57, %58 : vector<1x128xi1>, vector<1x128xf32>
    %60 = arith.addf %34, %59 : vector<1x128xf32>
    %61 = vector.extract_strided_slice %29 {offsets = [0, 328], sizes = [2, 32], strides = [1, 1]} : vector<2x640xf32> to vector<2x32xf32>
    %62 = vector.extract_strided_slice %61 {offsets = [0, 0], sizes = [1, 32], strides = [1, 1]} : vector<2x32xf32> to vector<1x32xf32>
    %63 = vector.extract_strided_slice %61 {offsets = [1, 0], sizes = [1, 32], strides = [1, 1]} : vector<2x32xf32> to vector<1x32xf32>
    %64 = arith.addf %62, %63 : vector<1x32xf32>
    %cst_20 = arith.constant 5.000000e-01 : f32
    %65 = vector.broadcast %cst_20 : f32 to vector<1x32xf32>
    %66 = arith.mulf %64, %65 : vector<1x32xf32>
    %c1_i32_21 = arith.constant 1 : i32
    %67 = vector.broadcast %c1_i32_21 : i32 to vector<2x32xi32>
    %68 = arith.cmpi eq, %32, %67 : vector<2x32xi32>
    %69 = vector.shape_cast %66 : vector<1x32xf32> to vector<1x32xf32>
    %70 = vector.broadcast %69 : vector<1x32xf32> to vector<2x32xf32>
    %71 = arith.select %68, %70, %61 : vector<2x32xi1>, vector<2x32xf32>
    %72 = arith.subf %31, %71 : vector<2x32xf32>
    %73 = arith.mulf %72, %72 : vector<2x32xf32>
    %cst_22 = arith.constant dense<0.000000e+00> : vector<2xf32>
    %74 = vector.multi_reduction <add>, %73, %cst_22 [1] : vector<2x32xf32> to vector<2xf32>
    %75 = vector.shape_cast %74 : vector<2xf32> to vector<2x1xf32>
    %cst_23 = arith.constant dense<0.000000e+00> : vector<1xf32>
    %76 = vector.multi_reduction <add>, %75, %cst_23 [0] : vector<2x1xf32> to vector<1xf32>
    %77 = vector.shape_cast %76 : vector<1xf32> to vector<1x1xf32>
    %cst_24 = arith.constant 1.562500e-02 : f32
    %78 = vector.broadcast %cst_24 : f32 to vector<1x1xf32>
    %79 = arith.mulf %77, %78 : vector<1x1xf32>
    %c1_i32_25 = arith.constant 1 : i32
    %80 = vector.broadcast %c1_i32_25 : i32 to vector<1x128xi32>
    %81 = arith.cmpi eq, %33, %80 : vector<1x128xi32>
    %cst_26 = arith.constant 0.000000e+00 : f32
    %82 = vector.shape_cast %79 : vector<1x1xf32> to vector<1x1xf32>
    %83 = vector.broadcast %82 : vector<1x1xf32> to vector<1x128xf32>
    %84 = vector.broadcast %cst_26 : f32 to vector<1x128xf32>
    %85 = arith.select %81, %83, %84 : vector<1x128xi1>, vector<1x128xf32>
    %86 = arith.addf %60, %85 : vector<1x128xf32>
    %87 = vector.extract_strided_slice %29 {offsets = [0, 456], sizes = [2, 32], strides = [1, 1]} : vector<2x640xf32> to vector<2x32xf32>
    %88 = vector.extract_strided_slice %87 {offsets = [0, 0], sizes = [1, 32], strides = [1, 1]} : vector<2x32xf32> to vector<1x32xf32>
    %89 = vector.extract_strided_slice %87 {offsets = [1, 0], sizes = [1, 32], strides = [1, 1]} : vector<2x32xf32> to vector<1x32xf32>
    %90 = arith.addf %88, %89 : vector<1x32xf32>
    %cst_27 = arith.constant 5.000000e-01 : f32
    %91 = vector.broadcast %cst_27 : f32 to vector<1x32xf32>
    %92 = arith.mulf %90, %91 : vector<1x32xf32>
    %c1_i32_28 = arith.constant 1 : i32
    %93 = vector.broadcast %c1_i32_28 : i32 to vector<2x32xi32>
    %94 = arith.cmpi eq, %32, %93 : vector<2x32xi32>
    %95 = vector.shape_cast %92 : vector<1x32xf32> to vector<1x32xf32>
    %96 = vector.broadcast %95 : vector<1x32xf32> to vector<2x32xf32>
    %97 = arith.select %94, %96, %87 : vector<2x32xi1>, vector<2x32xf32>
    %98 = arith.subf %31, %97 : vector<2x32xf32>
    %99 = arith.mulf %98, %98 : vector<2x32xf32>
    %cst_29 = arith.constant dense<0.000000e+00> : vector<2xf32>
    %100 = vector.multi_reduction <add>, %99, %cst_29 [1] : vector<2x32xf32> to vector<2xf32>
    %101 = vector.shape_cast %100 : vector<2xf32> to vector<2x1xf32>
    %cst_30 = arith.constant dense<0.000000e+00> : vector<1xf32>
    %102 = vector.multi_reduction <add>, %101, %cst_30 [0] : vector<2x1xf32> to vector<1xf32>
    %103 = vector.shape_cast %102 : vector<1xf32> to vector<1x1xf32>
    %cst_31 = arith.constant 1.562500e-02 : f32
    %104 = vector.broadcast %cst_31 : f32 to vector<1x1xf32>
    %105 = arith.mulf %103, %104 : vector<1x1xf32>
    %c2_i32 = arith.constant 2 : i32
    %106 = vector.broadcast %c2_i32 : i32 to vector<1x128xi32>
    %107 = arith.cmpi eq, %33, %106 : vector<1x128xi32>
    %cst_32 = arith.constant 0.000000e+00 : f32
    %108 = vector.shape_cast %105 : vector<1x1xf32> to vector<1x1xf32>
    %109 = vector.broadcast %108 : vector<1x1xf32> to vector<1x128xf32>
    %110 = vector.broadcast %cst_32 : f32 to vector<1x128xf32>
    %111 = arith.select %107, %109, %110 : vector<1x128xi1>, vector<1x128xf32>
    %112 = arith.addf %86, %111 : vector<1x128xf32>
    %113 = vector.extract_strided_slice %29 {offsets = [0, 584], sizes = [2, 32], strides = [1, 1]} : vector<2x640xf32> to vector<2x32xf32>
    %114 = vector.extract_strided_slice %113 {offsets = [0, 0], sizes = [1, 32], strides = [1, 1]} : vector<2x32xf32> to vector<1x32xf32>
    %115 = vector.extract_strided_slice %113 {offsets = [1, 0], sizes = [1, 32], strides = [1, 1]} : vector<2x32xf32> to vector<1x32xf32>
    %116 = arith.addf %114, %115 : vector<1x32xf32>
    %cst_33 = arith.constant 5.000000e-01 : f32
    %117 = vector.broadcast %cst_33 : f32 to vector<1x32xf32>
    %118 = arith.mulf %116, %117 : vector<1x32xf32>
    %c1_i32_34 = arith.constant 1 : i32
    %119 = vector.broadcast %c1_i32_34 : i32 to vector<2x32xi32>
    %120 = arith.cmpi eq, %32, %119 : vector<2x32xi32>
    %121 = vector.shape_cast %118 : vector<1x32xf32> to vector<1x32xf32>
    %122 = vector.broadcast %121 : vector<1x32xf32> to vector<2x32xf32>
    %123 = arith.select %120, %122, %113 : vector<2x32xi1>, vector<2x32xf32>
    %124 = arith.subf %31, %123 : vector<2x32xf32>
    %125 = arith.mulf %124, %124 : vector<2x32xf32>
    %cst_35 = arith.constant dense<0.000000e+00> : vector<2xf32>
    %126 = vector.multi_reduction <add>, %125, %cst_35 [1] : vector<2x32xf32> to vector<2xf32>
    %127 = vector.shape_cast %126 : vector<2xf32> to vector<2x1xf32>
    %cst_36 = arith.constant dense<0.000000e+00> : vector<1xf32>
    %128 = vector.multi_reduction <add>, %127, %cst_36 [0] : vector<2x1xf32> to vector<1xf32>
    %129 = vector.shape_cast %128 : vector<1xf32> to vector<1x1xf32>
    %cst_37 = arith.constant 1.562500e-02 : f32
    %130 = vector.broadcast %cst_37 : f32 to vector<1x1xf32>
    %131 = arith.mulf %129, %130 : vector<1x1xf32>
    %c3_i32 = arith.constant 3 : i32
    %132 = vector.broadcast %c3_i32 : i32 to vector<1x128xi32>
    %133 = arith.cmpi eq, %33, %132 : vector<1x128xi32>
    %cst_38 = arith.constant 0.000000e+00 : f32
    %134 = vector.shape_cast %131 : vector<1x1xf32> to vector<1x1xf32>
    %135 = vector.broadcast %134 : vector<1x1xf32> to vector<1x128xf32>
    %136 = vector.broadcast %cst_38 : f32 to vector<1x128xf32>
    %137 = arith.select %133, %135, %136 : vector<1x128xi1>, vector<1x128xf32>
    %138 = arith.addf %112, %137 : vector<1x128xf32>
    %c0_39 = arith.constant 0 : index
    %c0_40 = arith.constant 0 : index
    %139 = vector.load %arg6[%c0_39, %c0_40] : memref<1x128xf32, #tpu.memory_space<vmem>>, vector<1x128xf32>
    tpu.vector_store %arg6[%c0_39, %c0_40], %138 {strides = array<i32>} : memref<1x128xf32, #tpu.memory_space<vmem>>, vector<1x128xf32>,
    return
  }
}

module attributes {stable_mosaic.version = 11 : i64} {
  func.func @kernel(%arg0: memref<2x128xf32, #tpu.memory_space<vmem>>, %arg1: memref<2x128xf32, #tpu.memory_space<vmem>>, %arg2: memref<1x128xf32, #tpu.memory_space<vmem>>) attributes {dimension_semantics = [], scalar_prefetch = 0 : i64, scratch_operands = 0 : i64, tpu.core_type = #tpu.core_type<tc>} {
    %c0 = arith.constant 0 : index
    %c0_0 = arith.constant 0 : index
    %0 = vector.load %arg0[%c0, %c0_0] : memref<2x128xf32, #tpu.memory_space<vmem>>, vector<2x128xf32>
    %c0_1 = arith.constant 0 : index
    %c0_2 = arith.constant 0 : index
    %1 = vector.load %arg1[%c0_1, %c0_2] : memref<2x128xf32, #tpu.memory_space<vmem>>, vector<2x128xf32>
    %2 = vector.extract_strided_slice %0 {offsets = [0, 0], sizes = [2, 8], strides = [1, 1]} : vector<2x128xf32> to vector<2x8xf32>
    %cst = arith.constant 0.000000e+00 : f32
    %3 = vector.broadcast %cst : f32 to vector<2x8xf32>
    %4 = arith.subf %3, %2 : vector<2x8xf32>
    %5 = math.exp %4 : vector<2x8xf32>
    %cst_3 = arith.constant 1.000000e+00 : f32
    %6 = vector.broadcast %cst_3 : f32 to vector<2x8xf32>
    %7 = arith.addf %6, %5 : vector<2x8xf32>
    %8 = tpu.reciprocal %7 {approx = true} : vector<2x8xf32> -> vector<2x8xf32>
    %cst_4 = arith.constant 1.600000e+01 : f32
    %9 = vector.broadcast %cst_4 : f32 to vector<2x8xf32>
    %10 = arith.mulf %8, %9 : vector<2x8xf32>
    %11 = vector.extract_strided_slice %0 {offsets = [0, 8], sizes = [2, 8], strides = [1, 1]} : vector<2x128xf32> to vector<2x8xf32>
    %cst_5 = arith.constant 0.000000e+00 : f32
    %12 = vector.broadcast %cst_5 : f32 to vector<2x8xf32>
    %13 = arith.subf %12, %11 : vector<2x8xf32>
    %14 = math.exp %13 : vector<2x8xf32>
    %cst_6 = arith.constant 1.000000e+00 : f32
    %15 = vector.broadcast %cst_6 : f32 to vector<2x8xf32>
    %16 = arith.addf %15, %14 : vector<2x8xf32>
    %17 = tpu.reciprocal %16 {approx = true} : vector<2x8xf32> -> vector<2x8xf32>
    %cst_7 = arith.constant 1.600000e+01 : f32
    %18 = vector.broadcast %cst_7 : f32 to vector<2x8xf32>
    %19 = arith.mulf %17, %18 : vector<2x8xf32>
    %20 = vector.extract_strided_slice %0 {offsets = [0, 16], sizes = [2, 8], strides = [1, 1]} : vector<2x128xf32> to vector<2x8xf32>
    %cst_8 = arith.constant 0.000000e+00 : f32
    %21 = vector.broadcast %cst_8 : f32 to vector<2x8xf32>
    %22 = arith.subf %21, %20 : vector<2x8xf32>
    %23 = math.exp %22 : vector<2x8xf32>
    %cst_9 = arith.constant 1.000000e+00 : f32
    %24 = vector.broadcast %cst_9 : f32 to vector<2x8xf32>
    %25 = arith.addf %24, %23 : vector<2x8xf32>
    %26 = tpu.reciprocal %25 {approx = true} : vector<2x8xf32> -> vector<2x8xf32>
    %cst_10 = arith.constant 1.600000e+01 : f32
    %27 = vector.broadcast %cst_10 : f32 to vector<2x8xf32>
    %28 = arith.mulf %26, %27 : vector<2x8xf32>
    %29 = vector.extract_strided_slice %0 {offsets = [0, 24], sizes = [2, 8], strides = [1, 1]} : vector<2x128xf32> to vector<2x8xf32>
    %cst_11 = arith.constant 0.000000e+00 : f32
    %30 = vector.broadcast %cst_11 : f32 to vector<2x8xf32>
    %31 = arith.subf %30, %29 : vector<2x8xf32>
    %32 = math.exp %31 : vector<2x8xf32>
    %cst_12 = arith.constant 1.000000e+00 : f32
    %33 = vector.broadcast %cst_12 : f32 to vector<2x8xf32>
    %34 = arith.addf %33, %32 : vector<2x8xf32>
    %35 = tpu.reciprocal %34 {approx = true} : vector<2x8xf32> -> vector<2x8xf32>
    %cst_13 = arith.constant 1.600000e+01 : f32
    %36 = vector.broadcast %cst_13 : f32 to vector<2x8xf32>
    %37 = arith.mulf %35, %36 : vector<2x8xf32>
    %cst_14 = arith.constant 5.000000e-01 : f32
    %38 = vector.broadcast %cst_14 : f32 to vector<2x8xf32>
    %39 = arith.mulf %38, %28 : vector<2x8xf32>
    %40 = arith.subf %10, %39 : vector<2x8xf32>
    %cst_15 = arith.constant 5.000000e-01 : f32
    %41 = vector.broadcast %cst_15 : f32 to vector<2x8xf32>
    %42 = arith.mulf %41, %37 : vector<2x8xf32>
    %43 = arith.subf %19, %42 : vector<2x8xf32>
    %cst_16 = arith.constant 5.000000e-01 : f32
    %44 = vector.broadcast %cst_16 : f32 to vector<2x8xf32>
    %45 = arith.mulf %44, %28 : vector<2x8xf32>
    %46 = arith.addf %10, %45 : vector<2x8xf32>
    %cst_17 = arith.constant 5.000000e-01 : f32
    %47 = vector.broadcast %cst_17 : f32 to vector<2x8xf32>
    %48 = arith.mulf %47, %37 : vector<2x8xf32>
    %49 = arith.addf %19, %48 : vector<2x8xf32>
    %50 = vector.extract_strided_slice %1 {offsets = [0, 64], sizes = [2, 8], strides = [1, 1]} : vector<2x128xf32> to vector<2x8xf32>
    %cst_18 = arith.constant dense<0.000000e+00> : vector<2xf32>
    %51 = vector.multi_reduction <add>, %50, %cst_18 [1] : vector<2x8xf32> to vector<2xf32>
    %52 = vector.shape_cast %51 : vector<2xf32> to vector<2x1xf32>
    %cst_19 = arith.constant dense<0.000000e+00> : vector<1xf32>
    %53 = vector.multi_reduction <add>, %52, %cst_19 [0] : vector<2x1xf32> to vector<1xf32>
    %54 = vector.shape_cast %53 : vector<1xf32> to vector<1x1xf32>
    %cst_20 = arith.constant 1.000000e+00 : f32
    %55 = vector.broadcast %cst_20 : f32 to vector<1x1xf32>
    %56 = arith.maximumf %54, %55 : vector<1x1xf32>
    %57 = vector.extract_strided_slice %1 {offsets = [0, 0], sizes = [2, 8], strides = [1, 1]} : vector<2x128xf32> to vector<2x8xf32>
    %58 = arith.subf %40, %57 : vector<2x8xf32>
    %59 = math.absf %58 : vector<2x8xf32>
    %cst_21 = arith.constant 1.000000e+00 : f32
    %60 = vector.broadcast %cst_21 : f32 to vector<2x8xf32>
    %61 = arith.cmpf olt, %59, %60 : vector<2x8xf32>
    %cst_22 = arith.constant 5.000000e-01 : f32
    %62 = vector.broadcast %cst_22 : f32 to vector<2x8xf32>
    %63 = arith.mulf %62, %58 : vector<2x8xf32>
    %64 = arith.mulf %63, %58 : vector<2x8xf32>
    %cst_23 = arith.constant 5.000000e-01 : f32
    %65 = vector.broadcast %cst_23 : f32 to vector<2x8xf32>
    %66 = arith.subf %59, %65 : vector<2x8xf32>
    %67 = arith.select %61, %64, %66 : vector<2x8xi1>, vector<2x8xf32>
    %68 = vector.extract_strided_slice %1 {offsets = [0, 8], sizes = [2, 8], strides = [1, 1]} : vector<2x128xf32> to vector<2x8xf32>
    %69 = arith.subf %43, %68 : vector<2x8xf32>
    %70 = math.absf %69 : vector<2x8xf32>
    %cst_24 = arith.constant 1.000000e+00 : f32
    %71 = vector.broadcast %cst_24 : f32 to vector<2x8xf32>
    %72 = arith.cmpf olt, %70, %71 : vector<2x8xf32>
    %cst_25 = arith.constant 5.000000e-01 : f32
    %73 = vector.broadcast %cst_25 : f32 to vector<2x8xf32>
    %74 = arith.mulf %73, %69 : vector<2x8xf32>
    %75 = arith.mulf %74, %69 : vector<2x8xf32>
    %cst_26 = arith.constant 5.000000e-01 : f32
    %76 = vector.broadcast %cst_26 : f32 to vector<2x8xf32>
    %77 = arith.subf %70, %76 : vector<2x8xf32>
    %78 = arith.select %72, %75, %77 : vector<2x8xi1>, vector<2x8xf32>
    %79 = arith.addf %67, %78 : vector<2x8xf32>
    %80 = vector.extract_strided_slice %1 {offsets = [0, 16], sizes = [2, 8], strides = [1, 1]} : vector<2x128xf32> to vector<2x8xf32>
    %81 = arith.subf %46, %80 : vector<2x8xf32>
    %82 = math.absf %81 : vector<2x8xf32>
    %cst_27 = arith.constant 1.000000e+00 : f32
    %83 = vector.broadcast %cst_27 : f32 to vector<2x8xf32>
    %84 = arith.cmpf olt, %82, %83 : vector<2x8xf32>
    %cst_28 = arith.constant 5.000000e-01 : f32
    %85 = vector.broadcast %cst_28 : f32 to vector<2x8xf32>
    %86 = arith.mulf %85, %81 : vector<2x8xf32>
    %87 = arith.mulf %86, %81 : vector<2x8xf32>
    %cst_29 = arith.constant 5.000000e-01 : f32
    %88 = vector.broadcast %cst_29 : f32 to vector<2x8xf32>
    %89 = arith.subf %82, %88 : vector<2x8xf32>
    %90 = arith.select %84, %87, %89 : vector<2x8xi1>, vector<2x8xf32>
    %91 = arith.addf %79, %90 : vector<2x8xf32>
    %92 = vector.extract_strided_slice %1 {offsets = [0, 24], sizes = [2, 8], strides = [1, 1]} : vector<2x128xf32> to vector<2x8xf32>
    %93 = arith.subf %49, %92 : vector<2x8xf32>
    %94 = math.absf %93 : vector<2x8xf32>
    %cst_30 = arith.constant 1.000000e+00 : f32
    %95 = vector.broadcast %cst_30 : f32 to vector<2x8xf32>
    %96 = arith.cmpf olt, %94, %95 : vector<2x8xf32>
    %cst_31 = arith.constant 5.000000e-01 : f32
    %97 = vector.broadcast %cst_31 : f32 to vector<2x8xf32>
    %98 = arith.mulf %97, %93 : vector<2x8xf32>
    %99 = arith.mulf %98, %93 : vector<2x8xf32>
    %cst_32 = arith.constant 5.000000e-01 : f32
    %100 = vector.broadcast %cst_32 : f32 to vector<2x8xf32>
    %101 = arith.subf %94, %100 : vector<2x8xf32>
    %102 = arith.select %96, %99, %101 : vector<2x8xi1>, vector<2x8xf32>
    %103 = arith.addf %91, %102 : vector<2x8xf32>
    %104 = arith.mulf %103, %50 : vector<2x8xf32>
    %cst_33 = arith.constant dense<0.000000e+00> : vector<2xf32>
    %105 = vector.multi_reduction <add>, %104, %cst_33 [1] : vector<2x8xf32> to vector<2xf32>
    %106 = vector.shape_cast %105 : vector<2xf32> to vector<2x1xf32>
    %cst_34 = arith.constant dense<0.000000e+00> : vector<1xf32>
    %107 = vector.multi_reduction <add>, %106, %cst_34 [0] : vector<2x1xf32> to vector<1xf32>
    %108 = vector.shape_cast %107 : vector<1xf32> to vector<1x1xf32>
    %109 = arith.divf %108, %56 : vector<1x1xf32>
    %110 = vector.extract_strided_slice %0 {offsets = [0, 40], sizes = [2, 8], strides = [1, 1]} : vector<2x128xf32> to vector<2x8xf32>
    %111 = vector.extract_strided_slice %0 {offsets = [0, 48], sizes = [2, 8], strides = [1, 1]} : vector<2x128xf32> to vector<2x8xf32>
    %112 = vector.extract_strided_slice %0 {offsets = [0, 56], sizes = [2, 8], strides = [1, 1]} : vector<2x128xf32> to vector<2x8xf32>
    %113 = vector.extract_strided_slice %0 {offsets = [0, 64], sizes = [2, 8], strides = [1, 1]} : vector<2x128xf32> to vector<2x8xf32>
    %114 = arith.maximumf %110, %111 : vector<2x8xf32>
    %115 = arith.maximumf %114, %112 : vector<2x8xf32>
    %116 = arith.maximumf %115, %113 : vector<2x8xf32>
    %cst_35 = arith.constant 0.000000e+00 : f32
    %117 = vector.broadcast %cst_35 : f32 to vector<2x8xf32>
    %118 = arith.subf %110, %116 : vector<2x8xf32>
    %119 = math.exp %118 : vector<2x8xf32>
    %120 = arith.addf %117, %119 : vector<2x8xf32>
    %121 = arith.subf %111, %116 : vector<2x8xf32>
    %122 = math.exp %121 : vector<2x8xf32>
    %123 = arith.addf %120, %122 : vector<2x8xf32>
    %124 = arith.subf %112, %116 : vector<2x8xf32>
    %125 = math.exp %124 : vector<2x8xf32>
    %126 = arith.addf %123, %125 : vector<2x8xf32>
    %127 = arith.subf %113, %116 : vector<2x8xf32>
    %128 = math.exp %127 : vector<2x8xf32>
    %129 = arith.addf %126, %128 : vector<2x8xf32>
    %130 = math.log %129 : vector<2x8xf32>
    %cst_36 = arith.constant 0.000000e+00 : f32
    %131 = vector.broadcast %cst_36 : f32 to vector<2x8xf32>
    %132 = vector.extract_strided_slice %1 {offsets = [0, 32], sizes = [2, 8], strides = [1, 1]} : vector<2x128xf32> to vector<2x8xf32>
    %133 = arith.subf %110, %116 : vector<2x8xf32>
    %134 = arith.mulf %132, %133 : vector<2x8xf32>
    %135 = arith.addf %131, %134 : vector<2x8xf32>
    %136 = vector.extract_strided_slice %1 {offsets = [0, 40], sizes = [2, 8], strides = [1, 1]} : vector<2x128xf32> to vector<2x8xf32>
    %137 = arith.subf %111, %116 : vector<2x8xf32>
    %138 = arith.mulf %136, %137 : vector<2x8xf32>
    %139 = arith.addf %135, %138 : vector<2x8xf32>
    %140 = vector.extract_strided_slice %1 {offsets = [0, 48], sizes = [2, 8], strides = [1, 1]} : vector<2x128xf32> to vector<2x8xf32>
    %141 = arith.subf %112, %116 : vector<2x8xf32>
    %142 = arith.mulf %140, %141 : vector<2x8xf32>
    %143 = arith.addf %139, %142 : vector<2x8xf32>
    %144 = vector.extract_strided_slice %1 {offsets = [0, 56], sizes = [2, 8], strides = [1, 1]} : vector<2x128xf32> to vector<2x8xf32>
    %145 = arith.subf %113, %116 : vector<2x8xf32>
    %146 = arith.mulf %144, %145 : vector<2x8xf32>
    %147 = arith.addf %143, %146 : vector<2x8xf32>
    %148 = arith.subf %130, %147 : vector<2x8xf32>
    %149 = arith.mulf %148, %50 : vector<2x8xf32>
    %cst_37 = arith.constant dense<0.000000e+00> : vector<2xf32>
    %150 = vector.multi_reduction <add>, %149, %cst_37 [1] : vector<2x8xf32> to vector<2xf32>
    %151 = vector.shape_cast %150 : vector<2xf32> to vector<2x1xf32>
    %cst_38 = arith.constant dense<0.000000e+00> : vector<1xf32>
    %152 = vector.multi_reduction <add>, %151, %cst_38 [0] : vector<2x1xf32> to vector<1xf32>
    %153 = vector.shape_cast %152 : vector<1xf32> to vector<1x1xf32>
    %154 = arith.divf %153, %56 : vector<1x1xf32>
    %155 = tpu.iota {dimensions = array<i32: 1>} : vector<1x128xi32>
    %c0_i32 = arith.constant 0 : i32
    %156 = vector.broadcast %c0_i32 : i32 to vector<1x128xi32>
    %157 = arith.cmpi eq, %155, %156 : vector<1x128xi32>
    %cst_39 = arith.constant 0.000000e+00 : f32
    %158 = vector.shape_cast %109 : vector<1x1xf32> to vector<1x1xf32>
    %159 = vector.broadcast %158 : vector<1x1xf32> to vector<1x128xf32>
    %160 = vector.broadcast %cst_39 : f32 to vector<1x128xf32>
    %161 = arith.select %157, %159, %160 : vector<1x128xi1>, vector<1x128xf32>
    %c1_i32 = arith.constant 1 : i32
    %162 = vector.broadcast %c1_i32 : i32 to vector<1x128xi32>
    %163 = arith.cmpi eq, %155, %162 : vector<1x128xi32>
    %cst_40 = arith.constant 0.000000e+00 : f32
    %164 = vector.shape_cast %154 : vector<1x1xf32> to vector<1x1xf32>
    %165 = vector.broadcast %164 : vector<1x1xf32> to vector<1x128xf32>
    %166 = vector.broadcast %cst_40 : f32 to vector<1x128xf32>
    %167 = arith.select %163, %165, %166 : vector<1x128xi1>, vector<1x128xf32>
    %168 = arith.addf %161, %167 : vector<1x128xf32>
    %c0_41 = arith.constant 0 : index
    %c0_42 = arith.constant 0 : index
    %169 = vector.load %arg2[%c0_41, %c0_42] : memref<1x128xf32, #tpu.memory_space<vmem>>, vector<1x128xf32>
    tpu.vector_store %arg2[%c0_41, %c0_42], %168 {strides = array<i32>} : memref<1x128xf32, #tpu.memory_space<vmem>>, vector<1x128xf32>,
    return
  }
}

</mosaic_0001>

<bundles_post_ra>
// kernel: step.2
= control target key start
LH: loop header
LB: loop body
LE: loop exit
PB: predicated region body
PF: predicated region fallthrough
CT: control target
= control target key end

     0   :  { %12 = vsyncpa [#allocation3], 0  ;;  %s5893_s0 = inlined_call_operand.hbm [shape: f32[2,256], index: 0, kind: input, shape index: {}]   ;;  %s5894_s1 = inlined_call_operand.hbm [shape: f32[2,768], index: 1, kind: input, shape index: {}]   ;;  %s5895_s2 = inlined_call_operand.hbm [shape: f32[2,256], index: 2, kind: input, shape index: {}]   ;;  %s5896_s3 = inlined_call_operand.hbm [shape: f32[2,256], index: 3, kind: input, shape index: {}]   ;;  %s5897_s4 = inlined_call_operand.hbm [shape: bf16[1536,640], index: 4, kind: input, shape index: {}]   ;;  %s5898_s5 = inlined_call_operand.vmem [shape: f32[2,640], index: 5, kind: output, shape index: {0}]   ;;  %s5899_s6 = inlined_call_operand.vmem [shape: f32[1,128], index: 6, kind: output, shape index: {1}]  }
   0x1   :  { %13 = vsyncpa [#allocation5], 0 }
   0x2   :  { %14 = vsyncpa [#allocation8], 0  ;;  %s5629_s21 = smov [#allocation4]   ;;  %s5630_s23 = smov [#allocation7]  }
   0x3   :  { %s31_s22 = sshll.u32 %s5629_s21, 4  ;;  %s51_s24 = sshll.u32 %s5630_s23, 4  ;;  %s32_s22 = int_to_ptr.vmem [resolvable:$true] %s31_s22  ;;  %s52_s24 = int_to_ptr.vmem [resolvable:$true] %s51_s24 }
   0x4   :  { %s5513_s27 = scalar_lea.hbm %s5894_s1, 192 }
   0x5   :  { %p5514_p0 = scmp.ne.s32.totalorder %s5894_s1, %s5513_s27  ;;  %p5517_p1 = scmp.lt.u32.totalorder %s5513_s27, %s5894_s1 }
   0x7   :  { %p5519_p2 = pnand %p5517_p1, %p5514_p0 }
   0x9   :  { %5522 = shalt.err (!%p5519_p2)
}
   0xa   :  { %s5523_s8 = scalar_lea.vmem %s32_s22, 192  ;;  %p5528_p4 = scmp.lt.s32.totalorder %s32_s22, %s32_s22 }
   0xb   :  { %p5524_p3 = scmp.ne.s32.totalorder %s32_s22, %s5523_s8  ;;  %p5529_p5 = scmp.lt.s32.totalorder %s5523_s8, %s5523_s8 }
   0xd   :  { %p5530_p6 = por %p5529_p5, %p5528_p4 }
   0xf   :  { %p5531_p7 = pnand %p5530_p6, %p5524_p3 }
  0x11   :  { %5534 = shalt.err (!%p5531_p7)
}
  0x12   :  { %34 = dma.hbm_to_vmem [thread:$0]  %s5894_s1, 192, %s32_s22, [#allocation5]  }
  0x13   :  { %s5535_s13 = scalar_lea.hbm %s5896_s3, 64 }
  0x14   :  { %p5536_p8 = scmp.ne.s32.totalorder %s5896_s3, %s5535_s13  ;;  %p5539_p9 = scmp.lt.u32.totalorder %s5535_s13, %s5896_s3 }
  0x16   :  { %p5541_p10 = pnand %p5539_p9, %p5536_p8 }
  0x18   :  { %5544 = shalt.err (!%p5541_p10)
}
  0x19   :  { %s5545_s18 = scalar_lea.vmem %s52_s24, 64  ;;  %p5550_p12 = scmp.lt.s32.totalorder %s52_s24, %s52_s24 }
  0x1a   :  { %p5546_p11 = scmp.ne.s32.totalorder %s52_s24, %s5545_s18  ;;  %p5551_p13 = scmp.lt.s32.totalorder %s5545_s18, %s5545_s18 }
  0x1c   :  { %p5552_p0 = por %p5551_p13, %p5550_p12 }
  0x1e   :  { %p5553_p1 = pnand %p5552_p0, %p5546_p11 }
  0x20   :  { %5556 = shalt.err (!%p5553_p1)
}
  0x21   :  { %54 = dma.hbm_to_vmem [thread:$0]  %s5896_s3, 64, %s52_s24, [#allocation8]  }
  0x22   :  { %s5631_s20 = smov [#allocation2]   ;;  %s5632_s22 = smov [#allocation6]  }
  0x23   :  { %s21_s21 = sshll.u32 %s5631_s20, 4  ;;  %s41_s23 = sshll.u32 %s5632_s22, 4  ;;  %s22_s21 = int_to_ptr.vmem [resolvable:$true] %s21_s21  ;;  %s42_s23 = int_to_ptr.vmem [resolvable:$true] %s41_s23 }
  0x24   :  { %s5557_s27 = scalar_lea.hbm %s5893_s0, 64 }
  0x25   :  { %p5558_p2 = scmp.ne.s32.totalorder %s5893_s0, %s5557_s27  ;;  %p5561_p3 = scmp.lt.u32.totalorder %s5557_s27, %s5893_s0 }
  0x27   :  { %p5563_p4 = pnand %p5561_p3, %p5558_p2 }
  0x29   :  { %5566 = shalt.err (!%p5563_p4)
}
  0x2a   :  { %s5567_s3 = scalar_lea.vmem %s22_s21, 64  ;;  %p5572_p6 = scmp.lt.s32.totalorder %s22_s21, %s22_s21 }
  0x2b   :  { %p5568_p5 = scmp.ne.s32.totalorder %s22_s21, %s5567_s3  ;;  %p5573_p7 = scmp.lt.s32.totalorder %s5567_s3, %s5567_s3 }
  0x2d   :  { %p5574_p8 = por %p5573_p7, %p5572_p6 }
  0x2f   :  { %p5575_p9 = pnand %p5574_p8, %p5568_p5 }
  0x31   :  { %5578 = shalt.err (!%p5575_p9)
}
  0x32   :  { %24 = dma.hbm_to_vmem [thread:$0]  %s5893_s0, 64, %s22_s21, [#allocation3]  }
  0x33   :  { %s5579_s11 = scalar_lea.hbm %s5895_s2, 64 }
  0x34   :  { %p5580_p10 = scmp.ne.s32.totalorder %s5895_s2, %s5579_s11  ;;  %p5583_p11 = scmp.lt.u32.totalorder %s5579_s11, %s5895_s2 }
  0x36   :  { %p5585_p12 = pnand %p5583_p11, %p5580_p10 }
  0x38   :  { %5588 = shalt.err (!%p5585_p12)
}
  0x39   :  { %s5589_s16 = scalar_lea.vmem %s42_s23, 64  ;;  %p5594_p0 = scmp.lt.s32.totalorder %s42_s23, %s42_s23 }
  0x3a   :  { %p5590_p13 = scmp.ne.s32.totalorder %s42_s23, %s5589_s16  ;;  %p5595_p1 = scmp.lt.s32.totalorder %s5589_s16, %s5589_s16 }
  0x3c   :  { %p5596_p2 = por %p5595_p1, %p5594_p0 }
  0x3e   :  { %p5597_p3 = pnand %p5596_p2, %p5590_p13 }
  0x40   :  { %5600 = shalt.err (!%p5597_p3)
}
  0x41   :  { %44 = dma.hbm_to_vmem [thread:$0]  %s5895_s2, 64, %s42_s23, [#allocation5]  }
  0x42   :  { %s5633_s18 = smov [#allocation9]   ;;  %s5601_s21 = scalar_lea.hbm %s5897_s4, 61440 }
  0x43   :  { %s60_s1 = sshll.u32 %s5633_s18, 4  ;;  %p5602_p4 = scmp.ne.s32.totalorder %s5897_s4, %s5601_s21  ;;  %s61_s1 = int_to_ptr.vmem [resolvable:$true] %s60_s1 }
  0x44   :  { %p5605_p5 = scmp.lt.u32.totalorder %s5601_s21, %s5897_s4 }
  0x46   :  { %p5607_p6 = pnand %p5605_p5, %p5602_p4 }
  0x48   :  { %5610 = shalt.err (!%p5607_p6)
}
  0x49   :  { %s5611_s28 = scalar_lea.vmem %s61_s1, 61440  ;;  %p5616_p8 = scmp.lt.s32.totalorder %s61_s1, %s61_s1 }
  0x4a   :  { %p5612_p7 = scmp.ne.s32.totalorder %s61_s1, %s5611_s28  ;;  %p5617_p9 = scmp.lt.s32.totalorder %s5611_s28, %s5611_s28 }
  0x4c   :  { %p5618_p10 = por %p5617_p9, %p5616_p8 }
  0x4e   :  { %p5619_p11 = pnand %p5618_p10, %p5612_p7 }
  0x50   :  { %5622 = shalt.err (!%p5619_p11)
}
  0x51   :  { %s5634_s2 = smov 320   ;;  %s5635_s23 = smov 20  }
  0x52   :  { %66 = dma.hbm_to_vmem [thread:$0]  %s5897_s4, 61440, %s61_s1, [#allocation8], %s5634_s2, %s5634_s2, %s5635_s23  }
  0x53   :  { %5623 = dma.done.wait [#allocation3], 64  }
  0x54   :  { %5624 = vsyncadd [#allocation3], 4294967232 }
  0x55   :  { %5625 = dma.done.wait [#allocation5], 256  }
  0x56   :  { %5626 = vsyncadd [#allocation5], 4294967040 }
  0x57   :  { %5627 = dma.done.wait [#allocation8], 61504  }
  0x58   :  { %5628 = vsyncadd [#allocation8], 4294905792  ;;  %v4838_v0 = vld [vmem:[#allocation9 + $0x4] ss:$20 sps:$4 sm:$0xff]   ;;  %v4840_v1 = vld [vmem:[#allocation9 + $0xc] ss:$20 sps:$4 sm:$0xff]  }
  0x59   :  { %3275 = vmatprep.subr.bf16.mxu0 %v4838_v0  ;;  %v4842_v2 = vld [vmem:[#allocation9] ss:$20 sps:$4 sm:$0xff]   ;;  %v4843_v3 = vld [vmem:[#allocation9 + $0x8] ss:$20 sps:$4 sm:$0xff]   ;;  %3521 = vmatprep.subr.bf16.mxu1 %v4840_v1  ;;  %v4849_v7 = vld [vmem:[#allocation9 + $0x30] ss:$20 sps:$4 sm:$0xff]  }
  0x5a   :  { %v4844_v4 = vld [vmem:[#allocation9 + $0x2c] ss:$20 sps:$4 sm:$0xff]   ;;  %3276 = vmatpush1.bf16.msra.mxu0 %v4842_v2  ;;  %3522 = vmatpush1.bf16.msra.mxu1 %v4843_v3  ;;  %v4846_v5 = vld [vmem:[#allocation9 + $0x34] ss:$20 sps:$4 sm:$0xff]   ;;  %v4852_v9 = vld [vmem:[#allocation9 + $0x5c] ss:$20 sps:$4 sm:$0xff]  }
  0x5b   :  { %v4848_v6 = vld [vmem:[#allocation9 + $0x28] ss:$20 sps:$4 sm:$0xff]   ;;  %3277 = vmatprep.subr.bf16.mxu0 %v4844_v4  ;;  %3523 = vmatprep.subr.bf16.mxu1 %v4846_v5  ;;  %v4854_v10 = vld [vmem:[#allocation9 + $0x50] ss:$20 sps:$4 sm:$0xff]   ;;  %v4855_v11 = vld [vmem:[#allocation9 + $0x58] ss:$20 sps:$4 sm:$0xff]   ;;  %v97_v4 = vlaneseq }
  0x5c   :  { %v4850_v8 = vld [vmem:[#allocation9 + $0x54] ss:$20 sps:$4 sm:$0xff]   ;;  %v4856_v12 = vld [vmem:[#allocation9 + $0x7c] ss:$20 sps:$4 sm:$0xff]   ;;  %v4858_v13 = vld [vmem:[#allocation9 + $0x84] ss:$20 sps:$4 sm:$0xff]  }
  0x5d   :  { %v4860_v14 = vld [vmem:[#allocation9 + $0x78] ss:$20 sps:$4 sm:$0xff]   ;;  %v4861_v15 = vld [vmem:[#allocation9 + $0x80] ss:$20 sps:$4 sm:$0xff]   ;;  %v4867_v19 = vld [vmem:[#allocation9 + $0xa8] ss:$20 sps:$4 sm:$0xff]  }
  0x5e   :  { %3278 = vmatpush1.bf16.msra.mxu0 %v4848_v6  ;;  %3524 = vmatpush1.bf16.msra.mxu1 %v4849_v7  ;;  %v4862_v16 = vld [vmem:[#allocation9 + $0xa4] ss:$20 sps:$4 sm:$0xff]   ;;  %v4864_v17 = vld [vmem:[#allocation9 + $0xac] ss:$20 sps:$4 sm:$0xff]   ;;  %v4870_v21 = vld [vmem:[#allocation9 + $0xd4] ss:$20 sps:$4 sm:$0xff]  }
  0x5f   :  { %3279 = vmatprep.subr.bf16.mxu0 %v4850_v8  ;;  %3525 = vmatprep.subr.bf16.mxu1 %v4852_v9  ;;  %v4866_v18 = vld [vmem:[#allocation9 + $0xa0] ss:$20 sps:$4 sm:$0xff]   ;;  %v4872_v22 = vld [vmem:[#allocation9 + $0xc8] ss:$20 sps:$4 sm:$0xff]   ;;  %v4873_v23 = vld [vmem:[#allocation9 + $0xd0] ss:$20 sps:$4 sm:$0xff]  }
  0x60   :  { %v4868_v20 = vld [vmem:[#allocation9 + $0xcc] ss:$20 sps:$4 sm:$0xff]   ;;  %v4874_v24 = vld [vmem:[#allocation9 + $0xf4] ss:$20 sps:$4 sm:$0xff]   ;;  %v4876_v25 = vld [vmem:[#allocation9 + $0xfc] ss:$20 sps:$4 sm:$0xff]  }
  0x61   :  { %v4878_v26 = vld [vmem:[#allocation9 + $0xf0] ss:$20 sps:$4 sm:$0xff]   ;;  %v4879_v27 = vld [vmem:[#allocation9 + $0xf8] ss:$20 sps:$4 sm:$0xff]   ;;  %v4885_v31 = vld [vmem:[#allocation9 + $0x120] ss:$20 sps:$4 sm:$0xff]  }
  0x62   :  { %3280 = vmatpush1.bf16.msra.mxu0 %v4854_v10  ;;  %3526 = vmatpush1.bf16.msra.mxu1 %v4855_v11  ;;  %v4880_v28 = vld [vmem:[#allocation9 + $0x11c] ss:$20 sps:$4 sm:$0xff]   ;;  %v4882_v29 = vld [vmem:[#allocation9 + $0x124] ss:$20 sps:$4 sm:$0xff]   ;;  %v4888_v33 = vld [vmem:[#allocation9 + $0x14c] ss:$20 sps:$4 sm:$0xff]  }
  0x63   :  { %3281 = vmatprep.subr.bf16.mxu0 %v4856_v12  ;;  %3527 = vmatprep.subr.bf16.mxu1 %v4858_v13  ;;  %v4884_v30 = vld [vmem:[#allocation9 + $0x118] ss:$20 sps:$4 sm:$0xff]   ;;  %v4890_v34 = vld [vmem:[#allocation9 + $0x140] ss:$20 sps:$4 sm:$0xff]   ;;  %v4891_v35 = vld [vmem:[#allocation9 + $0x148] ss:$20 sps:$4 sm:$0xff]  }
  0x64   :  { %v4886_v32 = vld [vmem:[#allocation9 + $0x144] ss:$20 sps:$4 sm:$0xff]   ;;  %v4892_v36 = vld [vmem:[#allocation9 + $0x16c] ss:$20 sps:$4 sm:$0xff]   ;;  %v4894_v37 = vld [vmem:[#allocation9 + $0x174] ss:$20 sps:$4 sm:$0xff]  }
  0x65   :  { %v4896_v38 = vld [vmem:[#allocation9 + $0x168] ss:$20 sps:$4 sm:$0xff]   ;;  %v4897_v39 = vld [vmem:[#allocation9 + $0x170] ss:$20 sps:$4 sm:$0xff]   ;;  %v4903_v43 = vld [vmem:[#allocation9 + $0x198] ss:$20 sps:$4 sm:$0xff]  }
  0x66   :  { %3282 = vmatpush1.bf16.msra.mxu0 %v4860_v14  ;;  %3528 = vmatpush1.bf16.msra.mxu1 %v4861_v15  ;;  %v4898_v40 = vld [vmem:[#allocation9 + $0x194] ss:$20 sps:$4 sm:$0xff]   ;;  %v4900_v41 = vld [vmem:[#allocation9 + $0x19c] ss:$20 sps:$4 sm:$0xff]   ;;  %v4906_v45 = vld [vmem:[#allocation9 + $0x1c4] ss:$20 sps:$4 sm:$0xff]  }
  0x67   :  { %3283 = vmatprep.subr.bf16.mxu0 %v4862_v16  ;;  %3529 = vmatprep.subr.bf16.mxu1 %v4864_v17  ;;  %v4902_v42 = vld [vmem:[#allocation9 + $0x190] ss:$20 sps:$4 sm:$0xff]   ;;  %v5733_v46 = vld [vmem:[#allocation2] sm:$0xf]  ;;  %v4908_v47 = vld [vmem:[#allocation9 + $0x1b8] ss:$20 sps:$4 sm:$0xff]  }
  0x68   :  { %v4904_v44 = vld [vmem:[#allocation9 + $0x1bc] ss:$20 sps:$4 sm:$0xff]   ;;  %v84_v48 = vmul.f32 %v5733_v46, %v5733_v46  ;;  %v4909_v49 = vld [vmem:[#allocation9 + $0x1c0] ss:$20 sps:$4 sm:$0xff]   ;;  %v4910_v50 = vld [vmem:[#allocation9 + $0x1e4] ss:$20 sps:$4 sm:$0xff]  }
  0x69   :  { %v4912_v51 = vld [vmem:[#allocation9 + $0x1ec] ss:$20 sps:$4 sm:$0xff]   ;;  %v4915_v55 = vld [vmem:[#allocation9 + $0x1e8] ss:$20 sps:$4 sm:$0xff]   ;;  %v4921_v61 = vld [vmem:[#allocation9 + $0x210] ss:$20 sps:$4 sm:$0xff]  }
  0x6a   :  { %3284 = vmatpush1.bf16.msra.mxu0 %v4866_v18  ;;  %3530 = vmatpush1.bf16.msra.mxu1 %v4867_v19  ;;  %v85_v52 = vmul.f32 %v84_v48, %v84_v48  ;;  %v4914_v53 = vld [vmem:[#allocation9 + $0x1e0] ss:$20 sps:$4 sm:$0xff]   ;;  %v4920_v59 = vld [vmem:[#allocation9 + $0x208] ss:$20 sps:$4 sm:$0xff]   ;;  %v4926_v1 = vld [vmem:[#allocation9 + $0x230] ss:$20 sps:$4 sm:$0xff]  }
  0x6b   :  { %3285 = vmatprep.subr.bf16.mxu0 %v4868_v20  ;;  %3531 = vmatprep.subr.bf16.mxu1 %v4870_v21  ;;  %v4916_v56 = vld [vmem:[#allocation9 + $0x20c] ss:$20 sps:$4 sm:$0xff]   ;;  %v4918_v57 = vld [vmem:[#allocation9 + $0x214] ss:$20 sps:$4 sm:$0xff]   ;;  %v4924_v63 = vld [vmem:[#allocation9 + $0x23c] ss:$20 sps:$4 sm:$0xff]  }
  0x6c   :  { %v86_v54 = vmul.f32 %v85_v52, %v85_v52  ;;  %v4922_v62 = vld [vmem:[#allocation9 + $0x234] ss:$20 sps:$4 sm:$0xff]   ;;  %v4927_v3 = vld [vmem:[#allocation9 + $0x238] ss:$20 sps:$4 sm:$0xff]   ;;  %v5636_v5 = vmov 1983009808  }
  0x6d   :  { %v121_v6 = vunpack.c.l.s4 %v5636_v5  ;;  %v4928_v7 = vld [vmem:[#allocation9 + $0x25c] ss:$20 sps:$4 sm:$0xff]   ;;  %v4930_v8 = vld [vmem:[#allocation9 + $0x264] ss:$20 sps:$4 sm:$0xff]   ;;  %v4933_v10 = vld [vmem:[#allocation9 + $0x260] ss:$20 sps:$4 sm:$0xff]  }
  0x6e   :  { %3286 = vmatpush1.bf16.msra.mxu0 %v4872_v22  ;;  %3532 = vmatpush1.bf16.msra.mxu1 %v4873_v23  ;;  %v87_v58 = vmul.f32 %v86_v54, %v84_v48  ;;  %v4932_v9 = vld [vmem:[#allocation9 + $0x258] ss:$20 sps:$4 sm:$0xff]   ;;  %v5738_v11 = vshrl.u32 %v97_v4, 7  ;;  %v4961_v52 = vld [vmem:[#allocation9 + $0x328] ss:$20 sps:$4 sm:$0xff]   ;;  %s5637_s3 = smov 56  }
  0x6f   :  { %3287 = vmatprep.subr.bf16.mxu0 %v4874_v24  ;;  %3533 = vmatprep.subr.bf16.mxu1 %v4876_v25  ;;  %v122_v12 = vunpack.c.0.s8 %v121_v6  ;;  %v4936_v13 = vld [vmem:[#allocation9 + $0x284] ss:$20 sps:$4 sm:$0xff]   ;;  %v4939_v14 = vld [vmem:[#allocation9 + $0x28c] ss:$20 sps:$4 sm:$0xff]   ;;  %v4969_v54 = vld [vmem:[#allocation9 + $0x354] ss:$20 sps:$4 sm:$0xff]  }
  0x70   :  { %v4172_v60 = vrot.slane %v87_v58, 9  ;;  %v5744_v18 = vsub.s32 0, %v5738_v11  ;;  %v107_v19 = vsub.s32 2, %v5738_v11  ;;  %vm99_vm0 = vcmp.eq.s32.totalorder %v5738_v11, 1  ;;  %v4960_v48 = vld [vmem:[#allocation9 + $0x324] ss:$20 sps:$4 sm:$0xff]  }
  0x71   :  { %v5741_v15 = vsub.s32 %v122_v12, %v5738_v11  ;;  %v4985_v5 = vld [vmem:[#allocation9 + $0x3c8] ss:$20 sps:$4 sm:$0xff]   ;;  %v4990_v6 = vld [vmem:[#allocation9 + $0x3ec] ss:$20 sps:$4 sm:$0xff]   ;;  %vm4057_vm1 = vcmask 254976   ;;  %vm4061_vm2 = vcmask 1041408  }
  0x72   :  { %3288 = vmatpush1.bf16.msra.mxu0 %v4878_v26  ;;  %3534 = vmatpush1.bf16.msra.mxu1 %v4879_v27  ;;  %v92_v0 = vadd.f32 %v4172_v60, %v87_v58  ;;  %v4975_v58 = vld [vmem:[#allocation9 + $0x37c] ss:$20 sps:$4 sm:$0xff]   ;;  %v4973_v60 = vld [vmem:[#allocation9 + $0x378] ss:$20 sps:$4 sm:$0xff]  }
  0x73   :  { %3289 = vmatprep.subr.bf16.mxu0 %v4880_v28  ;;  %3535 = vmatprep.subr.bf16.mxu1 %v4882_v29  ;;  %v126_v20 = vrot.slane %v5733_v46, %v5741_v15  ;;  %v4999_v12 = vld [vmem:[#allocation9 + $0x41c] ss:$20 sps:$4 sm:$0xff]  }
  0x74   :  { %v93_v2 = vmax.f32 %v92_v0, 1e-07  ;;  %v4979_v0 = vld [vmem:[#allocation9 + $0x3a0] ss:$20 sps:$4 sm:$0xff]  }
  0x75   :  { %v127_v23 = vcombine.high %v126_v20, %v126_v20 }
  0x76   :  { %3290 = vmatpush1.bf16.msra.mxu0 %v4884_v30  ;;  %3536 = vmatpush1.bf16.msra.mxu1 %v4885_v31  ;;  %5511 = vlog2.f32 %v93_v2  ;;  %v4934_v30 = vld [vmem:[#allocation9 + $0x280] ss:$20 sps:$4 sm:$0xff]   ;;  %v4937_v31 = vld [vmem:[#allocation9 + $0x288] ss:$20 sps:$4 sm:$0xff]  }
  0x77   :  { %3291 = vmatprep.subr.bf16.mxu0 %v4886_v32  ;;  %3537 = vmatprep.subr.bf16.mxu1 %v4888_v33  ;;  %v4942_v33 = vld [vmem:[#allocation9 + $0x2ac] ss:$20 sps:$4 sm:$0xff]  }
  0x78   :  { %v4987_v2 = vld [vmem:[#allocation9 + $0x3cc] ss:$20 sps:$4 sm:$0xff]  }
  0x7a   :  { %3292 = vmatpush1.bf16.msra.mxu0 %v4890_v34  ;;  %3538 = vmatpush1.bf16.msra.mxu1 %v4891_v35  ;;  %v4945_v34 = vld [vmem:[#allocation9 + $0x2b4] ss:$20 sps:$4 sm:$0xff]  }
  0x7b   :  { %3293 = vmatprep.subr.bf16.mxu0 %v4892_v36  ;;  %3539 = vmatprep.subr.bf16.mxu1 %v4894_v37  ;;  %v4940_v35 = vld [vmem:[#allocation9 + $0x2a8] ss:$20 sps:$4 sm:$0xff]   ;;  %v4943_v36 = vld [vmem:[#allocation9 + $0x2b0] ss:$20 sps:$4 sm:$0xff]  }
  0x7c   :  { %v4948_v37 = vld [vmem:[#allocation9 + $0x2d4] ss:$20 sps:$4 sm:$0xff]  }
  0x7e   :  { %3294 = vmatpush1.bf16.msra.mxu0 %v4896_v38  ;;  %3540 = vmatpush1.bf16.msra.mxu1 %v4897_v39  ;;  %v4951_v38 = vld [vmem:[#allocation9 + $0x2dc] ss:$20 sps:$4 sm:$0xff]  }
  0x7f   :  { %3295 = vmatprep.subr.bf16.mxu0 %v4898_v40  ;;  %3541 = vmatprep.subr.bf16.mxu1 %v4900_v41  ;;  %v4946_v39 = vld [vmem:[#allocation9 + $0x2d0] ss:$20 sps:$4 sm:$0xff]   ;;  %v4949_v40 = vld [vmem:[#allocation9 + $0x2d8] ss:$20 sps:$4 sm:$0xff]  }
  0x80   :  { %v5512_v16 = vpop.eup %5511  ;;  %v4954_v41 = vld [vmem:[#allocation9 + $0x2fc] ss:$20 sps:$4 sm:$0xff]  }
  0x81   :  { %v95_v17 = vmul.f32 0.6931472, %v5512_v16  ;;  %v5002_v16 = vld [vmem:[#allocation9 + $0x43c] ss:$20 sps:$4 sm:$0xff]  }
  0x82   :  { %3296 = vmatpush1.bf16.msra.mxu0 %v4902_v42  ;;  %3542 = vmatpush1.bf16.msra.mxu1 %v4903_v43  ;;  %v5765_v42 = vld [vmem:[#allocation4] sm:$0xff]  ;;  %v4957_v43 = vld [vmem:[#allocation9 + $0x304] ss:$20 sps:$4 sm:$0xff]  }
  0x83   :  { %3297 = vmatprep.subr.bf16.mxu0 %v4904_v44  ;;  %3543 = vmatprep.subr.bf16.mxu1 %v4906_v45  ;;  %v96_v21 = vmul.f32 0.4342945, %v95_v17  ;;  %v5769_v44 = vrot.slane %v5765_v42, %v5741_v15  ;;  %v4952_v45 = vld [vmem:[#allocation9 + $0x2f8] ss:$20 sps:$4 sm:$0xff]  }
  0x84   :  { %v5005_v17 = vld [vmem:[#allocation9 + $0x444] ss:$20 sps:$4 sm:$0xff]  }
  0x85   :  { %v108_v22 = vrot.slane %v96_v21, %v107_v19  ;;  %v104_v24 = vrot.slane %v96_v21, %v5744_v18  ;;  %v729_v46 = vcombine.high %v5769_v44, %v5769_v44  ;;  %v5000_v19 = vld [vmem:[#allocation9 + $0x438] ss:$20 sps:$4 sm:$0xff]  }
  0x86   :  { %3298 = vmatpush1.bf16.msra.mxu0 %v4908_v47  ;;  %3544 = vmatpush1.bf16.msra.mxu1 %v4909_v49  ;;  %v4955_v47 = vld [vmem:[#allocation9 + $0x300] ss:$20 sps:$4 sm:$0xff]   ;;  %v5008_v21 = vld [vmem:[#allocation9 + $0x464] ss:$20 sps:$4 sm:$0xff]  }
  0x87   :  { %3299 = vmatprep.subr.bf16.mxu0 %v4910_v50  ;;  %3545 = vmatprep.subr.bf16.mxu1 %v4912_v51  ;;  %v118_v25 = vrot.slane %v108_v22, %v5744_v18  ;;  %v114_v26 = vrot.slane %v104_v24, %v5744_v18  ;;  %v4963_v49 = vld [vmem:[#allocation9 + $0x32c] ss:$20 sps:$4 sm:$0xff]   ;;  %v5773_v50 = vpack.c.bf16 %v729_v46, %v729_v46  ;;  %v5009_v24 = vld [vmem:[#allocation9 + $0x468] ss:$20 sps:$4 sm:$0xff]  }
  0x88   :  { %v4958_v51 = vld [vmem:[#allocation9 + $0x320] ss:$20 sps:$4 sm:$0xff]   ;;  %v5786_v46 = vpack.c.bf16 %v5769_v44, %v5769_v44  ;;  %v5047_v44 = vld [vmem:[#allocation9 + $0x55c] ss:$20 sps:$4 sm:$0xff]  }
  0x89   :  { %v131_v27 = vsel %vm99_vm0, %v118_v25, %v127_v23  ;;  %v130_v28 = vsel %vm99_vm0, %v114_v26, %v126_v20  ;;  %v5003_v20 = vld [vmem:[#allocation9 + $0x440] ss:$20 sps:$4 sm:$0xff]  }
  0x8a   :  { %3300 = vmatpush1.bf16.msra.mxu0 %v4914_v53  ;;  %3546 = vmatpush1.bf16.msra.mxu1 %v4915_v55  ;;  %v5757_v29 = vpack.c.bf16 %v131_v27, %v131_v27  ;;  %v5759_v32 = vpack.c.bf16 %v130_v28, %v130_v28  ;;  %v4966_v53 = vld [vmem:[#allocation9 + $0x34c] ss:$20 sps:$4 sm:$0xff]   ;;  %v4964_v55 = vld [vmem:[#allocation9 + $0x348] ss:$20 sps:$4 sm:$0xff]   ;;  %v5015_v28 = vld [vmem:[#allocation9 + $0x490] ss:$20 sps:$4 sm:$0xff]  }
  0x8b   :  { %3301 = vmatprep.subr.bf16.mxu0 %v4916_v56  ;;  %3547 = vmatprep.subr.bf16.mxu1 %v4918_v57  ;;  %v4967_v56 = vld [vmem:[#allocation9 + $0x350] ss:$20 sps:$4 sm:$0xff]   ;;  %v4972_v57 = vld [vmem:[#allocation9 + $0x374] ss:$20 sps:$4 sm:$0xff]   ;;  %v5011_v22 = vld [vmem:[#allocation9 + $0x46c] ss:$20 sps:$4 sm:$0xff]  }
  0x8c   :  { %3307 = vmatprep.mubr.bf16.mxu0 %v5757_v29  ;;  %3553 = vmatprep.mubr.bf16.mxu1 %v5757_v29  ;;  %v5006_v23 = vld [vmem:[#allocation9 + $0x460] ss:$20 sps:$4 sm:$0xff]   ;;  %v5012_v27 = vld [vmem:[#allocation9 + $0x488] ss:$20 sps:$4 sm:$0xff]  }
  0x8d   :  { %v5014_v25 = vld [vmem:[#allocation9 + $0x48c] ss:$20 sps:$4 sm:$0xff]   ;;  %v5017_v26 = vld [vmem:[#allocation9 + $0x494] ss:$20 sps:$4 sm:$0xff]  }
  0x8e   :  { %3302 = vmatpush1.bf16.msra.mxu0 %v4920_v59  ;;  %3548 = vmatpush1.bf16.msra.mxu1 %v4921_v61  ;;  %v4970_v59 = vld [vmem:[#allocation9 + $0x370] ss:$20 sps:$4 sm:$0xff]  }
  0x8f   :  { %3303 = vmatprep.subr.bf16.mxu0 %v4922_v62  ;;  %3549 = vmatprep.subr.bf16.mxu1 %v4924_v63  ;;  %v4978_v61 = vld [vmem:[#allocation9 + $0x39c] ss:$20 sps:$4 sm:$0xff]   ;;  %v4981_v62 = vld [vmem:[#allocation9 + $0x3a4] ss:$20 sps:$4 sm:$0xff]  }
  0x90   :  { %v4976_v63 = vld [vmem:[#allocation9 + $0x398] ss:$20 sps:$4 sm:$0xff]  }
  0x92   :  { %3304 = vmatpush1.bf16.msra.mxu0 %v4926_v1  ;;  %3550 = vmatpush1.bf16.msra.mxu1 %v4927_v3  ;;  %v4984_v1 = vld [vmem:[#allocation9 + $0x3c4] ss:$20 sps:$4 sm:$0xff]   ;;  %v4982_v3 = vld [vmem:[#allocation9 + $0x3c0] ss:$20 sps:$4 sm:$0xff]  }
  0x93   :  { %3305 = vmatprep.subr.bf16.mxu0 %v4928_v7  ;;  %3551 = vmatprep.subr.bf16.mxu1 %v4930_v8  ;;  %v4993_v7 = vld [vmem:[#allocation9 + $0x3f4] ss:$20 sps:$4 sm:$0xff]  }
  0x94   :  { %v4988_v8 = vld [vmem:[#allocation9 + $0x3e8] ss:$20 sps:$4 sm:$0xff]  }
  0x96   :  { %3306 = vmatpush1.bf16.msra.mxu0 %v4932_v9  ;;  %3552 = vmatpush1.bf16.msra.mxu1 %v4933_v10  ;;  %v4991_v9 = vld [vmem:[#allocation9 + $0x3f0] ss:$20 sps:$4 sm:$0xff]   ;;  %v4996_v10 = vld [vmem:[#allocation9 + $0x414] ss:$20 sps:$4 sm:$0xff]  }
  0x97   :  { %3316 = vmatprep.subr.bf16.mxu0 %v4936_v13  ;;  %3562 = vmatprep.subr.bf16.mxu1 %v4939_v14  ;;  %v4994_v13 = vld [vmem:[#allocation9 + $0x410] ss:$20 sps:$4 sm:$0xff]   ;;  %v4997_v14 = vld [vmem:[#allocation9 + $0x418] ss:$20 sps:$4 sm:$0xff]  }
  0x99   :  { %3308 = vmatmul.mubr.bf16.vlgmr.msra.gmra.mrb[0].mxu0 %v5759_v32  ;;  %3554 = vmatmul.mubr.bf16.vlgmr.msra.gmra.mrb[0].mxu1 %v5759_v32 }
  0x9a   :  { %3317 = vmatpush1.bf16.msra.mxu0 %v4934_v30  ;;  %3563 = vmatpush1.bf16.msra.mxu1 %v4937_v31  ;;  %v5020_v30 = vld [vmem:[#allocation9 + $0x4b4] ss:$20 sps:$4 sm:$0xff]   ;;  %v5023_v31 = vld [vmem:[#allocation9 + $0x4bc] ss:$20 sps:$4 sm:$0xff]  }
  0x9b   :  { %3318 = vmatprep.subr.bf16.mxu0 %v4942_v33  ;;  %3564 = vmatprep.subr.bf16.mxu1 %v4945_v34  ;;  %v714_v33 = vcombine.high %v5765_v42, %v5765_v42  ;;  %v5018_v34 = vld [vmem:[#allocation9 + $0x4b0] ss:$20 sps:$4 sm:$0xff]  }
  0x9c   :  { %3348 = vmatprep.mubr.bf16.mxu0 %v5773_v50  ;;  %3594 = vmatprep.mubr.bf16.mxu1 %v5773_v50 }
  0x9e   :  { %3319 = vmatpush1.bf16.msra.mxu0 %v4940_v35  ;;  %3565 = vmatpush1.bf16.msra.mxu1 %v4943_v36  ;;  %v5021_v35 = vld [vmem:[#allocation9 + $0x4b8] ss:$20 sps:$4 sm:$0xff]   ;;  %v5026_v36 = vld [vmem:[#allocation9 + $0x4dc] ss:$20 sps:$4 sm:$0xff]  }
  0x9f   :  { %3320 = vmatprep.subr.bf16.mxu0 %v4948_v37  ;;  %3566 = vmatprep.subr.bf16.mxu1 %v4951_v38  ;;  %v5029_v37 = vld [vmem:[#allocation9 + $0x4e4] ss:$20 sps:$4 sm:$0xff]   ;;  %v5780_v38 = vrot.slane %v714_v33, %v5741_v15 }
  0xa0   :  { %v5096_v33 = vld [vmem:[#allocation9 + $0x6b8] ss:$20 sps:$4 sm:$0xff]  }
  0xa1   :  { %v730_v42 = vcombine.high %v5780_v38, %v5780_v38 }
  0xa2   :  { %3321 = vmatpush1.bf16.msra.mxu0 %v4946_v39  ;;  %3567 = vmatpush1.bf16.msra.mxu1 %v4949_v40  ;;  %v5024_v39 = vld [vmem:[#allocation9 + $0x4d8] ss:$20 sps:$4 sm:$0xff]   ;;  %v5027_v40 = vld [vmem:[#allocation9 + $0x4e0] ss:$20 sps:$4 sm:$0xff]  }
  0xa3   :  { %3322 = vmatprep.subr.bf16.mxu0 %v4954_v41  ;;  %3568 = vmatprep.subr.bf16.mxu1 %v4957_v43  ;;  %v5032_v41 = vld [vmem:[#allocation9 + $0x504] ss:$20 sps:$4 sm:$0xff]   ;;  %v5035_v43 = vld [vmem:[#allocation9 + $0x50c] ss:$20 sps:$4 sm:$0xff]  }
  0xa6   :  { %3323 = vmatpush1.bf16.msra.mxu0 %v4952_v45  ;;  %3569 = vmatpush1.bf16.msra.mxu1 %v4955_v47  ;;  %v5030_v45 = vld [vmem:[#allocation9 + $0x500] ss:$20 sps:$4 sm:$0xff]   ;;  %v5033_v47 = vld [vmem:[#allocation9 + $0x508] ss:$20 sps:$4 sm:$0xff]  }
  0xa7   :  { %3324 = vmatprep.subr.bf16.mxu0 %v4960_v48  ;;  %3570 = vmatprep.subr.bf16.mxu1 %v4963_v49  ;;  %v5038_v48 = vld [vmem:[#allocation9 + $0x52c] ss:$20 sps:$4 sm:$0xff]   ;;  %v5041_v49 = vld [vmem:[#allocation9 + $0x534] ss:$20 sps:$4 sm:$0xff]  }
  0xaa   :  { %3325 = vmatpush1.bf16.msra.mxu0 %v4958_v51  ;;  %3571 = vmatpush1.bf16.msra.mxu1 %v4961_v52  ;;  %v5788_v51 = vpack.c.bf16 %v730_v42, %v730_v42  ;;  %v5036_v52 = vld [vmem:[#allocation9 + $0x528] ss:$20 sps:$4 sm:$0xff]   ;;  %v5111_v42 = vld [vmem:[#allocation9 + $0x710] ss:$20 sps:$4 sm:$0xff]  }
  0xab   :  { %3326 = vmatprep.subr.bf16.mxu0 %v4966_v53  ;;  %3572 = vmatprep.subr.bf16.mxu1 %v4969_v54  ;;  %v5039_v53 = vld [vmem:[#allocation9 + $0x530] ss:$20 sps:$4 sm:$0xff]   ;;  %v5044_v54 = vld [vmem:[#allocation9 + $0x554] ss:$20 sps:$4 sm:$0xff]  }
  0xae   :  { %3327 = vmatpush1.bf16.msra.mxu0 %v4964_v55  ;;  %3573 = vmatpush1.bf16.msra.mxu1 %v4967_v56  ;;  %v5042_v55 = vld [vmem:[#allocation9 + $0x550] ss:$20 sps:$4 sm:$0xff]   ;;  %v5045_v56 = vld [vmem:[#allocation9 + $0x558] ss:$20 sps:$4 sm:$0xff]  }
  0xaf   :  { %3328 = vmatprep.subr.bf16.mxu0 %v4972_v57  ;;  %3574 = vmatprep.subr.bf16.mxu1 %v4975_v58  ;;  %v5050_v57 = vld [vmem:[#allocation9 + $0x57c] ss:$20 sps:$4 sm:$0xff]   ;;  %v5053_v58 = vld [vmem:[#allocation9 + $0x584] ss:$20 sps:$4 sm:$0xff]  }
  0xb2   :  { %3329 = vmatpush1.bf16.msra.mxu0 %v4970_v59  ;;  %3575 = vmatpush1.bf16.msra.mxu1 %v4973_v60  ;;  %v5048_v59 = vld [vmem:[#allocation9 + $0x578] ss:$20 sps:$4 sm:$0xff]   ;;  %v5051_v60 = vld [vmem:[#allocation9 + $0x580] ss:$20 sps:$4 sm:$0xff]  }
  0xb3   :  { %3330 = vmatprep.subr.bf16.mxu0 %v4978_v61  ;;  %3576 = vmatprep.subr.bf16.mxu1 %v4981_v62  ;;  %v5056_v61 = vld [vmem:[#allocation9 + $0x5a4] ss:$20 sps:$4 sm:$0xff]   ;;  %v5059_v62 = vld [vmem:[#allocation9 + $0x5ac] ss:$20 sps:$4 sm:$0xff]  }
  0xb6   :  { %3331 = vmatpush1.bf16.msra.mxu0 %v4976_v63  ;;  %3577 = vmatpush1.bf16.msra.mxu1 %v4979_v0  ;;  %v5054_v63 = vld [vmem:[#allocation9 + $0x5a0] ss:$20 sps:$4 sm:$0xff]   ;;  %v5057_v0 = vld [vmem:[#allocation9 + $0x5a8] ss:$20 sps:$4 sm:$0xff]  }
  0xb7   :  { %3332 = vmatprep.subr.bf16.mxu0 %v4984_v1  ;;  %3578 = vmatprep.subr.bf16.mxu1 %v4987_v2  ;;  %v5062_v1 = vld [vmem:[#allocation9 + $0x5cc] ss:$20 sps:$4 sm:$0xff]   ;;  %v5065_v2 = vld [vmem:[#allocation9 + $0x5d4] ss:$20 sps:$4 sm:$0xff]  }
  0xba   :  { %3333 = vmatpush1.bf16.msra.mxu0 %v4982_v3  ;;  %3579 = vmatpush1.bf16.msra.mxu1 %v4985_v5  ;;  %v5060_v3 = vld [vmem:[#allocation9 + $0x5c8] ss:$20 sps:$4 sm:$0xff]   ;;  %v5063_v5 = vld [vmem:[#allocation9 + $0x5d0] ss:$20 sps:$4 sm:$0xff]  }
  0xbb   :  { %3334 = vmatprep.subr.bf16.mxu0 %v4990_v6  ;;  %3580 = vmatprep.subr.bf16.mxu1 %v4993_v7  ;;  %v5068_v6 = vld [vmem:[#allocation9 + $0x5f4] ss:$20 sps:$4 sm:$0xff]   ;;  %v5071_v7 = vld [vmem:[#allocation9 + $0x5fc] ss:$20 sps:$4 sm:$0xff]  }
  0xbe   :  { %3335 = vmatpush1.bf16.msra.mxu0 %v4988_v8  ;;  %3581 = vmatpush1.bf16.msra.mxu1 %v4991_v9  ;;  %v5066_v8 = vld [vmem:[#allocation9 + $0x5f0] ss:$20 sps:$4 sm:$0xff]   ;;  %v5069_v9 = vld [vmem:[#allocation9 + $0x5f8] ss:$20 sps:$4 sm:$0xff]  }
  0xbf   :  { %3336 = vmatprep.subr.bf16.mxu0 %v4996_v10  ;;  %3582 = vmatprep.subr.bf16.mxu1 %v4999_v12  ;;  %v5074_v10 = vld [vmem:[#allocation9 + $0x61c] ss:$20 sps:$4 sm:$0xff]   ;;  %v5077_v12 = vld [vmem:[#allocation9 + $0x624] ss:$20 sps:$4 sm:$0xff]  }
  0xc2   :  { %3337 = vmatpush1.bf16.msra.mxu0 %v4994_v13  ;;  %3583 = vmatpush1.bf16.msra.mxu1 %v4997_v14  ;;  %v5072_v13 = vld [vmem:[#allocation9 + $0x618] ss:$20 sps:$4 sm:$0xff]   ;;  %v5075_v14 = vld [vmem:[#allocation9 + $0x620] ss:$20 sps:$4 sm:$0xff]  }
  0xc3   :  { %3338 = vmatprep.subr.bf16.mxu0 %v5002_v16  ;;  %3584 = vmatprep.subr.bf16.mxu1 %v5005_v17  ;;  %v5080_v16 = vld [vmem:[#allocation9 + $0x644] ss:$20 sps:$4 sm:$0xff]   ;;  %v5083_v17 = vld [vmem:[#allocation9 + $0x64c] ss:$20 sps:$4 sm:$0xff]  }
  0xc6   :  { %3339 = vmatpush1.bf16.msra.mxu0 %v5000_v19  ;;  %3585 = vmatpush1.bf16.msra.mxu1 %v5003_v20  ;;  %v5078_v19 = vld [vmem:[#allocation9 + $0x640] ss:$20 sps:$4 sm:$0xff]   ;;  %v5081_v20 = vld [vmem:[#allocation9 + $0x648] ss:$20 sps:$4 sm:$0xff]  }
  0xc7   :  { %3340 = vmatprep.subr.bf16.mxu0 %v5008_v21  ;;  %3586 = vmatprep.subr.bf16.mxu1 %v5011_v22  ;;  %v5086_v21 = vld [vmem:[#allocation9 + $0x66c] ss:$20 sps:$4 sm:$0xff]   ;;  %v5089_v22 = vld [vmem:[#allocation9 + $0x674] ss:$20 sps:$4 sm:$0xff]  }
  0xca   :  { %3341 = vmatpush1.bf16.msra.mxu0 %v5006_v23  ;;  %3587 = vmatpush1.bf16.msra.mxu1 %v5009_v24  ;;  %v5084_v23 = vld [vmem:[#allocation9 + $0x668] ss:$20 sps:$4 sm:$0xff]   ;;  %v5087_v24 = vld [vmem:[#allocation9 + $0x670] ss:$20 sps:$4 sm:$0xff]  }
  0xcb   :  { %3342 = vmatprep.subr.bf16.mxu0 %v5014_v25  ;;  %3588 = vmatprep.subr.bf16.mxu1 %v5017_v26  ;;  %v5092_v25 = vld [vmem:[#allocation9 + $0x694] ss:$20 sps:$4 sm:$0xff]   ;;  %v5095_v26 = vld [vmem:[#allocation9 + $0x69c] ss:$20 sps:$4 sm:$0xff]  }
  0xce   :  { %3343 = vmatpush1.bf16.msra.mxu0 %v5012_v27  ;;  %3589 = vmatpush1.bf16.msra.mxu1 %v5015_v28  ;;  %v5090_v27 = vld [vmem:[#allocation9 + $0x690] ss:$20 sps:$4 sm:$0xff]   ;;  %v5093_v28 = vld [vmem:[#allocation9 + $0x698] ss:$20 sps:$4 sm:$0xff]  }
  0xcf   :  { %3344 = vmatprep.subr.bf16.mxu0 %v5020_v30  ;;  %3590 = vmatprep.subr.bf16.mxu1 %v5023_v31  ;;  %v5098_v30 = vld [vmem:[#allocation9 + $0x6bc] ss:$20 sps:$4 sm:$0xff]   ;;  %v5101_v31 = vld [vmem:[#allocation9 + $0x6c4] ss:$20 sps:$4 sm:$0xff]  }
  0xd2   :  { %3345 = vmatpush1.bf16.msra.mxu0 %v5018_v34  ;;  %3591 = vmatpush1.bf16.msra.mxu1 %v5021_v35  ;;  %v5099_v34 = vld [vmem:[#allocation9 + $0x6c0] ss:$20 sps:$4 sm:$0xff]   ;;  %v5104_v35 = vld [vmem:[#allocation9 + $0x6e4] ss:$20 sps:$4 sm:$0xff]  }
  0xd3   :  { %3346 = vmatprep.subr.bf16.mxu0 %v5026_v36  ;;  %3592 = vmatprep.subr.bf16.mxu1 %v5029_v37  ;;  %v5107_v36 = vld [vmem:[#allocation9 + $0x6ec] ss:$20 sps:$4 sm:$0xff]  }
  0xd4   :  { %v5102_v37 = vld [vmem:[#allocation9 + $0x6e0] ss:$20 sps:$4 sm:$0xff]  }
  0xd6   :  { %3347 = vmatpush1.bf16.msra.mxu0 %v5024_v39  ;;  %3593 = vmatpush1.bf16.msra.mxu1 %v5027_v40  ;;  %v5105_v39 = vld [vmem:[#allocation9 + $0x6e8] ss:$20 sps:$4 sm:$0xff]   ;;  %v5110_v40 = vld [vmem:[#allocation9 + $0x70c] ss:$20 sps:$4 sm:$0xff]  }
  0xd7   :  { %3357 = vmatprep.subr.bf16.mxu0 %v5032_v41  ;;  %3603 = vmatprep.subr.bf16.mxu1 %v5035_v43  ;;  %v5113_v41 = vld [vmem:[#allocation9 + $0x714] ss:$20 sps:$4 sm:$0xff]  }
  0xd8   :  { %v5108_v43 = vld [vmem:[#allocation9 + $0x708] ss:$20 sps:$4 sm:$0xff]  }
  0xd9   :  { %3349 = vmatmul.mubr.bf16.vlgmr.msra.gmra.mrb[0].mxu0 %v5786_v46  ;;  %3595 = vmatmul.mubr.bf16.vlgmr.msra.gmra.mrb[0].mxu1 %v5786_v46 }
  0xda   :  { %3358 = vmatpush1.bf16.msra.mxu0 %v5030_v45  ;;  %3604 = vmatpush1.bf16.msra.mxu1 %v5033_v47  ;;  %v5116_v45 = vld [vmem:[#allocation9 + $0x734] ss:$20 sps:$4 sm:$0xff]   ;;  %v5119_v47 = vld [vmem:[#allocation9 + $0x73c] ss:$20 sps:$4 sm:$0xff]  }
  0xdb   :  { %3359 = vmatprep.subr.bf16.mxu0 %v5038_v48  ;;  %3605 = vmatprep.subr.bf16.mxu1 %v5041_v49  ;;  %v5114_v48 = vld [vmem:[#allocation9 + $0x730] ss:$20 sps:$4 sm:$0xff]   ;;  %v5117_v49 = vld [vmem:[#allocation9 + $0x738] ss:$20 sps:$4 sm:$0xff]  }
  0xdc   :  { %3389 = vmatprep.mubr.bf16.mxu0 %v5788_v51  ;;  %3635 = vmatprep.mubr.bf16.mxu1 %v5788_v51 }
  0xde   :  { %3360 = vmatpush1.bf16.msra.mxu0 %v5036_v52  ;;  %3606 = vmatpush1.bf16.msra.mxu1 %v5039_v53  ;;  %v5122_v52 = vld [vmem:[#allocation9 + $0x75c] ss:$20 sps:$4 sm:$0xff]   ;;  %v5125_v53 = vld [vmem:[#allocation9 + $0x764] ss:$20 sps:$4 sm:$0xff]  }
  0xdf   :  { %3361 = vmatprep.subr.bf16.mxu0 %v5044_v54  ;;  %3607 = vmatprep.subr.bf16.mxu1 %v5047_v44  ;;  %v5120_v54 = vld [vmem:[#allocation9 + $0x758] ss:$20 sps:$4 sm:$0xff]   ;;  %v5794_v44 = vld.sshfl [vmem:[#allocation4 + $0x8] sm:$0x33 pattern:$0x76325410] }
  0xe2   :  { %3362 = vmatpush1.bf16.msra.mxu0 %v5042_v55  ;;  %3608 = vmatpush1.bf16.msra.mxu1 %v5045_v56  ;;  %v5123_v55 = vld [vmem:[#allocation9 + $0x760] ss:$20 sps:$4 sm:$0xff]   ;;  %v5129_v56 = vld [vmem:[#allocation9 + $0x784] ss:$20 sps:$4 sm:$0xff]  }
  0xe3   :  { %3363 = vmatprep.subr.bf16.mxu0 %v5050_v57  ;;  %3609 = vmatprep.subr.bf16.mxu1 %v5053_v58  ;;  %v5132_v57 = vld [vmem:[#allocation9 + $0x78c] ss:$20 sps:$4 sm:$0xff]   ;;  %v738_v58 = vcombine.high %v5794_v44, %v5794_v44 }
  0xe6   :  { %3364 = vmatpush1.bf16.msra.mxu0 %v5048_v59  ;;  %3610 = vmatpush1.bf16.msra.mxu1 %v5051_v60  ;;  %v5127_v59 = vld [vmem:[#allocation9 + $0x780] ss:$20 sps:$4 sm:$0xff]   ;;  %v5800_v60 = vpack.c.bf16 %v5780_v38, %v5780_v38 }
  0xe7   :  { %3365 = vmatprep.subr.bf16.mxu0 %v5056_v61  ;;  %3611 = vmatprep.subr.bf16.mxu1 %v5059_v62  ;;  %v5130_v61 = vld [vmem:[#allocation9 + $0x788] ss:$20 sps:$4 sm:$0xff]   ;;  %v5135_v62 = vld [vmem:[#allocation9 + $0x7ac] ss:$20 sps:$4 sm:$0xff]  }
  0xe8   :  { %v5141_v38 = vld [vmem:[#allocation9 + $0x7d4] ss:$20 sps:$4 sm:$0xff]  }
  0xea   :  { %3366 = vmatpush1.bf16.msra.mxu0 %v5054_v63  ;;  %3612 = vmatpush1.bf16.msra.mxu1 %v5057_v0  ;;  %v5138_v63 = vld [vmem:[#allocation9 + $0x7b4] ss:$20 sps:$4 sm:$0xff]   ;;  %v5802_v0 = vpack.c.bf16 %v738_v58, %v738_v58 }
  0xeb   :  { %3367 = vmatprep.subr.bf16.mxu0 %v5062_v1  ;;  %3613 = vmatprep.subr.bf16.mxu1 %v5065_v2  ;;  %v5133_v1 = vld [vmem:[#allocation9 + $0x7a8] ss:$20 sps:$4 sm:$0xff]   ;;  %v5136_v2 = vld [vmem:[#allocation9 + $0x7b0] ss:$20 sps:$4 sm:$0xff]  }
  0xec   :  { %v5210_v58 = vld [vmem:[#allocation9 + $0x994] ss:$20 sps:$4 sm:$0xff]  }
  0xee   :  { %3368 = vmatpush1.bf16.msra.mxu0 %v5060_v3  ;;  %3614 = vmatpush1.bf16.msra.mxu1 %v5063_v5  ;;  %v5144_v3 = vld [vmem:[#allocation9 + $0x7dc] ss:$20 sps:$4 sm:$0xff]  }
  0xef   :  { %3369 = vmatprep.subr.bf16.mxu0 %v5068_v6  ;;  %3615 = vmatprep.subr.bf16.mxu1 %v5071_v7  ;;  %v5139_v5 = vld [vmem:[#allocation9 + $0x7d0] ss:$20 sps:$4 sm:$0xff]   ;;  %v5142_v6 = vld [vmem:[#allocation9 + $0x7d8] ss:$20 sps:$4 sm:$0xff]  }
  0xf0   :  { %v5147_v7 = vld [vmem:[#allocation9 + $0x7fc] ss:$20 sps:$4 sm:$0xff]  }
  0xf2   :  { %3370 = vmatpush1.bf16.msra.mxu0 %v5066_v8  ;;  %3616 = vmatpush1.bf16.msra.mxu1 %v5069_v9  ;;  %v5150_v8 = vld [vmem:[#allocation9 + $0x804] ss:$20 sps:$4 sm:$0xff]  }
  0xf3   :  { %3371 = vmatprep.subr.bf16.mxu0 %v5074_v10  ;;  %3617 = vmatprep.subr.bf16.mxu1 %v5077_v12  ;;  %v5145_v9 = vld [vmem:[#allocation9 + $0x7f8] ss:$20 sps:$4 sm:$0xff]   ;;  %v5148_v10 = vld [vmem:[#allocation9 + $0x800] ss:$20 sps:$4 sm:$0xff]  }
  0xf4   :  { %v5153_v12 = vld [vmem:[#allocation9 + $0x824] ss:$20 sps:$4 sm:$0xff]  }
  0xf6   :  { %3372 = vmatpush1.bf16.msra.mxu0 %v5072_v13  ;;  %3618 = vmatpush1.bf16.msra.mxu1 %v5075_v14  ;;  %v5156_v13 = vld [vmem:[#allocation9 + $0x82c] ss:$20 sps:$4 sm:$0xff]  }
  0xf7   :  { %3373 = vmatprep.subr.bf16.mxu0 %v5080_v16  ;;  %3619 = vmatprep.subr.bf16.mxu1 %v5083_v17  ;;  %v5151_v14 = vld [vmem:[#allocation9 + $0x820] ss:$20 sps:$4 sm:$0xff]   ;;  %v5154_v16 = vld [vmem:[#allocation9 + $0x828] ss:$20 sps:$4 sm:$0xff]  }
  0xf8   :  { %v5159_v17 = vld [vmem:[#allocation9 + $0x84c] ss:$20 sps:$4 sm:$0xff]  }
  0xfa   :  { %3374 = vmatpush1.bf16.msra.mxu0 %v5078_v19  ;;  %3620 = vmatpush1.bf16.msra.mxu1 %v5081_v20  ;;  %v5162_v19 = vld [vmem:[#allocation9 + $0x854] ss:$20 sps:$4 sm:$0xff]  }
  0xfb   :  { %3375 = vmatprep.subr.bf16.mxu0 %v5086_v21  ;;  %3621 = vmatprep.subr.bf16.mxu1 %v5089_v22  ;;  %v5157_v20 = vld [vmem:[#allocation9 + $0x848] ss:$20 sps:$4 sm:$0xff]   ;;  %v5160_v21 = vld [vmem:[#allocation9 + $0x850] ss:$20 sps:$4 sm:$0xff]  }
  0xfc   :  { %v5165_v22 = vld [vmem:[#allocation9 + $0x874] ss:$20 sps:$4 sm:$0xff]  }
  0xfe   :  { %3376 = vmatpush1.bf16.msra.mxu0 %v5084_v23  ;;  %3622 = vmatpush1.bf16.msra.mxu1 %v5087_v24  ;;  %v5168_v23 = vld [vmem:[#allocation9 + $0x87c] ss:$20 sps:$4 sm:$0xff]  }
  0xff   :  { %3377 = vmatprep.subr.bf16.mxu0 %v5092_v25  ;;  %3623 = vmatprep.subr.bf16.mxu1 %v5095_v26  ;;  %v5163_v24 = vld [vmem:[#allocation9 + $0x870] ss:$20 sps:$4 sm:$0xff]   ;;  %v5166_v25 = vld [vmem:[#allocation9 + $0x878] ss:$20 sps:$4 sm:$0xff]  }
 0x100   :  { %v5171_v26 = vld [vmem:[#allocation9 + $0x89c] ss:$20 sps:$4 sm:$0xff]  }
 0x102   :  { %3378 = vmatpush1.bf16.msra.mxu0 %v5090_v27  ;;  %3624 = vmatpush1.bf16.msra.mxu1 %v5093_v28  ;;  %v5174_v27 = vld [vmem:[#allocation9 + $0x8a4] ss:$20 sps:$4 sm:$0xff]  }
 0x103   :  { %3379 = vmatprep.subr.bf16.mxu0 %v5098_v30  ;;  %3625 = vmatprep.subr.bf16.mxu1 %v5101_v31  ;;  %v5169_v28 = vld [vmem:[#allocation9 + $0x898] ss:$20 sps:$4 sm:$0xff]   ;;  %v5172_v30 = vld [vmem:[#allocation9 + $0x8a0] ss:$20 sps:$4 sm:$0xff]  }
 0x104   :  { %v5177_v31 = vld [vmem:[#allocation9 + $0x8c4] ss:$20 sps:$4 sm:$0xff]  }
 0x106   :  { %3380 = vmatpush1.bf16.msra.mxu0 %v5096_v33  ;;  %3626 = vmatpush1.bf16.msra.mxu1 %v5099_v34  ;;  %v5180_v33 = vld [vmem:[#allocation9 + $0x8cc] ss:$20 sps:$4 sm:$0xff]  }
 0x107   :  { %3381 = vmatprep.subr.bf16.mxu0 %v5104_v35  ;;  %3627 = vmatprep.subr.bf16.mxu1 %v5107_v36  ;;  %v5175_v34 = vld [vmem:[#allocation9 + $0x8c0] ss:$20 sps:$4 sm:$0xff]   ;;  %v5178_v35 = vld [vmem:[#allocation9 + $0x8c8] ss:$20 sps:$4 sm:$0xff]  }
 0x108   :  { %v5183_v36 = vld [vmem:[#allocation9 + $0x8ec] ss:$20 sps:$4 sm:$0xff]  }
 0x10a   :  { %3382 = vmatpush1.bf16.msra.mxu0 %v5102_v37  ;;  %3628 = vmatpush1.bf16.msra.mxu1 %v5105_v39  ;;  %v5186_v37 = vld [vmem:[#allocation9 + $0x8f4] ss:$20 sps:$4 sm:$0xff]  }
 0x10b   :  { %3383 = vmatprep.subr.bf16.mxu0 %v5110_v40  ;;  %3629 = vmatprep.subr.bf16.mxu1 %v5113_v41  ;;  %v5181_v39 = vld [vmem:[#allocation9 + $0x8e8] ss:$20 sps:$4 sm:$0xff]   ;;  %v5184_v40 = vld [vmem:[#allocation9 + $0x8f0] ss:$20 sps:$4 sm:$0xff]  }
 0x10c   :  { %v5189_v41 = vld [vmem:[#allocation9 + $0x914] ss:$20 sps:$4 sm:$0xff]  }
 0x10e   :  { %3384 = vmatpush1.bf16.msra.mxu0 %v5108_v43  ;;  %3630 = vmatpush1.bf16.msra.mxu1 %v5111_v42  ;;  %v5192_v43 = vld [vmem:[#allocation9 + $0x91c] ss:$20 sps:$4 sm:$0xff]  }
 0x10f   :  { %3385 = vmatprep.subr.bf16.mxu0 %v5116_v45  ;;  %3631 = vmatprep.subr.bf16.mxu1 %v5119_v47  ;;  %v5187_v42 = vld [vmem:[#allocation9 + $0x910] ss:$20 sps:$4 sm:$0xff]   ;;  %v5190_v45 = vld [vmem:[#allocation9 + $0x918] ss:$20 sps:$4 sm:$0xff]  }
 0x110   :  { %v5195_v47 = vld [vmem:[#allocation9 + $0x93c] ss:$20 sps:$4 sm:$0xff]  }
 0x112   :  { %3386 = vmatpush1.bf16.msra.mxu0 %v5114_v48  ;;  %3632 = vmatpush1.bf16.msra.mxu1 %v5117_v49  ;;  %v5198_v48 = vld [vmem:[#allocation9 + $0x944] ss:$20 sps:$4 sm:$0xff]  }
 0x113   :  { %3387 = vmatprep.subr.bf16.mxu0 %v5122_v52  ;;  %3633 = vmatprep.subr.bf16.mxu1 %v5125_v53  ;;  %v5193_v49 = vld [vmem:[#allocation9 + $0x938] ss:$20 sps:$4 sm:$0xff]   ;;  %v5196_v52 = vld [vmem:[#allocation9 + $0x940] ss:$20 sps:$4 sm:$0xff]  }
 0x114   :  { %v5201_v53 = vld [vmem:[#allocation9 + $0x964] ss:$20 sps:$4 sm:$0xff]  }
 0x116   :  { %3388 = vmatpush1.bf16.msra.mxu0 %v5120_v54  ;;  %3634 = vmatpush1.bf16.msra.mxu1 %v5123_v55  ;;  %v5204_v54 = vld [vmem:[#allocation9 + $0x96c] ss:$20 sps:$4 sm:$0xff]  }
 0x117   :  { %3398 = vmatprep.subr.bf16.mxu0 %v5129_v56  ;;  %3644 = vmatprep.subr.bf16.mxu1 %v5132_v57  ;;  %v5199_v55 = vld [vmem:[#allocation9 + $0x960] ss:$20 sps:$4 sm:$0xff]   ;;  %v5202_v56 = vld [vmem:[#allocation9 + $0x968] ss:$20 sps:$4 sm:$0xff]  }
 0x118   :  { %v5207_v57 = vld [vmem:[#allocation9 + $0x98c] ss:$20 sps:$4 sm:$0xff]  }
 0x119   :  { %3390 = vmatmul.mubr.bf16.vlgmr.msra.gmra.mrb[0].mxu0 %v5800_v60  ;;  %3636 = vmatmul.mubr.bf16.vlgmr.msra.gmra.mrb[0].mxu1 %v5800_v60 }
 0x11a   :  { %3399 = vmatpush1.bf16.msra.mxu0 %v5127_v59  ;;  %3645 = vmatpush1.bf16.msra.mxu1 %v5130_v61  ;;  %v5205_v59 = vld [vmem:[#allocation9 + $0x988] ss:$20 sps:$4 sm:$0xff]   ;;  %v5208_v61 = vld [vmem:[#allocation9 + $0x990] ss:$20 sps:$4 sm:$0xff]  }
 0x11b   :  { %3400 = vmatprep.subr.bf16.mxu0 %v5135_v62  ;;  %3646 = vmatprep.subr.bf16.mxu1 %v5138_v63  ;;  %v5213_v62 = vld [vmem:[#allocation9 + $0x9b4] ss:$20 sps:$4 sm:$0xff]   ;;  %v5216_v63 = vld [vmem:[#allocation9 + $0x9bc] ss:$20 sps:$4 sm:$0xff]  }
 0x11c   :  { %3430 = vmatprep.mubr.bf16.mxu0 %v5802_v0  ;;  %3676 = vmatprep.mubr.bf16.mxu1 %v5802_v0 }
 0x11e   :  { %3401 = vmatpush1.bf16.msra.mxu0 %v5133_v1  ;;  %3647 = vmatpush1.bf16.msra.mxu1 %v5136_v2  ;;  %v5211_v1 = vld [vmem:[#allocation9 + $0x9b0] ss:$20 sps:$4 sm:$0xff]   ;;  %v5214_v2 = vld [vmem:[#allocation9 + $0x9b8] ss:$20 sps:$4 sm:$0xff]  }
 0x11f   :  { %3402 = vmatprep.subr.bf16.mxu0 %v5141_v38  ;;  %3648 = vmatprep.subr.bf16.mxu1 %v5144_v3  ;;  %v5219_v38 = vld [vmem:[#allocation9 + $0x9dc] ss:$20 sps:$4 sm:$0xff]   ;;  %v5222_v3 = vld [vmem:[#allocation9 + $0x9e4] ss:$20 sps:$4 sm:$0xff]  }
 0x122   :  { %3403 = vmatpush1.bf16.msra.mxu0 %v5139_v5  ;;  %3649 = vmatpush1.bf16.msra.mxu1 %v5142_v6  ;;  %v5808_v5 = vld.sshfl [vmem:[#allocation6] sm:$0x33 pattern:$0x76325410] }
 0x123   :  { %3404 = vmatprep.subr.bf16.mxu0 %v5147_v7  ;;  %3650 = vmatprep.subr.bf16.mxu1 %v5150_v8  ;;  %v5217_v6 = vld [vmem:[#allocation9 + $0x9d8] ss:$20 sps:$4 sm:$0xff]   ;;  %v5220_v7 = vld [vmem:[#allocation9 + $0x9e0] ss:$20 sps:$4 sm:$0xff]  }
 0x124   :  { %v5225_v8 = vld [vmem:[#allocation9 + $0xa04] ss:$20 sps:$4 sm:$0xff]  }
 0x126   :  { %3405 = vmatpush1.bf16.msra.mxu0 %v5145_v9  ;;  %3651 = vmatpush1.bf16.msra.mxu1 %v5148_v10  ;;  %v5228_v9 = vld [vmem:[#allocation9 + $0xa0c] ss:$20 sps:$4 sm:$0xff]  }
 0x127   :  { %3406 = vmatprep.subr.bf16.mxu0 %v5153_v12  ;;  %3652 = vmatprep.subr.bf16.mxu1 %v5156_v13  ;;  %v5223_v10 = vld [vmem:[#allocation9 + $0xa00] ss:$20 sps:$4 sm:$0xff]   ;;  %v5226_v12 = vld [vmem:[#allocation9 + $0xa08] ss:$20 sps:$4 sm:$0xff]   ;;  %v753_v13 = vcombine.high %v5808_v5, %v5808_v5 }
 0x12a   :  { %3407 = vmatpush1.bf16.msra.mxu0 %v5151_v14  ;;  %3653 = vmatpush1.bf16.msra.mxu1 %v5154_v16  ;;  %v5814_v14 = vpack.c.bf16 %v5794_v44, %v5794_v44  ;;  %v5231_v16 = vld [vmem:[#allocation9 + $0xa2c] ss:$20 sps:$4 sm:$0xff]   ;;  %v5237_v44 = vld [vmem:[#allocation9 + $0xa54] ss:$20 sps:$4 sm:$0xff]  }
 0x12b   :  { %3408 = vmatprep.subr.bf16.mxu0 %v5159_v17  ;;  %3654 = vmatprep.subr.bf16.mxu1 %v5162_v19  ;;  %v5234_v17 = vld [vmem:[#allocation9 + $0xa34] ss:$20 sps:$4 sm:$0xff]  }
 0x12c   :  { %v5229_v19 = vld [vmem:[#allocation9 + $0xa28] ss:$20 sps:$4 sm:$0xff]  }
 0x12e   :  { %3409 = vmatpush1.bf16.msra.mxu0 %v5157_v20  ;;  %3655 = vmatpush1.bf16.msra.mxu1 %v5160_v21  ;;  %v5816_v20 = vpack.c.bf16 %v753_v13, %v753_v13  ;;  %v5232_v21 = vld [vmem:[#allocation9 + $0xa30] ss:$20 sps:$4 sm:$0xff]   ;;  %v5306_v13 = vld [vmem:[#allocation9 + $0xc14] ss:$20 sps:$4 sm:$0xff]  }
 0x12f   :  { %3410 = vmatprep.subr.bf16.mxu0 %v5165_v22  ;;  %3656 = vmatprep.subr.bf16.mxu1 %v5168_v23  ;;  %v5240_v22 = vld [vmem:[#allocation9 + $0xa5c] ss:$20 sps:$4 sm:$0xff]  }
 0x130   :  { %v5235_v23 = vld [vmem:[#allocation9 + $0xa50] ss:$20 sps:$4 sm:$0xff]  }
 0x132   :  { %3411 = vmatpush1.bf16.msra.mxu0 %v5163_v24  ;;  %3657 = vmatpush1.bf16.msra.mxu1 %v5166_v25  ;;  %v5238_v24 = vld [vmem:[#allocation9 + $0xa58] ss:$20 sps:$4 sm:$0xff]   ;;  %v5243_v25 = vld [vmem:[#allocation9 + $0xa7c] ss:$20 sps:$4 sm:$0xff]  }
 0x133   :  { %3412 = vmatprep.subr.bf16.mxu0 %v5171_v26  ;;  %3658 = vmatprep.subr.bf16.mxu1 %v5174_v27  ;;  %v5246_v26 = vld [vmem:[#allocation9 + $0xa84] ss:$20 sps:$4 sm:$0xff]  }
 0x134   :  { %v5241_v27 = vld [vmem:[#allocation9 + $0xa78] ss:$20 sps:$4 sm:$0xff]  }
 0x136   :  { %3413 = vmatpush1.bf16.msra.mxu0 %v5169_v28  ;;  %3659 = vmatpush1.bf16.msra.mxu1 %v5172_v30  ;;  %v5244_v28 = vld [vmem:[#allocation9 + $0xa80] ss:$20 sps:$4 sm:$0xff]   ;;  %v5249_v30 = vld [vmem:[#allocation9 + $0xaa4] ss:$20 sps:$4 sm:$0xff]  }
 0x137   :  { %3414 = vmatprep.subr.bf16.mxu0 %v5177_v31  ;;  %3660 = vmatprep.subr.bf16.mxu1 %v5180_v33  ;;  %v5252_v31 = vld [vmem:[#allocation9 + $0xaac] ss:$20 sps:$4 sm:$0xff]  }
 0x138   :  { %v5247_v33 = vld [vmem:[#allocation9 + $0xaa0] ss:$20 sps:$4 sm:$0xff]  }
 0x13a   :  { %3415 = vmatpush1.bf16.msra.mxu0 %v5175_v34  ;;  %3661 = vmatpush1.bf16.msra.mxu1 %v5178_v35  ;;  %v5250_v34 = vld [vmem:[#allocation9 + $0xaa8] ss:$20 sps:$4 sm:$0xff]   ;;  %v5255_v35 = vld [vmem:[#allocation9 + $0xacc] ss:$20 sps:$4 sm:$0xff]  }
 0x13b   :  { %3416 = vmatprep.subr.bf16.mxu0 %v5183_v36  ;;  %3662 = vmatprep.subr.bf16.mxu1 %v5186_v37  ;;  %v5258_v36 = vld [vmem:[#allocation9 + $0xad4] ss:$20 sps:$4 sm:$0xff]  }
 0x13c   :  { %v5253_v37 = vld [vmem:[#allocation9 + $0xac8] ss:$20 sps:$4 sm:$0xff]  }
 0x13e   :  { %3417 = vmatpush1.bf16.msra.mxu0 %v5181_v39  ;;  %3663 = vmatpush1.bf16.msra.mxu1 %v5184_v40  ;;  %v5256_v39 = vld [vmem:[#allocation9 + $0xad0] ss:$20 sps:$4 sm:$0xff]   ;;  %v5261_v40 = vld [vmem:[#allocation9 + $0xaf4] ss:$20 sps:$4 sm:$0xff]  }
 0x13f   :  { %3418 = vmatprep.subr.bf16.mxu0 %v5189_v41  ;;  %3664 = vmatprep.subr.bf16.mxu1 %v5192_v43  ;;  %v5264_v41 = vld [vmem:[#allocation9 + $0xafc] ss:$20 sps:$4 sm:$0xff]  }
 0x140   :  { %v5259_v43 = vld [vmem:[#allocation9 + $0xaf0] ss:$20 sps:$4 sm:$0xff]  }
 0x142   :  { %3419 = vmatpush1.bf16.msra.mxu0 %v5187_v42  ;;  %3665 = vmatpush1.bf16.msra.mxu1 %v5190_v45  ;;  %v5262_v42 = vld [vmem:[#allocation9 + $0xaf8] ss:$20 sps:$4 sm:$0xff]   ;;  %v5267_v45 = vld [vmem:[#allocation9 + $0xb1c] ss:$20 sps:$4 sm:$0xff]  }
 0x143   :  { %3420 = vmatprep.subr.bf16.mxu0 %v5195_v47  ;;  %3666 = vmatprep.subr.bf16.mxu1 %v5198_v48  ;;  %v5270_v47 = vld [vmem:[#allocation9 + $0xb24] ss:$20 sps:$4 sm:$0xff]  }
 0x144   :  { %v5265_v48 = vld [vmem:[#allocation9 + $0xb18] ss:$20 sps:$4 sm:$0xff]  }
 0x146   :  { %3421 = vmatpush1.bf16.msra.mxu0 %v5193_v49  ;;  %3667 = vmatpush1.bf16.msra.mxu1 %v5196_v52  ;;  %v5268_v49 = vld [vmem:[#allocation9 + $0xb20] ss:$20 sps:$4 sm:$0xff]   ;;  %v5273_v52 = vld [vmem:[#allocation9 + $0xb44] ss:$20 sps:$4 sm:$0xff]  }
 0x147   :  { %3422 = vmatprep.subr.bf16.mxu0 %v5201_v53  ;;  %3668 = vmatprep.subr.bf16.mxu1 %v5204_v54  ;;  %v5276_v53 = vld [vmem:[#allocation9 + $0xb4c] ss:$20 sps:$4 sm:$0xff]  }
 0x148   :  { %v5271_v54 = vld [vmem:[#allocation9 + $0xb40] ss:$20 sps:$4 sm:$0xff]  }
 0x14a   :  { %3423 = vmatpush1.bf16.msra.mxu0 %v5199_v55  ;;  %3669 = vmatpush1.bf16.msra.mxu1 %v5202_v56  ;;  %v5274_v55 = vld [vmem:[#allocation9 + $0xb48] ss:$20 sps:$4 sm:$0xff]   ;;  %v5279_v56 = vld [vmem:[#allocation9 + $0xb6c] ss:$20 sps:$4 sm:$0xff]  }
 0x14b   :  { %3424 = vmatprep.subr.bf16.mxu0 %v5207_v57  ;;  %3670 = vmatprep.subr.bf16.mxu1 %v5210_v58  ;;  %v5282_v57 = vld [vmem:[#allocation9 + $0xb74] ss:$20 sps:$4 sm:$0xff]  }
 0x14c   :  { %v5277_v58 = vld [vmem:[#allocation9 + $0xb68] ss:$20 sps:$4 sm:$0xff]  }
 0x14e   :  { %3425 = vmatpush1.bf16.msra.mxu0 %v5205_v59  ;;  %3671 = vmatpush1.bf16.msra.mxu1 %v5208_v61  ;;  %v5280_v59 = vld [vmem:[#allocation9 + $0xb70] ss:$20 sps:$4 sm:$0xff]   ;;  %v5285_v61 = vld [vmem:[#allocation9 + $0xb94] ss:$20 sps:$4 sm:$0xff]  }
 0x14f   :  { %3426 = vmatprep.subr.bf16.mxu0 %v5213_v62  ;;  %3672 = vmatprep.subr.bf16.mxu1 %v5216_v63  ;;  %v5288_v62 = vld [vmem:[#allocation9 + $0xb9c] ss:$20 sps:$4 sm:$0xff]  }
 0x150   :  { %v5283_v63 = vld [vmem:[#allocation9 + $0xb90] ss:$20 sps:$4 sm:$0xff]  }
 0x152   :  { %3427 = vmatpush1.bf16.msra.mxu0 %v5211_v1  ;;  %3673 = vmatpush1.bf16.msra.mxu1 %v5214_v2  ;;  %v5286_v1 = vld [vmem:[#allocation9 + $0xb98] ss:$20 sps:$4 sm:$0xff]   ;;  %v5291_v2 = vld [vmem:[#allocation9 + $0xbbc] ss:$20 sps:$4 sm:$0xff]  }
 0x153   :  { %3428 = vmatprep.subr.bf16.mxu0 %v5219_v38  ;;  %3674 = vmatprep.subr.bf16.mxu1 %v5222_v3  ;;  %v5294_v38 = vld [vmem:[#allocation9 + $0xbc4] ss:$20 sps:$4 sm:$0xff]  }
 0x154   :  { %v5289_v3 = vld [vmem:[#allocation9 + $0xbb8] ss:$20 sps:$4 sm:$0xff]  }
 0x156   :  { %3429 = vmatpush1.bf16.msra.mxu0 %v5217_v6  ;;  %3675 = vmatpush1.bf16.msra.mxu1 %v5220_v7  ;;  %v5292_v6 = vld [vmem:[#allocation9 + $0xbc0] ss:$20 sps:$4 sm:$0xff]   ;;  %v5297_v7 = vld [vmem:[#allocation9 + $0xbe4] ss:$20 sps:$4 sm:$0xff]  }
 0x157   :  { %3439 = vmatprep.subr.bf16.mxu0 %v5225_v8  ;;  %3685 = vmatprep.subr.bf16.mxu1 %v5228_v9  ;;  %v5300_v8 = vld [vmem:[#allocation9 + $0xbec] ss:$20 sps:$4 sm:$0xff]  }
 0x158   :  { %v5295_v9 = vld [vmem:[#allocation9 + $0xbe0] ss:$20 sps:$4 sm:$0xff]  }
 0x159   :  { %3431 = vmatmul.mubr.bf16.vlgmr.msra.gmra.mrb[0].mxu0 %v5814_v14  ;;  %3677 = vmatmul.mubr.bf16.vlgmr.msra.gmra.mrb[0].mxu1 %v5814_v14 }
 0x15a   :  { %3440 = vmatpush1.bf16.msra.mxu0 %v5223_v10  ;;  %3686 = vmatpush1.bf16.msra.mxu1 %v5226_v12  ;;  %v5298_v10 = vld [vmem:[#allocation9 + $0xbe8] ss:$20 sps:$4 sm:$0xff]   ;;  %v5303_v12 = vld [vmem:[#allocation9 + $0xc0c] ss:$20 sps:$4 sm:$0xff]  }
 0x15b   :  { %3441 = vmatprep.subr.bf16.mxu0 %v5231_v16  ;;  %3687 = vmatprep.subr.bf16.mxu1 %v5234_v17  ;;  %v5301_v16 = vld [vmem:[#allocation9 + $0xc08] ss:$20 sps:$4 sm:$0xff]   ;;  %v5304_v17 = vld [vmem:[#allocation9 + $0xc10] ss:$20 sps:$4 sm:$0xff]  }
 0x15c   :  { %3471 = vmatprep.mubr.bf16.mxu0 %v5816_v20  ;;  %3717 = vmatprep.mubr.bf16.mxu1 %v5816_v20 }
 0x15e   :  { %3442 = vmatpush1.bf16.msra.mxu0 %v5229_v19  ;;  %3688 = vmatpush1.bf16.msra.mxu1 %v5232_v21  ;;  %v5309_v19 = vld [vmem:[#allocation9 + $0xc34] ss:$20 sps:$4 sm:$0xff]   ;;  %v5312_v21 = vld [vmem:[#allocation9 + $0xc3c] ss:$20 sps:$4 sm:$0xff]  }
 0x15f   :  { %3443 = vmatprep.subr.bf16.mxu0 %v5237_v44  ;;  %3689 = vmatprep.subr.bf16.mxu1 %v5240_v22  ;;  %v5307_v44 = vld [vmem:[#allocation9 + $0xc30] ss:$20 sps:$4 sm:$0xff]   ;;  %v5310_v22 = vld [vmem:[#allocation9 + $0xc38] ss:$20 sps:$4 sm:$0xff]  }
 0x162   :  { %3444 = vmatpush1.bf16.msra.mxu0 %v5235_v23  ;;  %3690 = vmatpush1.bf16.msra.mxu1 %v5238_v24  ;;  %v5315_v23 = vld [vmem:[#allocation9 + $0xc5c] ss:$20 sps:$4 sm:$0xff]   ;;  %v5318_v24 = vld [vmem:[#allocation9 + $0xc64] ss:$20 sps:$4 sm:$0xff]  }
 0x163   :  { %3445 = vmatprep.subr.bf16.mxu0 %v5243_v25  ;;  %3691 = vmatprep.subr.bf16.mxu1 %v5246_v26  ;;  %v5822_v25 = vld.sshfl [vmem:[#allocation7] sm:$0x33 pattern:$0x76325410]  ;;  %v5313_v26 = vld [vmem:[#allocation9 + $0xc58] ss:$20 sps:$4 sm:$0xff]  }
 0x166   :  { %3446 = vmatpush1.bf16.msra.mxu0 %v5241_v27  ;;  %3692 = vmatpush1.bf16.msra.mxu1 %v5244_v28  ;;  %v5316_v27 = vld [vmem:[#allocation9 + $0xc60] ss:$20 sps:$4 sm:$0xff]   ;;  %v5321_v28 = vld [vmem:[#allocation9 + $0xc84] ss:$20 sps:$4 sm:$0xff]  }
 0x167   :  { %3447 = vmatprep.subr.bf16.mxu0 %v5249_v30  ;;  %3693 = vmatprep.subr.bf16.mxu1 %v5252_v31  ;;  %v5324_v30 = vld [vmem:[#allocation9 + $0xc8c] ss:$20 sps:$4 sm:$0xff]  }
 0x168   :  { %v5319_v31 = vld [vmem:[#allocation9 + $0xc80] ss:$20 sps:$4 sm:$0xff]  }
 0x16a   :  { %3448 = vmatpush1.bf16.msra.mxu0 %v5247_v33  ;;  %3694 = vmatpush1.bf16.msra.mxu1 %v5250_v34  ;;  %v5322_v33 = vld [vmem:[#allocation9 + $0xc88] ss:$20 sps:$4 sm:$0xff]   ;;  %v764_v34 = vcombine.high %v5822_v25, %v5822_v25 }
 0x16b   :  { %3449 = vmatprep.subr.bf16.mxu0 %v5255_v35  ;;  %3695 = vmatprep.subr.bf16.mxu1 %v5258_v36  ;;  %v5828_v35 = vpack.c.bf16 %v5808_v5, %v5808_v5  ;;  %v5327_v36 = vld [vmem:[#allocation9 + $0xcac] ss:$20 sps:$4 sm:$0xff]   ;;  %v5333_v5 = vld [vmem:[#allocation9 + $0xcd4] ss:$20 sps:$4 sm:$0xff]  }
 0x16e   :  { %3450 = vmatpush1.bf16.msra.mxu0 %v5253_v37  ;;  %3696 = vmatpush1.bf16.msra.mxu1 %v5256_v39  ;;  %v5330_v37 = vld [vmem:[#allocation9 + $0xcb4] ss:$20 sps:$4 sm:$0xff]  }
 0x16f   :  { %3451 = vmatprep.subr.bf16.mxu0 %v5261_v40  ;;  %3697 = vmatprep.subr.bf16.mxu1 %v5264_v41  ;;  %v5325_v39 = vld [vmem:[#allocation9 + $0xca8] ss:$20 sps:$4 sm:$0xff]   ;;  %v5830_v40 = vpack.c.bf16 %v764_v34, %v764_v34  ;;  %v5328_v41 = vld [vmem:[#allocation9 + $0xcb0] ss:$20 sps:$4 sm:$0xff]  }
 0x170   :  { %v5394_v34 = vld [vmem:[#allocation9 + $0xe68] ss:$20 sps:$4 sm:$0xff]  }
 0x172   :  { %3452 = vmatpush1.bf16.msra.mxu0 %v5259_v43  ;;  %3698 = vmatpush1.bf16.msra.mxu1 %v5262_v42  ;;  %v5336_v43 = vld [vmem:[#allocation9 + $0xcdc] ss:$20 sps:$4 sm:$0xff]  }
 0x173   :  { %3453 = vmatprep.subr.bf16.mxu0 %v5267_v45  ;;  %3699 = vmatprep.subr.bf16.mxu1 %v5270_v47  ;;  %v5331_v42 = vld [vmem:[#allocation9 + $0xcd0] ss:$20 sps:$4 sm:$0xff]   ;;  %v5334_v45 = vld [vmem:[#allocation9 + $0xcd8] ss:$20 sps:$4 sm:$0xff]  }
 0x174   :  { %v5339_v47 = vld [vmem:[#allocation9 + $0xcfc] ss:$20 sps:$4 sm:$0xff]  }
 0x176   :  { %3454 = vmatpush1.bf16.msra.mxu0 %v5265_v48  ;;  %3700 = vmatpush1.bf16.msra.mxu1 %v5268_v49  ;;  %v5342_v48 = vld [vmem:[#allocation9 + $0xd04] ss:$20 sps:$4 sm:$0xff]  }
 0x177   :  { %3455 = vmatprep.subr.bf16.mxu0 %v5273_v52  ;;  %3701 = vmatprep.subr.bf16.mxu1 %v5276_v53  ;;  %v5337_v49 = vld [vmem:[#allocation9 + $0xcf8] ss:$20 sps:$4 sm:$0xff]   ;;  %v5340_v52 = vld [vmem:[#allocation9 + $0xd00] ss:$20 sps:$4 sm:$0xff]  }
 0x178   :  { %v5345_v53 = vld [vmem:[#allocation9 + $0xd24] ss:$20 sps:$4 sm:$0xff]  }
 0x17a   :  { %3456 = vmatpush1.bf16.msra.mxu0 %v5271_v54  ;;  %3702 = vmatpush1.bf16.msra.mxu1 %v5274_v55  ;;  %v5348_v54 = vld [vmem:[#allocation9 + $0xd2c] ss:$20 sps:$4 sm:$0xff]  }
 0x17b   :  { %3457 = vmatprep.subr.bf16.mxu0 %v5279_v56  ;;  %3703 = vmatprep.subr.bf16.mxu1 %v5282_v57  ;;  %v5343_v55 = vld [vmem:[#allocation9 + $0xd20] ss:$20 sps:$4 sm:$0xff]   ;;  %v5346_v56 = vld [vmem:[#allocation9 + $0xd28] ss:$20 sps:$4 sm:$0xff]  }
 0x17c   :  { %v5351_v57 = vld [vmem:[#allocation9 + $0xd4c] ss:$20 sps:$4 sm:$0xff]  }
 0x17e   :  { %3458 = vmatpush1.bf16.msra.mxu0 %v5277_v58  ;;  %3704 = vmatpush1.bf16.msra.mxu1 %v5280_v59  ;;  %v5354_v58 = vld [vmem:[#allocation9 + $0xd54] ss:$20 sps:$4 sm:$0xff]  }
 0x17f   :  { %3459 = vmatprep.subr.bf16.mxu0 %v5285_v61  ;;  %3705 = vmatprep.subr.bf16.mxu1 %v5288_v62  ;;  %v5349_v59 = vld [vmem:[#allocation9 + $0xd48] ss:$20 sps:$4 sm:$0xff]   ;;  %v5352_v61 = vld [vmem:[#allocation9 + $0xd50] ss:$20 sps:$4 sm:$0xff]  }
 0x180   :  { %v5357_v62 = vld [vmem:[#allocation9 + $0xd74] ss:$20 sps:$4 sm:$0xff]  }
 0x182   :  { %3460 = vmatpush1.bf16.msra.mxu0 %v5283_v63  ;;  %3706 = vmatpush1.bf16.msra.mxu1 %v5286_v1  ;;  %v5360_v63 = vld [vmem:[#allocation9 + $0xd7c] ss:$20 sps:$4 sm:$0xff]  }
 0x183   :  { %3461 = vmatprep.subr.bf16.mxu0 %v5291_v2  ;;  %3707 = vmatprep.subr.bf16.mxu1 %v5294_v38  ;;  %v5355_v1 = vld [vmem:[#allocation9 + $0xd70] ss:$20 sps:$4 sm:$0xff]   ;;  %v5358_v2 = vld [vmem:[#allocation9 + $0xd78] ss:$20 sps:$4 sm:$0xff]  }
 0x184   :  { %v5363_v38 = vld [vmem:[#allocation9 + $0xd9c] ss:$20 sps:$4 sm:$0xff]  }
 0x186   :  { %3462 = vmatpush1.bf16.msra.mxu0 %v5289_v3  ;;  %3708 = vmatpush1.bf16.msra.mxu1 %v5292_v6  ;;  %v5366_v3 = vld [vmem:[#allocation9 + $0xda4] ss:$20 sps:$4 sm:$0xff]  }
 0x187   :  { %3463 = vmatprep.subr.bf16.mxu0 %v5297_v7  ;;  %3709 = vmatprep.subr.bf16.mxu1 %v5300_v8  ;;  %v5361_v6 = vld [vmem:[#allocation9 + $0xd98] ss:$20 sps:$4 sm:$0xff]   ;;  %v5364_v7 = vld [vmem:[#allocation9 + $0xda0] ss:$20 sps:$4 sm:$0xff]  }
 0x188   :  { %v5369_v8 = vld [vmem:[#allocation9 + $0xdc4] ss:$20 sps:$4 sm:$0xff]  }
 0x18a   :  { %3464 = vmatpush1.bf16.msra.mxu0 %v5295_v9  ;;  %3710 = vmatpush1.bf16.msra.mxu1 %v5298_v10  ;;  %v5372_v9 = vld [vmem:[#allocation9 + $0xdcc] ss:$20 sps:$4 sm:$0xff]  }
 0x18b   :  { %3465 = vmatprep.subr.bf16.mxu0 %v5303_v12  ;;  %3711 = vmatprep.subr.bf16.mxu1 %v5306_v13  ;;  %v5367_v10 = vld [vmem:[#allocation9 + $0xdc0] ss:$20 sps:$4 sm:$0xff]   ;;  %v5370_v12 = vld [vmem:[#allocation9 + $0xdc8] ss:$20 sps:$4 sm:$0xff]  }
 0x18c   :  { %v5375_v13 = vld [vmem:[#allocation9 + $0xdec] ss:$20 sps:$4 sm:$0xff]  }
 0x18e   :  { %3466 = vmatpush1.bf16.msra.mxu0 %v5301_v16  ;;  %3712 = vmatpush1.bf16.msra.mxu1 %v5304_v17  ;;  %v5378_v16 = vld [vmem:[#allocation9 + $0xdf4] ss:$20 sps:$4 sm:$0xff]  }
 0x18f   :  { %3467 = vmatprep.subr.bf16.mxu0 %v5309_v19  ;;  %3713 = vmatprep.subr.bf16.mxu1 %v5312_v21  ;;  %v5373_v17 = vld [vmem:[#allocation9 + $0xde8] ss:$20 sps:$4 sm:$0xff]   ;;  %v5376_v19 = vld [vmem:[#allocation9 + $0xdf0] ss:$20 sps:$4 sm:$0xff]  }
 0x190   :  { %v5381_v21 = vld [vmem:[#allocation9 + $0xe14] ss:$20 sps:$4 sm:$0xff]  }
 0x192   :  { %3468 = vmatpush1.bf16.msra.mxu0 %v5307_v44  ;;  %3714 = vmatpush1.bf16.msra.mxu1 %v5310_v22  ;;  %v5384_v44 = vld [vmem:[#allocation9 + $0xe1c] ss:$20 sps:$4 sm:$0xff]  }
 0x193   :  { %3469 = vmatprep.subr.bf16.mxu0 %v5315_v23  ;;  %3715 = vmatprep.subr.bf16.mxu1 %v5318_v24  ;;  %v5379_v22 = vld [vmem:[#allocation9 + $0xe10] ss:$20 sps:$4 sm:$0xff]   ;;  %v5382_v23 = vld [vmem:[#allocation9 + $0xe18] ss:$20 sps:$4 sm:$0xff]  }
 0x194   :  { %v5387_v24 = vld [vmem:[#allocation9 + $0xe3c] ss:$20 sps:$4 sm:$0xff]  }
 0x196   :  { %3470 = vmatpush1.bf16.msra.mxu0 %v5313_v26  ;;  %3716 = vmatpush1.bf16.msra.mxu1 %v5316_v27  ;;  %v5390_v26 = vld [vmem:[#allocation9 + $0xe44] ss:$20 sps:$4 sm:$0xff]  }
 0x197   :  { %3480 = vmatprep.subr.bf16.mxu0 %v5321_v28  ;;  %3726 = vmatprep.subr.bf16.mxu1 %v5324_v30  ;;  %v5385_v27 = vld [vmem:[#allocation9 + $0xe38] ss:$20 sps:$4 sm:$0xff]   ;;  %v5388_v28 = vld [vmem:[#allocation9 + $0xe40] ss:$20 sps:$4 sm:$0xff]  }
 0x198   :  { %v5393_v30 = vld [vmem:[#allocation9 + $0xe64] ss:$20 sps:$4 sm:$0xff]  }
 0x199   :  { %3472 = vmatmul.mubr.bf16.vlgmr.msra.gmra.mrb[0].mxu0 %v5828_v35  ;;  %3718 = vmatmul.mubr.bf16.vlgmr.msra.gmra.mrb[0].mxu1 %v5828_v35 }
 0x19a   :  { %3481 = vmatpush1.bf16.msra.mxu0 %v5319_v31  ;;  %3727 = vmatpush1.bf16.msra.mxu1 %v5322_v33  ;;  %v5396_v31 = vld [vmem:[#allocation9 + $0xe6c] ss:$20 sps:$4 sm:$0xff]  }
 0x19b   :  { %3482 = vmatprep.subr.bf16.mxu0 %v5327_v36  ;;  %3728 = vmatprep.subr.bf16.mxu1 %v5330_v37  ;;  %v5391_v33 = vld [vmem:[#allocation9 + $0xe60] ss:$20 sps:$4 sm:$0xff]  }
 0x19c   :  { %3512 = vmatprep.mubr.bf16.mxu0 %v5830_v40  ;;  %3758 = vmatprep.mubr.bf16.mxu1 %v5830_v40  ;;  %v5399_v36 = vld [vmem:[#allocation9 + $0xe8c] ss:$20 sps:$4 sm:$0xff]   ;;  %v5402_v37 = vld [vmem:[#allocation9 + $0xe94] ss:$20 sps:$4 sm:$0xff]  }
 0x19e   :  { %3483 = vmatpush1.bf16.msra.mxu0 %v5325_v39  ;;  %3729 = vmatpush1.bf16.msra.mxu1 %v5328_v41  ;;  %v5397_v39 = vld [vmem:[#allocation9 + $0xe88] ss:$20 sps:$4 sm:$0xff]   ;;  %v5400_v41 = vld [vmem:[#allocation9 + $0xe90] ss:$20 sps:$4 sm:$0xff]  }
 0x19f   :  { %3484 = vmatprep.subr.bf16.mxu0 %v5333_v5  ;;  %3730 = vmatprep.subr.bf16.mxu1 %v5336_v43  ;;  %v5405_v5 = vld [vmem:[#allocation9 + $0xeb4] ss:$20 sps:$4 sm:$0xff]   ;;  %v5408_v43 = vld [vmem:[#allocation9 + $0xebc] ss:$20 sps:$4 sm:$0xff]  }
 0x1a2   :  { %3485 = vmatpush1.bf16.msra.mxu0 %v5331_v42  ;;  %3731 = vmatpush1.bf16.msra.mxu1 %v5334_v45  ;;  %v5403_v42 = vld [vmem:[#allocation9 + $0xeb0] ss:$20 sps:$4 sm:$0xff]   ;;  %v5406_v45 = vld [vmem:[#allocation9 + $0xeb8] ss:$20 sps:$4 sm:$0xff]  }
 0x1a3   :  { %3486 = vmatprep.subr.bf16.mxu0 %v5339_v47  ;;  %3732 = vmatprep.subr.bf16.mxu1 %v5342_v48  ;;  %v5411_v47 = vld [vmem:[#allocation9 + $0xedc] ss:$20 sps:$4 sm:$0xff]   ;;  %v5414_v48 = vld [vmem:[#allocation9 + $0xee4] ss:$20 sps:$4 sm:$0xff]  }
 0x1a6   :  { %3487 = vmatpush1.bf16.msra.mxu0 %v5337_v49  ;;  %3733 = vmatpush1.bf16.msra.mxu1 %v5340_v52  ;;  %v5409_v49 = vld [vmem:[#allocation9 + $0xed8] ss:$20 sps:$4 sm:$0xff]   ;;  %v5412_v52 = vld [vmem:[#allocation9 + $0xee0] ss:$20 sps:$4 sm:$0xff]  }
 0x1a7   :  { %3488 = vmatprep.subr.bf16.mxu0 %v5345_v53  ;;  %3734 = vmatprep.subr.bf16.mxu1 %v5348_v54  ;;  %v5415_v53 = vld [vmem:[#allocation9 + $0x150] ss:$20 sps:$4 sm:$0xff]  }
 0x1a8   :  { %v5416_v54 = vld [vmem:[#allocation9 + $0x3d0] ss:$20 sps:$4 sm:$0xff]  }
 0x1aa   :  { %3489 = vmatpush1.bf16.msra.mxu0 %v5343_v55  ;;  %3735 = vmatpush1.bf16.msra.mxu1 %v5346_v56  ;;  %v5838_v55 = vpack.c.bf16 %v5822_v25, %v5822_v25  ;;  %v5417_v56 = vld [vmem:[#allocation9 + $0x10] ss:$20 sps:$4 sm:$0xff]   ;;  %v5423_v25 = vld [vmem:[#allocation9 + $0x1a0] ss:$20 sps:$4 sm:$0xff]  }
 0x1ab   :  { %3490 = vmatprep.subr.bf16.mxu0 %v5351_v57  ;;  %3736 = vmatprep.subr.bf16.mxu1 %v5354_v58  ;;  %v5418_v57 = vld [vmem:[#allocation9 + $0x290] ss:$20 sps:$4 sm:$0xff]   ;;  %v5419_v58 = vld [vmem:[#allocation9 + $0x178] ss:$20 sps:$4 sm:$0xff]  }
 0x1ae   :  { %3491 = vmatpush1.bf16.msra.mxu0 %v5349_v59  ;;  %3737 = vmatpush1.bf16.msra.mxu1 %v5352_v61  ;;  %v5420_v59 = vld [vmem:[#allocation9 + $0x3f8] ss:$20 sps:$4 sm:$0xff]  }
 0x1af   :  { %3492 = vmatprep.subr.bf16.mxu0 %v5357_v62  ;;  %3738 = vmatprep.subr.bf16.mxu1 %v5360_v63  ;;  %v5421_v61 = vld [vmem:[#allocation9 + $0x38] ss:$20 sps:$4 sm:$0xff]   ;;  %v5424_v63 = vld [vmem:[#allocation9 + $0x420] ss:$20 sps:$4 sm:$0xff]  }
 0x1b0   :  { %v5422_v62 = vld [vmem:[#allocation9 + $0x2b8] ss:$20 sps:$4 sm:$0xff]  }
 0x1b2   :  { %3493 = vmatpush1.bf16.msra.mxu0 %v5355_v1  ;;  %3739 = vmatpush1.bf16.msra.mxu1 %v5358_v2  ;;  %v5425_v1 = vld [vmem:[#allocation9 + $0x60] ss:$20 sps:$4 sm:$0xff]  }
 0x1b3   :  { %3494 = vmatprep.subr.bf16.mxu0 %v5363_v38  ;;  %3740 = vmatprep.subr.bf16.mxu1 %v5366_v3  ;;  %v5426_v2 = vld [vmem:[#allocation9 + $0x2e0] ss:$20 sps:$4 sm:$0xff]   ;;  %v5427_v38 = vld [vmem:[#allocation9 + $0x1c8] ss:$20 sps:$4 sm:$0xff]  }
 0x1b4   :  { %v5428_v3 = vld [vmem:[#allocation9 + $0x448] ss:$20 sps:$4 sm:$0xff]  }
 0x1b6   :  { %3495 = vmatpush1.bf16.msra.mxu0 %v5361_v6  ;;  %3741 = vmatpush1.bf16.msra.mxu1 %v5364_v7  ;;  %v5429_v6 = vld [vmem:[#allocation9 + $0x88] ss:$20 sps:$4 sm:$0xff]  }
 0x1b7   :  { %3496 = vmatprep.subr.bf16.mxu0 %v5369_v8  ;;  %3742 = vmatprep.subr.bf16.mxu1 %v5372_v9  ;;  %v5430_v7 = vld [vmem:[#allocation9 + $0x308] ss:$20 sps:$4 sm:$0xff]   ;;  %v5431_v8 = vld [vmem:[#allocation9 + $0x1f0] ss:$20 sps:$4 sm:$0xff]  }
 0x1b8   :  { %v5432_v9 = vld [vmem:[#allocation9 + $0x470] ss:$20 sps:$4 sm:$0xff]  }
 0x1ba   :  { %3497 = vmatpush1.bf16.msra.mxu0 %v5367_v10  ;;  %3743 = vmatpush1.bf16.msra.mxu1 %v5370_v12  ;;  %v5435_v10 = vld [vmem:[#allocation9 + $0x218] ss:$20 sps:$4 sm:$0xff]  }
 0x1bb   :  { %3498 = vmatprep.subr.bf16.mxu0 %v5375_v13  ;;  %3744 = vmatprep.subr.bf16.mxu1 %v5378_v16  ;;  %v5436_v12 = vld [vmem:[#allocation9 + $0x498] ss:$20 sps:$4 sm:$0xff]  }
 0x1bc   :  { %v5437_v13 = vld [vmem:[#allocation9 + $0xd8] ss:$20 sps:$4 sm:$0xff]  }
 0x1bd   :  { %v5438_v16 = vld [vmem:[#allocation9 + $0x358] ss:$20 sps:$4 sm:$0xff]  }
 0x1be   :  { %3499 = vmatpush1.bf16.msra.mxu0 %v5373_v17  ;;  %3745 = vmatpush1.bf16.msra.mxu1 %v5376_v19  ;;  %v5439_v17 = vld [vmem:[#allocation9 + $0x240] ss:$20 sps:$4 sm:$0xff]  }
 0x1bf   :  { %3500 = vmatprep.subr.bf16.mxu0 %v5381_v21  ;;  %3746 = vmatprep.subr.bf16.mxu1 %v5384_v44  ;;  %v5440_v19 = vld [vmem:[#allocation9 + $0x4c0] ss:$20 sps:$4 sm:$0xff]  }
 0x1c0   :  { %v5441_v21 = vld [vmem:[#allocation9 + $0x100] ss:$20 sps:$4 sm:$0xff]  }
 0x1c1   :  { %v5442_v44 = vld [vmem:[#allocation9 + $0x380] ss:$20 sps:$4 sm:$0xff]  }
 0x1c2   :  { %3501 = vmatpush1.bf16.msra.mxu0 %v5379_v22  ;;  %3747 = vmatpush1.bf16.msra.mxu1 %v5382_v23  ;;  %v5443_v22 = vld [vmem:[#allocation9 + $0x268] ss:$20 sps:$4 sm:$0xff]  }
 0x1c3   :  { %3502 = vmatprep.subr.bf16.mxu0 %v5387_v24  ;;  %3748 = vmatprep.subr.bf16.mxu1 %v5390_v26  ;;  %v5444_v23 = vld [vmem:[#allocation9 + $0x4e8] ss:$20 sps:$4 sm:$0xff]  }
 0x1c4   :  { %v5445_v24 = vld [vmem:[#allocation9 + $0x128] ss:$20 sps:$4 sm:$0xff]  }
 0x1c5   :  { %v5446_v26 = vld [vmem:[#allocation9 + $0x3a8] ss:$20 sps:$4 sm:$0xff]  }
 0x1c6   :  { %3503 = vmatpush1.bf16.msra.mxu0 %v5385_v27  ;;  %3749 = vmatpush1.bf16.msra.mxu1 %v5388_v28  ;;  %v5447_v27 = vld [vmem:[#allocation9 + $0x650] ss:$20 sps:$4 sm:$0xff]  }
 0x1c7   :  { %3504 = vmatprep.subr.bf16.mxu0 %v5393_v30  ;;  %3750 = vmatprep.subr.bf16.mxu1 %v5396_v31  ;;  %v5448_v28 = vld [vmem:[#allocation9 + $0x8d0] ss:$20 sps:$4 sm:$0xff]  }
 0x1c8   :  { %v5449_v30 = vld [vmem:[#allocation9 + $0x510] ss:$20 sps:$4 sm:$0xff]  }
 0x1c9   :  { %v5450_v31 = vld [vmem:[#allocation9 + $0x790] ss:$20 sps:$4 sm:$0xff]  }
 0x1ca   :  { %3505 = vmatpush1.bf16.msra.mxu0 %v5391_v33  ;;  %3751 = vmatpush1.bf16.msra.mxu1 %v5394_v34  ;;  %v5451_v33 = vld [vmem:[#allocation9 + $0x678] ss:$20 sps:$4 sm:$0xff]  }
 0x1cb   :  { %3506 = vmatprep.subr.bf16.mxu0 %v5399_v36  ;;  %3752 = vmatprep.subr.bf16.mxu1 %v5402_v37  ;;  %v5452_v34 = vld [vmem:[#allocation9 + $0x8f8] ss:$20 sps:$4 sm:$0xff]  }
 0x1cc   :  { %v5453_v36 = vld [vmem:[#allocation9 + $0x538] ss:$20 sps:$4 sm:$0xff]  }
 0x1cd   :  { %v5454_v37 = vld [vmem:[#allocation9 + $0x7b8] ss:$20 sps:$4 sm:$0xff]  }
 0x1ce   :  { %3507 = vmatpush1.bf16.msra.mxu0 %v5397_v39  ;;  %3753 = vmatpush1.bf16.msra.mxu1 %v5400_v41  ;;  %v5455_v39 = vld [vmem:[#allocation9 + $0x6a0] ss:$20 sps:$4 sm:$0xff]  }
 0x1cf   :  { %3508 = vmatprep.subr.bf16.mxu0 %v5405_v5  ;;  %3754 = vmatprep.subr.bf16.mxu1 %v5408_v43  ;;  %v5456_v41 = vld [vmem:[#allocation9 + $0x920] ss:$20 sps:$4 sm:$0xff]  }
 0x1d0   :  { %v5457_v5 = vld [vmem:[#allocation9 + $0x560] ss:$20 sps:$4 sm:$0xff]  }
 0x1d1   :  { %v5458_v43 = vld [vmem:[#allocation9 + $0x7e0] ss:$20 sps:$4 sm:$0xff]  }
 0x1d2   :  { %3509 = vmatpush1.bf16.msra.mxu0 %v5403_v42  ;;  %3755 = vmatpush1.bf16.msra.mxu1 %v5406_v45  ;;  %v5461_v42 = vld [vmem:[#allocation9 + $0x588] ss:$20 sps:$4 sm:$0xff]  }
 0x1d3   :  { %3510 = vmatprep.subr.bf16.mxu0 %v5411_v47  ;;  %3756 = vmatprep.subr.bf16.mxu1 %v5414_v48  ;;  %v5462_v45 = vld [vmem:[#allocation9 + $0x808] ss:$20 sps:$4 sm:$0xff]   ;;  %v5463_v47 = vld [vmem:[#allocation9 + $0x6f0] ss:$20 sps:$4 sm:$0xff]  }
 0x1d4   :  { %v5464_v48 = vld [vmem:[#allocation9 + $0x970] ss:$20 sps:$4 sm:$0xff]  }
 0x1d6   :  { %3511 = vmatpush1.bf16.msra.mxu0 %v5409_v49  ;;  %3757 = vmatpush1.bf16.msra.mxu1 %v5412_v52  ;;  %v5467_v49 = vld [vmem:[#allocation9 + $0x718] ss:$20 sps:$4 sm:$0xff]  }
 0x1d7   :  { %4657 = vmatprep.subr.bf16.mxu0 %v5415_v53  ;;  %4679 = vmatprep.subr.bf16.mxu1 %v5416_v54  ;;  %v5468_v52 = vld [vmem:[#allocation9 + $0x998] ss:$20 sps:$4 sm:$0xff]  }
 0x1d8   :  { %v5469_v53 = vld [vmem:[#allocation9 + $0x5d8] ss:$20 sps:$4 sm:$0xff]  }
 0x1d9   :  { %3513 = vmatmul.mubr.bf16.vlgmr.msra.gmra.mrb[0].mxu0 %v5838_v55  ;;  %3759 = vmatmul.mubr.bf16.vlgmr.msra.gmra.mrb[0].mxu1 %v5838_v55  ;;  %v5470_v54 = vld [vmem:[#allocation9 + $0x858] ss:$20 sps:$4 sm:$0xff]  }
 0x1da   :  { %4658 = vmatpush3.bf16.msra.mxu0 %v5417_v56  ;;  %4680 = vmatpush3.bf16.msra.mxu1 %v5418_v57  ;;  %v5471_v56 = vld [vmem:[#allocation9 + $0x740] ss:$20 sps:$4 sm:$0xff]  }
 0x1db   :  { %4659 = vmatprep.subr.bf16.mxu0 %v5419_v58  ;;  %4681 = vmatprep.subr.bf16.mxu1 %v5420_v59  ;;  %v5472_v57 = vld [vmem:[#allocation9 + $0x9c0] ss:$20 sps:$4 sm:$0xff]  }
 0x1dc   :  { %3799 = vmatprep.mubr.bf16.mxu0 %v5757_v29  ;;  %3839 = vmatprep.mubr.bf16.mxu1 %v5773_v50  ;;  %v5433_v29 = vld [vmem:[#allocation9 + $0xb0] ss:$20 sps:$4 sm:$0xff]   ;;  %v5473_v58 = vld [vmem:[#allocation9 + $0x600] ss:$20 sps:$4 sm:$0xff]  }
 0x1dd   :  { %v5434_v50 = vld [vmem:[#allocation9 + $0x330] ss:$20 sps:$4 sm:$0xff]   ;;  %v5474_v59 = vld [vmem:[#allocation9 + $0x880] ss:$20 sps:$4 sm:$0xff]  }
 0x1de   :  { %4660 = vmatpush3.bf16.msra.mxu0 %v5421_v61  ;;  %4682 = vmatpush3.bf16.msra.mxu1 %v5422_v62  ;;  %v5475_v61 = vld [vmem:[#allocation9 + $0x768] ss:$20 sps:$4 sm:$0xff]  }
 0x1df   :  { %4661 = vmatprep.subr.bf16.mxu0 %v5423_v25  ;;  %4683 = vmatprep.subr.bf16.mxu1 %v5424_v63  ;;  %v5476_v62 = vld [vmem:[#allocation9 + $0x9e8] ss:$20 sps:$4 sm:$0xff]  }
 0x1e0   :  { %v5477_v25 = vld [vmem:[#allocation9 + $0x628] ss:$20 sps:$4 sm:$0xff]  }
 0x1e1   :  { %v5478_v63 = vld [vmem:[#allocation9 + $0x8a8] ss:$20 sps:$4 sm:$0xff]  }
 0x1e2   :  { %4662 = vmatpush3.bf16.msra.mxu0 %v5425_v1  ;;  %4684 = vmatpush3.bf16.msra.mxu1 %v5426_v2  ;;  %v5479_v1 = vld [vmem:[#allocation9 + $0xb50] ss:$20 sps:$4 sm:$0xff]  }
 0x1e3   :  { %4663 = vmatprep.subr.bf16.mxu0 %v5427_v38  ;;  %4685 = vmatprep.subr.bf16.mxu1 %v5428_v3  ;;  %v5480_v2 = vld [vmem:[#allocation9 + $0xdd0] ss:$20 sps:$4 sm:$0xff]  }
 0x1e4   :  { %v5481_v38 = vld [vmem:[#allocation9 + $0xa10] ss:$20 sps:$4 sm:$0xff]  }
 0x1e5   :  { %v5482_v3 = vld [vmem:[#allocation9 + $0xc90] ss:$20 sps:$4 sm:$0xff]  }
 0x1e6   :  { %4664 = vmatpush3.bf16.msra.mxu0 %v5429_v6  ;;  %4686 = vmatpush3.bf16.msra.mxu1 %v5430_v7  ;;  %v5483_v6 = vld [vmem:[#allocation9 + $0xb78] ss:$20 sps:$4 sm:$0xff]  }
 0x1e7   :  { %4665 = vmatprep.subr.bf16.mxu0 %v5431_v8  ;;  %4687 = vmatprep.subr.bf16.mxu1 %v5432_v9  ;;  %v5484_v7 = vld [vmem:[#allocation9 + $0xdf8] ss:$20 sps:$4 sm:$0xff]  }
 0x1e8   :  { %v5485_v8 = vld [vmem:[#allocation9 + $0xa38] ss:$20 sps:$4 sm:$0xff]  }
 0x1e9   :  { %v5486_v9 = vld [vmem:[#allocation9 + $0xcb8] ss:$20 sps:$4 sm:$0xff]  }
 0x1ea   :  { %4666 = vmatpush3.bf16.msra.mxu0 %v5433_v29  ;;  %4688 = vmatpush3.bf16.msra.mxu1 %v5434_v50  ;;  %v5487_v29 = vld [vmem:[#allocation9 + $0xba0] ss:$20 sps:$4 sm:$0xff]  }
 0x1eb   :  { %4667 = vmatprep.subr.bf16.mxu0 %v5435_v10  ;;  %4689 = vmatprep.subr.bf16.mxu1 %v5436_v12  ;;  %v5488_v50 = vld [vmem:[#allocation9 + $0xe20] ss:$20 sps:$4 sm:$0xff]  }
 0x1ec   :  { %v5489_v10 = vld [vmem:[#allocation9 + $0xa60] ss:$20 sps:$4 sm:$0xff]  }
 0x1ed   :  { %v5490_v12 = vld [vmem:[#allocation9 + $0xce0] ss:$20 sps:$4 sm:$0xff]  }
 0x1ee   :  { %4668 = vmatpush3.bf16.msra.mxu0 %v5437_v13  ;;  %4690 = vmatpush3.bf16.msra.mxu1 %v5438_v16  ;;  %v5493_v13 = vld [vmem:[#allocation9 + $0xa88] ss:$20 sps:$4 sm:$0xff]  }
 0x1ef   :  { %4669 = vmatprep.subr.bf16.mxu0 %v5439_v17  ;;  %4691 = vmatprep.subr.bf16.mxu1 %v5440_v19  ;;  %v5494_v16 = vld [vmem:[#allocation9 + $0xd08] ss:$20 sps:$4 sm:$0xff]   ;;  %v5495_v17 = vld [vmem:[#allocation9 + $0xbf0] ss:$20 sps:$4 sm:$0xff]  }
 0x1f0   :  { %v5496_v19 = vld [vmem:[#allocation9 + $0xe70] ss:$20 sps:$4 sm:$0xff]  }
 0x1f2   :  { %4670 = vmatpush3.bf16.msra.mxu0 %v5441_v21  ;;  %4692 = vmatpush3.bf16.msra.mxu1 %v5442_v44  ;;  %v5499_v21 = vld [vmem:[#allocation9 + $0xc18] ss:$20 sps:$4 sm:$0xff]  }
 0x1f3   :  { %4671 = vmatprep.subr.bf16.mxu0 %v5443_v22  ;;  %4693 = vmatprep.subr.bf16.mxu1 %v5444_v23  ;;  %v5500_v44 = vld [vmem:[#allocation9 + $0xe98] ss:$20 sps:$4 sm:$0xff]  }
 0x1f4   :  { %v5501_v22 = vld [vmem:[#allocation9 + $0xad8] ss:$20 sps:$4 sm:$0xff]  }
 0x1f5   :  { %v5502_v23 = vld [vmem:[#allocation9 + $0xd58] ss:$20 sps:$4 sm:$0xff]  }
 0x1f6   :  { %4672 = vmatpush3.bf16.msra.mxu0 %v5445_v24  ;;  %4694 = vmatpush3.bf16.msra.mxu1 %v5446_v26  ;;  %v5503_v24 = vld [vmem:[#allocation9 + $0xc40] ss:$20 sps:$4 sm:$0xff]  }
 0x1f7   :  { %4701 = vmatprep.subr.bf16.mxu0 %v5447_v27  ;;  %4723 = vmatprep.subr.bf16.mxu1 %v5448_v28  ;;  %v5504_v26 = vld [vmem:[#allocation9 + $0xec0] ss:$20 sps:$4 sm:$0xff]  }
 0x1f8   :  { %v5505_v27 = vld [vmem:[#allocation9 + $0xb00] ss:$20 sps:$4 sm:$0xff]  }
 0x1f9   :  { %3800 = vmatmul.mubr.bf16.vlgmr.msra.gmra.mrb[4].mxu0 %v5759_v32  ;;  %3840 = vmatmul.mubr.bf16.vlgmr.msra.gmra.mrb[4].mxu1 %v5786_v46  ;;  %v5459_v32 = vld [vmem:[#allocation9 + $0x6c8] ss:$20 sps:$4 sm:$0xff]   ;;  %v5506_v28 = vld [vmem:[#allocation9 + $0xd80] ss:$20 sps:$4 sm:$0xff]  }
 0x1fa   :  { %4702 = vmatpush3.bf16.msra.mxu0 %v5449_v30  ;;  %4724 = vmatpush3.bf16.msra.mxu1 %v5450_v31  ;;  %v5460_v46 = vld [vmem:[#allocation9 + $0x948] ss:$20 sps:$4 sm:$0xff]  }
 0x1fb   :  { %4703 = vmatprep.subr.bf16.mxu0 %v5451_v33  ;;  %4725 = vmatprep.subr.bf16.mxu1 %v5452_v34  ;;  %v5507_v30 = vld [vmem:[#allocation9 + $0xc68] ss:$20 sps:$4 sm:$0xff]  }
 0x1fc   :  { %3879 = vmatprep.mubr.bf16.mxu0 %v5788_v51  ;;  %3919 = vmatprep.mubr.bf16.mxu1 %v5802_v0  ;;  %v5465_v51 = vld [vmem:[#allocation9 + $0x5b0] ss:$20 sps:$4 sm:$0xff]   ;;  %v5508_v31 = vld [vmem:[#allocation9 + $0xee8] ss:$20 sps:$4 sm:$0xff]  }
 0x1fd   :  { %v5466_v0 = vld [vmem:[#allocation9 + $0x830] ss:$20 sps:$4 sm:$0xff]   ;;  %v5509_v33 = vld [vmem:[#allocation9 + $0xb28] ss:$20 sps:$4 sm:$0xff]  }
 0x1fe   :  { %4704 = vmatpush3.bf16.msra.mxu0 %v5453_v36  ;;  %4726 = vmatpush3.bf16.msra.mxu1 %v5454_v37  ;;  %v5510_v34 = vld [vmem:[#allocation9 + $0xda8] ss:$20 sps:$4 sm:$0xff]  }
 0x1ff   :  { %4705 = vmatprep.subr.bf16.mxu0 %v5455_v39  ;;  %4727 = vmatprep.subr.bf16.mxu1 %v5456_v41 }
 0x202   :  { %4706 = vmatpush3.bf16.msra.mxu0 %v5457_v5  ;;  %4728 = vmatpush3.bf16.msra.mxu1 %v5458_v43 }
 0x203   :  { %4707 = vmatprep.subr.bf16.mxu0 %v5459_v32  ;;  %4729 = vmatprep.subr.bf16.mxu1 %v5460_v46 }
 0x206   :  { %4708 = vmatpush3.bf16.msra.mxu0 %v5461_v42  ;;  %4730 = vmatpush3.bf16.msra.mxu1 %v5462_v45 }
 0x207   :  { %4709 = vmatprep.subr.bf16.mxu0 %v5463_v47  ;;  %4731 = vmatprep.subr.bf16.mxu1 %v5464_v48 }
 0x20a   :  { %4710 = vmatpush3.bf16.msra.mxu0 %v5465_v51  ;;  %4732 = vmatpush3.bf16.msra.mxu1 %v5466_v0 }
 0x20b   :  { %4711 = vmatprep.subr.bf16.mxu0 %v5467_v49  ;;  %4733 = vmatprep.subr.bf16.mxu1 %v5468_v52 }
 0x20e   :  { %4712 = vmatpush3.bf16.msra.mxu0 %v5469_v53  ;;  %4734 = vmatpush3.bf16.msra.mxu1 %v5470_v54 }
 0x20f   :  { %4713 = vmatprep.subr.bf16.mxu0 %v5471_v56  ;;  %4735 = vmatprep.subr.bf16.mxu1 %v5472_v57 }
 0x212   :  { %4714 = vmatpush3.bf16.msra.mxu0 %v5473_v58  ;;  %4736 = vmatpush3.bf16.msra.mxu1 %v5474_v59 }
 0x213   :  { %4715 = vmatprep.subr.bf16.mxu0 %v5475_v61  ;;  %4737 = vmatprep.subr.bf16.mxu1 %v5476_v62 }
 0x216   :  { %4716 = vmatpush3.bf16.msra.mxu0 %v5477_v25  ;;  %4738 = vmatpush3.bf16.msra.mxu1 %v5478_v63 }
 0x217   :  { %4745 = vmatprep.subr.bf16.mxu0 %v5479_v1  ;;  %4767 = vmatprep.subr.bf16.mxu1 %v5480_v2 }
 0x219   :  { %3880 = vmatmul.mubr.bf16.vlgmr.msra.gmra.mrb[8].mxu0 %v5800_v60  ;;  %3920 = vmatmul.mubr.bf16.vlgmr.msra.gmra.mrb[8].mxu1 %v5814_v14  ;;  %v5491_v60 = vld [vmem:[#allocation9 + $0xbc8] ss:$20 sps:$4 sm:$0xff]  }
 0x21a   :  { %4746 = vmatpush3.bf16.msra.mxu0 %v5481_v38  ;;  %4768 = vmatpush3.bf16.msra.mxu1 %v5482_v3  ;;  %v5492_v14 = vld [vmem:[#allocation9 + $0xe48] ss:$20 sps:$4 sm:$0xff]  }
 0x21b   :  { %4747 = vmatprep.subr.bf16.mxu0 %v5483_v6  ;;  %4769 = vmatprep.subr.bf16.mxu1 %v5484_v7 }
 0x21c   :  { %3959 = vmatprep.mubr.bf16.mxu0 %v5816_v20  ;;  %3999 = vmatprep.mubr.bf16.mxu1 %v5830_v40  ;;  %v5497_v20 = vld [vmem:[#allocation9 + $0xab0] ss:$20 sps:$4 sm:$0xff]  }
 0x21d   :  { %v5498_v40 = vld [vmem:[#allocation9 + $0xd30] ss:$20 sps:$4 sm:$0xff]  }
 0x21e   :  { %4748 = vmatpush3.bf16.msra.mxu0 %v5485_v8  ;;  %4770 = vmatpush3.bf16.msra.mxu1 %v5486_v9 }
 0x21f   :  { %4749 = vmatprep.subr.bf16.mxu0 %v5487_v29  ;;  %4771 = vmatprep.subr.bf16.mxu1 %v5488_v50 }
 0x222   :  { %4750 = vmatpush3.bf16.msra.mxu0 %v5489_v10  ;;  %4772 = vmatpush3.bf16.msra.mxu1 %v5490_v12 }
 0x223   :  { %4751 = vmatprep.subr.bf16.mxu0 %v5491_v60  ;;  %4773 = vmatprep.subr.bf16.mxu1 %v5492_v14 }
 0x226   :  { %4752 = vmatpush3.bf16.msra.mxu0 %v5493_v13  ;;  %4774 = vmatpush3.bf16.msra.mxu1 %v5494_v16 }
 0x227   :  { %4753 = vmatprep.subr.bf16.mxu0 %v5495_v17  ;;  %4775 = vmatprep.subr.bf16.mxu1 %v5496_v19 }
 0x22a   :  { %4754 = vmatpush3.bf16.msra.mxu0 %v5497_v20  ;;  %4776 = vmatpush3.bf16.msra.mxu1 %v5498_v40 }
 0x22b   :  { %4755 = vmatprep.subr.bf16.mxu0 %v5499_v21  ;;  %4777 = vmatprep.subr.bf16.mxu1 %v5500_v44 }
 0x22e   :  { %4756 = vmatpush3.bf16.msra.mxu0 %v5501_v22  ;;  %4778 = vmatpush3.bf16.msra.mxu1 %v5502_v23 }
 0x22f   :  { %4757 = vmatprep.subr.bf16.mxu0 %v5503_v24  ;;  %4779 = vmatprep.subr.bf16.mxu1 %v5504_v26 }
 0x232   :  { %4758 = vmatpush3.bf16.msra.mxu0 %v5505_v27  ;;  %4780 = vmatpush3.bf16.msra.mxu1 %v5506_v28 }
 0x233   :  { %4759 = vmatprep.subr.bf16.mxu0 %v5507_v30  ;;  %4781 = vmatprep.subr.bf16.mxu1 %v5508_v31 }
 0x236   :  { %4760 = vmatpush3.bf16.msra.mxu0 %v5509_v33  ;;  %4782 = vmatpush3.bf16.msra.mxu1 %v5510_v34 }
 0x239   :  { %3960 = vmatmul.mubr.bf16.vlgmr.msra.gmra.mrb[12].mxu0 %v5828_v35  ;;  %4000 = vmatmul.mubr.bf16.vlgmr.msra.gmra.mrb[12].mxu1 %v5838_v55 }
 0x2ac   :  { %v5854_v36 = vpop.f32.mrb[0].mxu0  ;;  %v3760_v37 = vpop.f32.mrb[0].mxu1 }
 0x2ad   :  { %v4073_v39 = vrot.slane %v3760_v37, 1  ;;  %v3516_v41 = vpop.f32.mrb[1].mxu0  ;;  %v3762_v5 = vpop.f32.mrb[1].mxu1 }
 0x2ae   :  { %v4012_v43 = vcombine.low %v5854_v36, %v3516_v41  ;;  %v4042_v32 = vrot.slane %v3516_v41, 1  ;;  %v4013_v46 = vcombine.low %v3760_v37, %v3762_v5  ;;  %v4102_v42 = vrot.slane %v3762_v5, 1  ;;  %v3518_v45 = vpop.f32.mrb[2].mxu0  ;;  %v3764_v47 = vpop.f32.mrb[2].mxu1 }
 0x2af   :  { %v4075_v48 = vadd.f32 %v4073_v39, %v3760_v37  ;;  %v3519_v51 = vpop.f32.mrb[3].mxu0  ;;  %v3765_v0 = vpop.f32.mrb[3].mxu1 }
 0x2b0   :  { %v4020_v35 = vrot.slane %v4012_v43, %v5741_v15  ;;  %v4044_v49 = vadd.f32 %v4042_v32, %v3516_v41  ;;  %v4027_v55 = vrot.slane %v4013_v46, %v5741_v15  ;;  %v4104_v52 = vadd.f32 %v4102_v42, %v3762_v5 }
 0x2b1   :  { %v4076_v53 = vmul.f32 0.5, %v4075_v48 }
 0x2b2   :  { %v4045_v54 = vmul.f32 0.5, %v4044_v49  ;;  %v4028_v56 = vcombine.low %v4020_v35, %v4027_v55  ;;  %v4105_v57 = vmul.f32 0.5, %v4104_v52 }
 0x2b3   :  { %v4080_v58 = vrot.slane %v4076_v53, %v5744_v18 }
 0x2b4   :  { %4038 = vst [vmem:[%s5898_s5] sm:$0xff] %v4028_v56  ;;  %v4109_v59 = vrot.slane %v4105_v57, %v5744_v18  ;;  %v4049_v61 = vrot.slane %v4045_v54, %v5744_v18 }
 0x2b5   :  { %v4081_v62 = vsel %vm99_vm0, %v4080_v58, %v3760_v37 }
 0x2b6   :  { %v4110_v15 = vsel %vm99_vm0, %v4109_v59, %v3762_v5  ;;  %v4050_v25 = vsel %vm99_vm0, %v4049_v61, %v3516_v41  ;;  %v4082_v63 = vsub.f32 %v5854_v36, %v4081_v62 }
 0x2b7   :  { %v4111_v1 = vsub.f32 %v5854_v36, %v4110_v15  ;;  %v4051_v2 = vsub.f32 %v5854_v36, %v4050_v25 }
 0x2b8   :  { %v4083_v6 = vmul.f32 %v4082_v63, %v4082_v63 }
 0x2b9   :  { %v4112_v38 = vmul.f32 %v4111_v1, %v4111_v1  ;;  %v4052_v3 = vmul.f32 %v4051_v2, %v4051_v2 }
 0x2bb   :  { %4114 = vrot.lane.b32.xlu1 %v4112_v38, %s5637_s3  ;;  %4054 = vrot.lane.b32.xlu0 %v4052_v3, %s5637_s3 }
 0x2bf   :  { %4085 = vrot.lane.b32.xlu0 %v4083_v6, %s5637_s3 }
 0x2cc   :  { %v4673_v7 = vpop.f32.mrb[4].mxu0  ;;  %v4695_v8 = vpop.f32.mrb[4].mxu1 }
 0x2cd   :  { %v4674_v9 = vpop.f32.mrb[5].mxu0  ;;  %v4696_v29 = vpop.f32.mrb[5].mxu1 }
 0x2ce   :  { %v4675_v50 = vadd.f32 %v4674_v9, %v4673_v7  ;;  %v4697_v10 = vadd.f32 %v4696_v29, %v4695_v8  ;;  %v4676_v12 = vpop.f32.mrb[6].mxu0  ;;  %v4698_v60 = vpop.f32.mrb[6].mxu1 }
 0x2cf   :  { %v4677_v14 = vpop.f32.mrb[7].mxu0  ;;  %v4699_v13 = vpop.f32.mrb[7].mxu1 }
 0x2d0   :  { %v3842_v16 = vadd.f32 %v4697_v10, %v4675_v50 }
 0x2ec   :  { %v4717_v17 = vpop.f32.mrb[8].mxu0  ;;  %v4739_v19 = vpop.f32.mrb[8].mxu1 }
 0x2ed   :  { %v4718_v20 = vpop.f32.mrb[9].mxu0  ;;  %v4740_v40 = vpop.f32.mrb[9].mxu1 }
 0x2ee   :  { %v4719_v21 = vadd.f32 %v4718_v20, %v4717_v17  ;;  %v4741_v44 = vadd.f32 %v4740_v40, %v4739_v19  ;;  %v4720_v22 = vpop.f32.mrb[10].mxu0  ;;  %v4742_v23 = vpop.f32.mrb[10].mxu1  ;;  %v4041_v20 = vand.u32 127, %v97_v4 }
 0x2ef   :  { %v4721_v24 = vpop.f32.mrb[11].mxu0  ;;  %v4743_v26 = vpop.f32.mrb[11].mxu1 }
 0x2f0   :  { %v3882_v27 = vadd.f32 %v4719_v21, %v3842_v16  ;;  %vm4099_vm3 = vcmp.eq.s32.totalorder %v4041_v20, 1  ;;  %vm4070_vm4 = vcmp.eq.s32.totalorder %v4041_v20, 0  ;;  %vm4128_vm5 = vcmp.eq.s32.totalorder %v4041_v20, 2 }
 0x2f1   :  { %vm4157_vm6 = vcmp.eq.s32.totalorder %v4041_v20, 3 }
 0x2f2   :  { %v3922_v28 = vadd.f32 %v4741_v44, %v3882_v27 }
 0x30c   :  { %v4761_v30 = vpop.f32.mrb[12].mxu0  ;;  %v4783_v31 = vpop.f32.mrb[12].mxu1 }
 0x30d   :  { %v4762_v33 = vpop.f32.mrb[13].mxu0  ;;  %v4784_v34 = vpop.f32.mrb[13].mxu1 }
 0x30e   :  { %v4763_v37 = vadd.f32 %v4762_v33, %v4761_v30  ;;  %v4785_v39 = vadd.f32 %v4784_v34, %v4783_v31  ;;  %v4764_v41 = vpop.f32.mrb[14].mxu0  ;;  %v4786_v5 = vpop.f32.mrb[14].mxu1 }
 0x30f   :  { %v4765_v43 = vpop.f32.mrb[15].mxu0  ;;  %v4787_v32 = vpop.f32.mrb[15].mxu1 }
 0x310   :  { %v3962_v46 = vadd.f32 %v4763_v37, %v3922_v28 }
 0x312   :  { %v4002_v42 = vadd.f32 %v4785_v39, %v3962_v46 }
 0x314   :  { %4656 = vst.sshfl [vmem:[%s5898_s5 + $0x8] sm:$0x3 pattern:$0x76325410] %v4002_v42  ;;  %v4131_v45 = vrot.slane %v4002_v42, 1 }
 0x316   :  { %v4133_v47 = vadd.f32 %v4131_v45, %v4002_v42 }
 0x318   :  { %v4134_v48 = vmul.f32 0.5, %v4133_v47 }
 0x31a   :  { %v4138_v51 = vrot.slane %v4134_v48, %v5744_v18 }
 0x31c   :  { %v4139_v0 = vsel %vm99_vm0, %v4138_v51, %v4002_v42 }
 0x31d   :  { %v4140_v35 = vsub.f32 %v5854_v36, %v4139_v0 }
 0x31f   :  { %v4141_v49 = vmul.f32 %v4140_v35, %v4140_v35 }
 0x321   :  { %4143 = vrot.lane.b32.xlu1 %v4141_v49, %s5637_s3 }
 0x32d   :  { %v4055_v55 = vpop.permute.xlu0 %4054  ;;  %v4115_v53 = vpop.permute.xlu1 %4114 }
 0x32e   :  { %v4058_v52 = vsel %vm4057_vm1, %v4055_v55, 0.0  ;;  %v4117_v54 = vsel %vm4057_vm1, %v4115_v53, 0.0 }
 0x32f   :  { %4059 = vadd.xlane.f32.xlu0 %v4058_v52 }
 0x331   :  { %v4086_v56 = vpop.permute.xlu0 %4085 }
 0x332   :  { %v4088_v57 = vsel %vm4057_vm1, %v4086_v56, 0.0 }
 0x333   :  { %4118 = vadd.xlane.f32.xlu0 %v4117_v54 }
 0x345   :  { %4089 = vadd.xlane.f32.xlu1 %v4088_v57 }
 0x393   :  { %v4144_v58 = vpop.permute.xlu1 %4143 }
 0x394   :  { %v4146_v18 = vsel %vm4057_vm1, %v4144_v58, 0.0 }
 0x395   :  { %4147 = vadd.xlane.f32.xlu0 %v4146_v18 }
 0x3bc   :  { %v4060_v11 = vpop.xlane.xlu0 %4059 }
 0x3bd   :  { %v4062_v61 = vsel %vm4061_vm2, %v4060_v11, 0.0 }
 0x3be   :  { %v4063_v25 = vrot.slane %v4062_v61, 4 }
 0x3c0   :  { %v4119_v62 = vpop.xlane.xlu0 %4118  ;;  %v4064_v2 = vadd.f32 %v4063_v25, %v4062_v61 }
 0x3c1   :  { %v4120_v63 = vsel %vm4061_vm2, %v4119_v62, 0.0 }
 0x3c2   :  { %v4121_v38 = vrot.slane %v4120_v63, 4  ;;  %v4065_v6 = vrot.slane %v4064_v2, 2 }
 0x3c4   :  { %v4122_v7 = vadd.f32 %v4121_v38, %v4120_v63  ;;  %v4066_v9 = vadd.f32 %v4065_v6, %v4064_v2 }
 0x3c6   :  { %v4123_v29 = vrot.slane %v4122_v7, 2  ;;  %v4067_v10 = vrot.slane %v4066_v9, 1 }
 0x3c8   :  { %v4124_v12 = vadd.f32 %v4123_v29, %v4122_v7  ;;  %v4068_v16 = vadd.f32 %v4067_v10, %v4066_v9 }
 0x3ca   :  { %v4125_v17 = vrot.slane %v4124_v12, 1  ;;  %v4069_v44 = vmul.f32 0.015625, %v4068_v16 }
 0x3cc   :  { %v4126_v22 = vadd.f32 %v4125_v17, %v4124_v12  ;;  %v4071_v27 = vsel %vm4070_vm4, %v4069_v44, 0.0 }
 0x3ce   :  { %v4127_v28 = vmul.f32 0.015625, %v4126_v22 }
 0x3d0   :  { %v4129_v34 = vsel %vm4128_vm5, %v4127_v28, 0.0 }
 0x3d2   :  { %v4090_v59 = vpop.xlane.xlu1 %4089 }
 0x3d3   :  { %v4091_v36 = vsel %vm4061_vm2, %v4090_v59, 0.0 }
 0x3d4   :  { %v4092_v15 = vrot.slane %v4091_v36, 4 }
 0x3d6   :  { %v4093_v1 = vadd.f32 %v4092_v15, %v4091_v36 }
 0x3d8   :  { %v4094_v3 = vrot.slane %v4093_v1, 2 }
 0x3da   :  { %v4095_v8 = vadd.f32 %v4094_v3, %v4093_v1 }
 0x3dc   :  { %v4096_v50 = vrot.slane %v4095_v8, 1 }
 0x3de   :  { %v4097_v60 = vadd.f32 %v4096_v50, %v4095_v8 }
 0x3e0   :  { %v4098_v40 = vmul.f32 0.015625, %v4097_v60 }
 0x3e2   :  { %v4100_v24 = vsel %vm4099_vm3, %v4098_v40, 0.0 }
 0x3e3   :  { %v4101_v31 = vadd.f32 %v4100_v24, %v4071_v27 }
 0x3e5   :  { %v4130_v39 = vadd.f32 %v4129_v34, %v4101_v31 }
 0x422   :  { %v4148_v14 = vpop.xlane.xlu0 %4147 }
 0x423   :  { %v4149_v13 = vsel %vm4061_vm2, %v4148_v14, 0.0 }
 0x424   :  { %v4150_v19 = vrot.slane %v4149_v13, 4 }
 0x426   :  { %v4151_v21 = vadd.f32 %v4150_v19, %v4149_v13 }
 0x428   :  { %v4152_v23 = vrot.slane %v4151_v21, 2 }
 0x42a   :  { %v4153_v26 = vadd.f32 %v4152_v23, %v4151_v21 }
 0x42c   :  { %v4154_v30 = vrot.slane %v4153_v26, 1 }
 0x42e   :  { %v4155_v33 = vadd.f32 %v4154_v30, %v4153_v26 }
 0x430   :  { %v4156_v37 = vmul.f32 0.015625, %v4155_v33 }
 0x432   :  { %v4158_v4 = vsel %vm4157_vm6, %v4156_v37, 0.0 }
 0x433   :  { %v4159_v41 = vadd.f32 %v4158_v4, %v4130_v39 }
 0x435   :  { %4160 = vst [vmem:[%s5899_s6] sm:$0x1] %v4159_v41 }
 0x436   :  { %4169 = vsyncpa [#allocation3], 1 }
 0x437   :  { %4170 = vsyncpa [#allocation5], 1 }
 0x438   :  { %4171 = vsyncpa [#allocation8], 1 }

// kernel: step.3
= control target key start
LH: loop header
LB: loop body
LE: loop exit
PB: predicated region body
PF: predicated region fallthrough
CT: control target
= control target key end

     0   :  { %s235_s11 = smov 120   ;;  %s236_s12 = smov 104   ;;  %vm30_vm2 = vcmask 58368   ;;  %vm34_vm3 = vcmask 1041408   ;;  %s290_s0 = inlined_call_operand.vmem [shape: f32[2,128], index: 0, kind: input, shape index: {}]   ;;  %s291_s1 = inlined_call_operand.vmem [shape: f32[2,128], index: 1, kind: input, shape index: {}]   ;;  %s292_s2 = inlined_call_operand.vmem [shape: f32[1,128], index: 2, kind: output, shape index: {}]  }
   0x1   :  { %v11_v0 = vld [vmem:[%s290_s0] sm:$0x3]  ;;  %s237_s13 = smov 112   ;;  %s238_s14 = smov 16  }
   0x2   :  { %85 = vrot.lane.b32.xlu0 %v11_v0, %s235_s11  ;;  %93 = vrot.lane.b32.xlu1 %v11_v0, %s236_s12  ;;  %s239_s15 = smov 8   ;;  %s240_s0 = smov 24   ;;  %v13_v14 = vsub.f32 0.0, %v11_v0  ;;  %v12_v21 = vld [vmem:[%s291_s1] sm:$0x3] }
   0x3   :  { %s241_s1 = smov 64   ;;  %s242_s18 = smov 88  }
   0x4   :  { %v14_v15 = vmul.f32 1.442695, %v13_v14 }
   0x6   :  { %89 = vrot.lane.b32.xlu0 %v11_v0, %s237_s13  ;;  %219 = vpow2.f32 %v14_v15 }
  0x10   :  { %v220_v16 = vpop.eup %219 }
  0x11   :  { %v16_v17 = vadd.f32 1.0, %v220_v16 }
  0x13   :  { %221 = vrcp.f32 %v16_v17 }
  0x1d   :  { %v222_v26 = vpop.eup %221 }
  0x1e   :  { %v18_v30 = vmul.f32 16.0, %v222_v26 }
  0x20   :  { %v19_v33 = vmul.f32 0.5, %v18_v30 }
  0x74   :  { %v86_v1 = vpop.permute.xlu0 %85  ;;  %v94_v4 = vpop.permute.xlu1 %93 }
  0x75   :  { %v88_v2 = vmax.f32 %v11_v0, %v86_v1 }
  0x78   :  { %v90_v3 = vpop.permute.xlu0 %89 }
  0x79   :  { %v92_v5 = vmax.f32 %v88_v2, %v90_v3 }
  0x7b   :  { %v96_v6 = vmax.f32 %v92_v5, %v94_v4 }
  0x7d   :  { %113 = vrot.lane.b32.xlu0 %v96_v6, %s238_s14  ;;  %102 = vrot.lane.b32.xlu1 %v96_v6, %s239_s15  ;;  %v97_v13 = vsub.f32 %v11_v0, %v96_v6 }
  0x7f   :  { %v98_v34 = vmul.f32 1.442695, %v97_v13 }
  0x81   :  { %124 = vrot.lane.b32.xlu1 %v96_v6, %s240_s0 }
  0xef   :  { %v114_v7 = vpop.permute.xlu0 %113  ;;  %v103_v8 = vpop.permute.xlu1 %102 }
  0xf0   :  { %v116_v9 = vsub.f32 %v11_v0, %v114_v7  ;;  %v105_v10 = vsub.f32 %v11_v0, %v103_v8 }
  0xf2   :  { %154 = vrot.lane.b32.xlu1 %v116_v9, %s235_s11  ;;  %144 = vrot.lane.b32.xlu0 %v105_v10, %s235_s11  ;;  %v106_v18 = vmul.f32 1.442695, %v105_v10  ;;  %v117_v19 = vmul.f32 1.442695, %v116_v9 }
  0xf3   :  { %v125_v11 = vpop.permute.xlu1 %124 }
  0xf4   :  { %v127_v12 = vsub.f32 %v11_v0, %v125_v11  ;;  %223 = vpow2.f32 %v106_v18 }
  0xf5   :  { %225 = vpow2.f32 %v117_v19 }
  0xf6   :  { %164 = vrot.lane.b32.xlu0 %v127_v12, %s235_s11  ;;  %138 = vrot.lane.b32.xlu1 %v97_v13, %s235_s11  ;;  %v128_v20 = vmul.f32 1.442695, %v127_v12 }
  0xf8   :  { %227 = vpow2.f32 %v128_v20 }
  0xf9   :  { %229 = vpow2.f32 %v98_v34 }
  0xfe   :  { %v224_v29 = vpop.eup %223 }
  0xff   :  { %v226_v31 = vpop.eup %225 }
 0x102   :  { %v228_v32 = vpop.eup %227 }
 0x103   :  { %v230_v44 = vpop.eup %229 }
 0x164   :  { %v145_v22 = vpop.permute.xlu0 %144  ;;  %v155_v23 = vpop.permute.xlu1 %154 }
 0x165   :  { %v147_v24 = vmul.f32 %v145_v22, %v12_v21  ;;  %v157_v25 = vmul.f32 %v155_v23, %v12_v21 }
 0x167   :  { %149 = vrot.lane.b32.xlu0 %v147_v24, %s235_s11  ;;  %159 = vrot.lane.b32.xlu1 %v157_v25, %s237_s13 }
 0x168   :  { %v165_v27 = vpop.permute.xlu0 %164  ;;  %v139_v35 = vpop.permute.xlu1 %138 }
 0x169   :  { %v167_v28 = vmul.f32 %v165_v27, %v12_v21  ;;  %v141_v36 = vmul.f32 %v139_v35, %v12_v21 }
 0x16b   :  { %169 = vrot.lane.b32.xlu0 %v167_v28, %s236_s12  ;;  %109 = vrot.lane.b32.xlu1 %v224_v29, %s235_s11 }
 0x16f   :  { %120 = vrot.lane.b32.xlu0 %v226_v31, %s237_s13  ;;  %131 = vrot.lane.b32.xlu1 %v228_v32, %s236_s12 }
 0x173   :  { %21 = vrot.lane.b32.xlu0 %v19_v33, %s237_s13  ;;  %55 = vrot.lane.b32.xlu1 %v12_v21, %s237_s13 }
 0x177   :  { %178 = vrot.lane.b32.xlu1 %v12_v21, %s236_s12 }
 0x1d9   :  { %v150_v37 = vpop.permute.xlu0 %149  ;;  %v160_v38 = vpop.permute.xlu1 %159 }
 0x1da   :  { %v152_v39 = vadd.f32 %v150_v37, %v141_v36 }
 0x1dc   :  { %v162_v40 = vadd.f32 %v160_v38, %v152_v39  ;;  %v197_v39 = vlaneseq }
 0x1dd   :  { %v170_v41 = vpop.permute.xlu0 %169  ;;  %v110_v42 = vpop.permute.xlu1 %109 }
 0x1de   :  { %v172_v43 = vadd.f32 %v170_v41, %v162_v40  ;;  %v112_v45 = vadd.f32 %v230_v44, %v110_v42  ;;  %v198_v44 = vand.u32 127, %v197_v39 }
 0x1e0   :  { %174 = vrot.lane.b32.xlu0 %v172_v43, %s239_s15  ;;  %vm199_vm4 = vcmp.eq.s32.totalorder %v198_v44, 0  ;;  %vm201_vm5 = vcmp.eq.s32.totalorder %v198_v44, 1 }
 0x1e1   :  { %v121_v46 = vpop.permute.xlu0 %120  ;;  %v132_v47 = vpop.permute.xlu1 %131 }
 0x1e2   :  { %v123_v48 = vadd.f32 %v121_v46, %v112_v45 }
 0x1e4   :  { %v134_v49 = vadd.f32 %v132_v47, %v123_v48  ;;  %27 = vrot.lane.b32.xlu0 %v12_v21, %s241_s1 }
 0x1e5   :  { %v22_v50 = vpop.permute.xlu0 %21  ;;  %v56_v51 = vpop.permute.xlu1 %55 }
 0x1e6   :  { %v24_v52 = vsub.f32 %v18_v30, %v22_v50  ;;  %v25_v53 = vadd.f32 %v22_v50, %v18_v30  ;;  %231 = vlog2.f32 %v134_v49 }
 0x1e8   :  { %v43_v54 = vsub.f32 %v24_v52, %v12_v21  ;;  %v58_v55 = vsub.f32 %v25_v53, %v56_v51 }
 0x1e9   :  { %v179_v5 = vpop.permute.xlu1 %178 }
 0x1ea   :  { %v59_v56 = vand.u32 2147483647, %v58_v55  ;;  %v61_v57 = vmul.f32 0.5, %v58_v55  ;;  %v44_v58 = vand.u32 2147483647, %v43_v54  ;;  %v46_v59 = vmul.f32 0.5, %v43_v54 }
 0x1ec   :  { %v62_v60 = vmul.f32 %v61_v57, %v58_v55  ;;  %vm45_vm0 = vcmp.lt.f32.partialorder %v44_v58, 1.0  ;;  %v47_v61 = vmul.f32 %v46_v59, %v43_v54  ;;  %v209_v62 = vadd.f32 -0.5, %v44_v58 }
 0x1ed   :  { %vm60_vm1 = vcmp.lt.f32.partialorder %v59_v56, 1.0  ;;  %v210_v63 = vadd.f32 -0.5, %v59_v56 }
 0x1ee   :  { %v49_v0 = vsel %vm45_vm0, %v47_v61, %v209_v62 }
 0x1ef   :  { %51 = vrot.lane.b32.xlu1 %v49_v0, %s235_s11  ;;  %v64_v1 = vsel %vm60_vm1, %v62_v60, %v210_v63 }
 0x1f0   :  { %67 = vrot.lane.b32.xlu0 %v64_v1, %s235_s11  ;;  %v232_v2 = vpop.eup %231 }
 0x1f1   :  { %v136_v3 = vmul.f32 0.6931472, %v232_v2 }
 0x252   :  { %v175_v4 = vpop.permute.xlu0 %174 }
 0x253   :  { %v177_v6 = vsub.f32 %v136_v3, %v175_v4 }
 0x255   :  { %v181_v7 = vmul.f32 %v179_v5, %v177_v6 }
 0x256   :  { %v28_v8 = vpop.permute.xlu0 %27 }
 0x257   :  { %183 = vrot.lane.b32.xlu1 %v181_v7, %s242_s18  ;;  %v31_v9 = vsel %vm30_vm2, %v28_v8, 0.0 }
 0x258   :  { %32 = vadd.xlane.f32.xlu0 %v31_v9 }
 0x261   :  { %v52_v10 = vpop.permute.xlu1 %51 }
 0x262   :  { %v54_v11 = vadd.f32 %v52_v10, %v49_v0  ;;  %v68_v13 = vpop.permute.xlu0 %67 }
 0x264   :  { %v65_v12 = vadd.f32 %v64_v1, %v54_v11 }
 0x266   :  { %v70_v14 = vadd.f32 %v68_v13, %v65_v12 }
 0x268   :  { %v71_v15 = vmul.f32 %v70_v14, %v28_v8 }
 0x26a   :  { %v72_v16 = vsel %vm30_vm2, %v71_v15, 0.0 }
 0x27b   :  { %73 = vadd.xlane.f32.xlu1 %v72_v16 }
 0x2c9   :  { %v184_v17 = vpop.permute.xlu1 %183 }
 0x2ca   :  { %v186_v18 = vsel %vm30_vm2, %v184_v17, 0.0 }
 0x2cb   :  { %187 = vadd.xlane.f32.xlu0 %v186_v18 }
 0x2e5   :  { %v33_v19 = vpop.xlane.xlu0 %32 }
 0x2e6   :  { %v35_v20 = vsel %vm34_vm3, %v33_v19, 0.0 }
 0x2e7   :  { %v36_v21 = vrot.slane %v35_v20, 4 }
 0x2e9   :  { %v37_v22 = vadd.f32 %v36_v21, %v35_v20 }
 0x2eb   :  { %v38_v23 = vrot.slane %v37_v22, 2 }
 0x2ed   :  { %v39_v25 = vadd.f32 %v38_v23, %v37_v22 }
 0x2ef   :  { %v40_v27 = vrot.slane %v39_v25, 1 }
 0x2f1   :  { %v41_v29 = vadd.f32 %v40_v27, %v39_v25 }
 0x2f3   :  { %v42_v31 = vmax.f32 %v41_v29, 1.0 }
 0x2f5   :  { %233 = vrcp.f32 %v42_v31 }
 0x2ff   :  { %v234_v43 = vpop.eup %233 }
 0x308   :  { %v74_v24 = vpop.xlane.xlu1 %73 }
 0x309   :  { %v75_v26 = vsel %vm34_vm3, %v74_v24, 0.0 }
 0x30a   :  { %v76_v28 = vrot.slane %v75_v26, 4 }
 0x30c   :  { %v77_v30 = vadd.f32 %v76_v28, %v75_v26 }
 0x30e   :  { %v78_v32 = vrot.slane %v77_v30, 2 }
 0x310   :  { %v79_v33 = vadd.f32 %v78_v32, %v77_v30 }
 0x312   :  { %v80_v37 = vrot.slane %v79_v33, 1 }
 0x314   :  { %v81_v41 = vadd.f32 %v80_v37, %v79_v33 }
 0x316   :  { %v83_v46 = vmul.f32 %v234_v43, %v81_v41 }
 0x318   :  { %v200_v49 = vsel %vm199_vm4, %v83_v46, 0.0 }
 0x358   :  { %v188_v34 = vpop.xlane.xlu0 %187 }
 0x359   :  { %v189_v35 = vsel %vm34_vm3, %v188_v34, 0.0 }
 0x35a   :  { %v190_v36 = vrot.slane %v189_v35, 4 }
 0x35c   :  { %v191_v38 = vadd.f32 %v190_v36, %v189_v35 }
 0x35e   :  { %v192_v40 = vrot.slane %v191_v38, 2 }
 0x360   :  { %v193_v42 = vadd.f32 %v192_v40, %v191_v38 }
 0x362   :  { %v194_v45 = vrot.slane %v193_v42, 1 }
 0x364   :  { %v195_v47 = vadd.f32 %v194_v45, %v193_v42 }
 0x366   :  { %v196_v48 = vmul.f32 %v234_v43, %v195_v47 }
 0x368   :  { %v202_v50 = vsel %vm201_vm5, %v196_v48, 0.0 }
 0x369   :  { %v203_v51 = vadd.f32 %v202_v50, %v200_v49 }
 0x36b   :  { %204 = vst [vmem:[%s292_s2] sm:$0x1] %v203_v51 }

</bundles_post_ra>
